<compile_context>
chip_gen: v6e
topology: v6e:2x2x1
jax: 0.10.0
libtpu: 0.0.40
codegen_flags: <defaults>
</compile_context>

<pallas_src>
import functools
import math

import numpy as np
import jax
import jax.numpy as jnp
from jax.experimental import pallas as pl
from jax.experimental.pallas import tpu as pltpu


OUT_WIDTH = 128   # lane-dense output slab (action mean in lanes [0, A), value in lane A)
STAT_COLS = 128   # lane-dense stats-matmul output (only the first 1-2 columns are used)

PARAM_KEYS = (
    "w_feat", "b_feat", "g_feat", "be_feat",          # 8 feature layers (stacked)
    "w_attn_v", "b_attn_v", "w_attn_o", "b_attn_o",   # global+local MHA (fused, len-1 seq)
    "w_enc1", "vec_enc1", "w_enc2", "vec_enc2",       # cooperation|jamming encoders (fused)
    "w_ac1", "vec_ac1", "w_ac2", "vec_ac2",           # actor|critic branches (fused)
    "w_ac3", "vec_ac3",
    "w_head", "b_head",                               # 3 action heads + value head (fused)
    "stat_feat", "stat_wide", "stat_half", "stat_ac3",  # LayerNorm segment-stat matrices
)


# ----------------------------- math helpers --------------------------------

_GELU_C = math.sqrt(2.0 / math.pi)


def _gelu(x):
    # tanh-approximation GELU: roughly half the VPU ops of the erf polynomial;
    # max abs deviation from exact erf-GELU (~3e-4) is absorbed by the loose
    # reference-B tolerance below.
    return 0.5 * x * (1.0 + jnp.tanh(_GELU_C * (x + 0.044715 * (x * x * x))))


def _dot(x, w):
    # bf16 x bf16 MXU matmul with f32 accumulation (w is stored in bf16).
    return jnp.dot(x.astype(w.dtype), w, preferred_element_type=jnp.float32)


def _seg_layernorm(pre, gamma, beta, seg_mat, boundary=None, eps=1e-5):
    """LayerNorm with per-segment statistics computed on the MXU.

    seg_mat[j, s] = 1/n_s for the n_s true lanes of segment s (0 elsewhere,
    including padded lanes), so one matmul gives per-row/per-segment mean and
    another gives E[x^2]; var = E[x^2] - mean^2.  No XLU cross-lane reduce, no
    sub-128-lane slicing or concat.  boundary=None -> one full-width segment;
    otherwise two segments split at lane `boundary`, broadcast back with a
    lane-iota select.
    """
    mean_s = _dot(pre, seg_mat)           # [B, STAT_COLS]; cols 0..S-1 used
    ex2_s = _dot(pre * pre, seg_mat)
    if boundary is None:
        mu, ex2 = mean_s[:, 0:1], ex2_s[:, 0:1]
    else:
        left = jax.lax.broadcasted_iota(jnp.int32, pre.shape, 1) < boundary
        mu = jnp.where(left, mean_s[:, 0:1], mean_s[:, 1:2])
        ex2 = jnp.where(left, ex2_s[:, 0:1], ex2_s[:, 1:2])
    var = ex2 - mu * mu
    return (pre - mu) * jax.lax.rsqrt(var + eps) * gamma + beta


# Fused forward-pass math.  Works both on Pallas Refs (inside the kernel) and
# on plain arrays (pure-JAX reference), since all accesses use explicit
# indexing that behaves identically for both.
def forward_math(x, P, n_act, *, residual0=False):
    wf, bfeat, gfeat, befeat = P["w_feat"], P["b_feat"], P["g_feat"], P["be_feat"]
    H = wf.shape[-1]
    H2 = H // 2

    stat_feat = P["stat_feat"][...]

    # 8 feature layers: Linear -> LayerNorm -> GELU (+ residual when in == out dim)
    h = x
    for i in range(wf.shape[0]):
        res = h if (i > 0 or residual0) else None
        pre = _dot(h, wf[i]) + bfeat[i:i + 1, :]
        z = _gelu(_seg_layernorm(pre, gfeat[i:i + 1, :], befeat[i:i + 1, :], stat_feat))
        h = z + res if res is not None else z

    # global + local MultiheadAttention on a length-1 sequence:
    # softmax over one key == 1  =>  attn(x,x,x) == out_proj(v_proj(x)).
    # Both attentions are fused: [H,2H] V-proj, [2H,H] out-proj, summed bias.
    v = _dot(h, P["w_attn_v"][...]) + P["b_attn_v"][...]
    h = h + _dot(v, P["w_attn_o"][...]) + P["b_attn_o"][...]

    def fused(z, wk, vk, sk, boundary):
        # One matmul for two parallel branches; segmented LayerNorm per half.
        vec = P[vk]
        pre = _dot(z, P[wk][...]) + vec[0:1, :]
        return _gelu(_seg_layernorm(pre, vec[1:2, :], vec[2:3, :], P[sk][...], boundary))

    z = fused(h, "w_enc1", "vec_enc1", "stat_wide", H)           # [coop | jam], width 2H
    combined = fused(z, "w_enc2", "vec_enc2", "stat_half", H2)   # == combined_features, width H

    a = fused(combined, "w_ac1", "vec_ac1", "stat_wide", H)      # [actor | critic], width 2H
    a = fused(a, "w_ac2", "vec_ac2", "stat_half", H2)            # width H
    a = fused(a, "w_ac3", "vec_ac3", "stat_ac3", H2)             # width H (true halves H/4, zero-padded)

    out = _dot(a, P["w_head"][...]) + P["b_head"][...]           # [B, OUT_WIDTH]
    lanes = jax.lax.broadcasted_iota(jnp.int32, out.shape, 1)
    # tanh only on the action-mean lanes; value lane (and zero padding) untouched.
    return jnp.where(lanes < n_act, jnp.tanh(out), out)


# ------------------------------ Pallas kernel -------------------------------

def actor_critic_kernel(*refs, n_act, residual0):
    x_ref = refs[0]
    out_ref = refs[-1]
    P = dict(zip(PARAM_KEYS, refs[1:-1]))
    out = forward_math(x_ref[...], P, n_act, residual0=residual0)
    out_ref[...] = out.astype(out_ref.dtype)


def _round_up(n, m):
    return ((n + m - 1) // m) * m


def ultra_actor_critic_forward(state, packed, log_std, *, block_b=256):
    B, S = state.shape
    H = packed["w_feat"].shape[-1]
    A = log_std.shape[0]
    OW = packed["w_head"].shape[-1]
    assert S <= H, "state_dim > hidden_dim not supported by the packed layout"
    assert A + 1 <= OW

    # Lane-dense input: pad features to H (weight rows S..H-1 are zero -> exact).
    x = state if S == H else jnp.pad(state, ((0, 0), (0, H - S)))

    # Batch tile: multiple of 8 sublanes; keep >= 2 grid steps whenever possible
    # so the "parallel" axis can be split across the two TensorCores on v7x.
    b8 = _round_up(B, 8)
    bb = min(block_b, b8)
    if b8 >= 16:
        bb = min(bb, _round_up(b8 // 2, 8))
    bb = _round_up(bb, 8)
    Bp = _round_up(B, bb)
    if Bp != B:
        x = jnp.pad(x, ((0, Bp - B), (0, 0)))

    in_specs = [pl.BlockSpec((bb, H), lambda i: (i, 0))]
    for k in PARAM_KEYS:
        nd = packed[k].ndim
        in_specs.append(pl.BlockSpec(packed[k].shape, lambda i, nd=nd: (0,) * nd))
    out_spec = pl.BlockSpec((bb, OW), lambda i: (i, 0))

    kernel = functools.partial(actor_critic_kernel, n_act=A, residual0=(S == H))
    out = pl.pallas_call(
        kernel,
        grid=(Bp // bb,),
        in_specs=in_specs,
        out_specs=out_spec,
        out_shape=jax.ShapeDtypeStruct((Bp, OW), jnp.float32),
        compiler_params=pltpu.CompilerParams(
            dimension_semantics=("parallel",),
            vmem_limit_bytes=32 * 1024 * 1024,
        ),
    )(x, *[packed[k] for k in PARAM_KEYS])

    action_mean = out[:B, :A]
    value = out[:B, A:A + 1]
    # state-independent std: trivial 1-D op, done in plain JAX (glue)
    action_std = jnp.exp(jnp.clip(log_std, -20.0, 2.0))
    return action_mean, action_std, value


# --------------------------- parameter construction -------------------------

def init_raw_params(key, state_dim, action_dim, hidden_dim):
    """Per-layer parameters, [in, out] weight layout (transposed vs PyTorch)."""
    H, H2, H4, A3 = hidden_dim, hidden_dim // 2, hidden_dim // 4, action_dim // 3
    keys = iter(jax.random.split(key, 128))

    def xavier(i, o, gain=0.02):
        lim = gain * math.sqrt(6.0 / (i + o))
        return jax.random.uniform(next(keys), (i, o), jnp.float32, -lim, lim)

    z = lambda d: jnp.zeros((d,), jnp.float32)
    o = lambda d: jnp.ones((d,), jnp.float32)

    raw = {}
    raw["feat"] = []
    din = state_dim
    for _ in range(8):
        raw["feat"].append((xavier(din, H), z(H), o(H), z(H)))
        din = H
    # V-projection (MHA default init, gain 1) + out_proj for global / local attention
    raw["attn"] = [(xavier(H, H, 1.0), z(H), xavier(H, H), z(H)) for _ in range(2)]
    raw["coop"] = (xavier(H, H), z(H), o(H), z(H), xavier(H, H2), z(H2), o(H2), z(H2))
    raw["jam"] = (xavier(H, H), z(H), o(H), z(H), xavier(H, H2), z(H2), o(H2), z(H2))
    raw["actor"] = [(xavier(H, H), z(H), o(H), z(H)),
                    (xavier(H, H2), z(H2), o(H2), z(H2)),
                    (xavier(H2, H4), z(H4), o(H4), z(H4))]
    raw["heads"] = [(xavier(H4, A3), z(A3)) for _ in range(3)]   # movement, jamming, coop
    raw["critic"] = [(xavier(H, H), z(H), o(H), z(H)),
                     (xavier(H, H2), z(H2), o(H2), z(H2)),
                     (xavier(H2, H4), z(H4), o(H4), z(H4))]
    raw["value"] = (xavier(H4, 1), z(1))
    log_std = jnp.full((action_dim,), -0.3, jnp.float32)
    return raw, log_std


def _seg_matrix(width, segments, dtype, ncols=STAT_COLS):
    """seg_matrix[j, s] = 1/n_s for the n_s true lanes of segment s; 0 elsewhere.

    Columns are padded to `ncols` so the stats matmul output is lane-dense
    (N < 128 costs the same MXU time anyway).
    """
    m = np.zeros((width, ncols), np.float32)
    for s, (start, n) in enumerate(segments):
        m[start:start + n, s] = 1.0 / n
    return jnp.asarray(m, dtype)


def pack_params(raw, state_dim, hidden_dim, action_dim,
                out_width=OUT_WIDTH, wdtype=jnp.bfloat16):
    H, H2, H4 = hidden_dim, hidden_dim // 2, hidden_dim // 4
    A = action_dim

    def fuse_wide(pa, pb):   # shared input -> side-by-side output columns
        wa, ba, ga, ea = pa
        wb, bb_, gb, eb = pb
        w = jnp.concatenate([wa, wb], axis=1).astype(wdtype)
        vec = jnp.stack([jnp.concatenate([ba, bb_]),
                         jnp.concatenate([ga, gb]),
                         jnp.concatenate([ea, eb])])
        return w, vec

    def fuse_diag(pa, pb, pad_out_to=None):
        # independent halves -> block-diagonal weight; optionally zero-pad each
        # half's output band to `pad_out_to` lanes (padded gamma/beta are 0 so
        # the padded lanes of the segmented LayerNorm output stay exactly 0).
        wa, ba, ga, ea = pa
        wb, bb_, gb, eb = pb
        n1, n2 = wa.shape[1], wb.shape[1]
        c1 = pad_out_to if pad_out_to is not None else n1
        c2 = pad_out_to if pad_out_to is not None else n2
        w = jnp.zeros((wa.shape[0] + wb.shape[0], c1 + c2), jnp.float32)
        w = w.at[:wa.shape[0], :n1].set(wa).at[wa.shape[0]:, c1:c1 + n2].set(wb)

        def padvec(v1, v2):
            out = jnp.zeros((c1 + c2,), jnp.float32)
            return out.at[:n1].set(v1).at[c1:c1 + n2].set(v2)

        vec = jnp.stack([padvec(ba, bb_), padvec(ga, gb), padvec(ea, eb)])
        return w.astype(wdtype), vec

    p = {}
    w0 = jnp.zeros((H, H), jnp.float32).at[:state_dim, :].set(raw["feat"][0][0])
    p["w_feat"] = jnp.stack([w0] + [raw["feat"][i][0] for i in range(1, 8)]).astype(wdtype)
    p["b_feat"] = jnp.stack([raw["feat"][i][1] for i in range(8)])
    p["g_feat"] = jnp.stack([raw["feat"][i][2] for i in range(8)])
    p["be_feat"] = jnp.stack([raw["feat"][i][3] for i in range(8)])

    (wvg, bvg, wog, bog), (wvl, bvl, wol, bol) = raw["attn"]
    p["w_attn_v"] = jnp.concatenate([wvg, wvl], axis=1).astype(wdtype)
    p["b_attn_v"] = jnp.concatenate([bvg, bvl])[None, :]
    p["w_attn_o"] = jnp.concatenate([wog, wol], axis=0).astype(wdtype)
    p["b_attn_o"] = (bog + bol)[None, :]

    p["w_enc1"], p["vec_enc1"] = fuse_wide(raw["coop"][0:4], raw["jam"][0:4])
    p["w_enc2"], p["vec_enc2"] = fuse_diag(raw["coop"][4:8], raw["jam"][4:8])

    p["w_ac1"], p["vec_ac1"] = fuse_wide(raw["actor"][0], raw["critic"][0])
    p["w_ac2"], p["vec_ac2"] = fuse_diag(raw["actor"][1], raw["critic"][1])
    # ac3: each H/4-wide half zero-padded to H/2 lanes -> lane-dense [*, H] output
    p["w_ac3"], p["vec_ac3"] = fuse_diag(raw["actor"][2], raw["critic"][2], pad_out_to=H2)

    # head: rows [0,H4) -> action heads, rows [H2,H2+H4) -> value column; padded rows 0.
    w_heads = jnp.concatenate([w for w, _ in raw["heads"]], axis=1)   # [H4, A]
    b_heads = jnp.concatenate([b for _, b in raw["heads"]])           # [A]
    wv_, bv_ = raw["value"]
    w_head = jnp.zeros((H, out_width), jnp.float32)
    w_head = w_head.at[:H4, :A].set(w_heads).at[H2:H2 + H4, A].set(wv_[:, 0])
    b_head = jnp.zeros((out_width,), jnp.float32).at[:A].set(b_heads).at[A].set(bv_[0])
    p["w_head"] = w_head.astype(wdtype)
    p["b_head"] = b_head[None, :]

    # LayerNorm segment-stat matrices (mean / E[x^2] via MXU matmul).
    p["stat_feat"] = _seg_matrix(H, [(0, H)], wdtype)
    p["stat_wide"] = _seg_matrix(2 * H, [(0, H), (H, H)], wdtype)
    p["stat_half"] = _seg_matrix(H, [(0, H2), (H2, H2)], wdtype)
    p["stat_ac3"] = _seg_matrix(H, [(0, H4), (H2, H4)], wdtype)
    return p


# --------------------------- pure-JAX f32 reference --------------------------

def reference_forward_f32(state, raw):
    """Unfused float32 reference in the original per-layer form of the module."""
    def ln(x, g, b, eps=1e-5):
        mu = jnp.mean(x, -1, keepdims=True)
        var = jnp.mean(jnp.square(x - mu), -1, keepdims=True)
        return (x - mu) / jnp.sqrt(var + eps) * g + b

    def gelu(x):
        return 0.5 * x * (1.0 + jax.lax.erf(x / math.sqrt(2.0)))

    x = state
    for w, b, g, be in raw["feat"]:
        res = x if x.shape[-1] == w.shape[0] else None
        y = gelu(ln(x @ w + b, g, be))
        x = y + res if (res is not None and res.shape == y.shape) else y

    attn = 0.0  # length-1-sequence MHA == out_proj(v_proj(x)) -- exact
    for wv, bv, wo, bo in raw["attn"]:
        attn = attn + (x @ wv + bv) @ wo + bo
    x = x + attn

    def enc(z, prm):
        w1, b1, g1, be1, w2, b2, g2, be2 = prm
        z = gelu(ln(z @ w1 + b1, g1, be1))
        return gelu(ln(z @ w2 + b2, g2, be2))

    combined = jnp.concatenate([enc(x, raw["coop"]), enc(x, raw["jam"])], -1)

    a = combined
    for w, b, g, be in raw["actor"]:
        a = gelu(ln(a @ w + b, g, be))
    mean = jnp.concatenate([jnp.tanh(a @ w + b) for w, b in raw["heads"]], -1)

    v = combined
    for w, b, g, be in raw["critic"]:
        v = gelu(ln(v @ w + b, g, be))
    wv_, bv_ = raw["value"]
    value = v @ wv_ + bv_
    return mean, value


# ----------------------------------- main -----------------------------------

if __name__ == "__main__":
    STATE_DIM, ACTION_DIM, HIDDEN, BATCH = 32, 12, 128, 8

    key = jax.random.PRNGKey(0)
    pkey, xkey = jax.random.split(key)
    raw, log_std = init_raw_params(pkey, STATE_DIM, ACTION_DIM, HIDDEN)
    packed = pack_params(raw, STATE_DIM, HIDDEN, ACTION_DIM)
    state = jax.random.normal(xkey, (BATCH, STATE_DIM), jnp.float32)

    mean, std, value = jax.block_until_ready(
        ultra_actor_critic_forward(state, packed, log_std)
    )

    assert mean.shape == (BATCH, ACTION_DIM) and value.shape == (BATCH, 1)
    assert std.shape == (ACTION_DIM,)
    assert bool(jnp.all(jnp.isfinite(mean))) and bool(jnp.all(jnp.isfinite(value)))

    # Reference A (tight): identical fused math (bf16 weights, matmul LN stats,
    # tanh-GELU) run through plain XLA -- checks the Pallas lowering itself.
    x_pad = jnp.pad(state, ((0, 0), (0, HIDDEN - STATE_DIM)))
    slab = forward_math(x_pad, packed, ACTION_DIM, residual0=(STATE_DIM == HIDDEN))
    mean_a, value_a = slab[:, :ACTION_DIM], slab[:, ACTION_DIM:ACTION_DIM + 1]
    assert bool(jnp.allclose(mean, mean_a, atol=2e-3, rtol=1e-2)), "mean vs fused ref"
    assert bool(jnp.allclose(value, value_a, atol=2e-3, rtol=1e-2)), "value vs fused ref"

    # Reference B (loose): unfused float32 reference in the original per-layer
    # form; covers the packing/fusion algebra plus the bf16-weight, matmul-LN
    # and tanh-GELU approximations.
    mean_b, value_b = reference_forward_f32(state, raw)
    assert bool(jnp.allclose(mean, mean_b, atol=5e-3, rtol=5e-2)), "mean vs f32 ref"
    assert bool(jnp.allclose(value, value_b, atol=5e-3, rtol=5e-2)), "value vs f32 ref"

    std_ref = jnp.exp(jnp.clip(log_std, -20.0, 2.0))
    assert bool(jnp.allclose(std, std_ref))

    print("KERNEL_OK")
</pallas_src>

<mosaic_0001>
module attributes {stable_mosaic.version = 11 : i64} {
  func.func @actor_critic_kernel(%arg0: i32, %arg1: memref<8x128xf32, #tpu.memory_space<vmem>>, %arg2: memref<8x128x128xbf16, #tpu.memory_space<vmem>>, %arg3: memref<8x128xf32, #tpu.memory_space<vmem>>, %arg4: memref<8x128xf32, #tpu.memory_space<vmem>>, %arg5: memref<8x128xf32, #tpu.memory_space<vmem>>, %arg6: memref<128x256xbf16, #tpu.memory_space<vmem>>, %arg7: memref<1x256xf32, #tpu.memory_space<vmem>>, %arg8: memref<256x128xbf16, #tpu.memory_space<vmem>>, %arg9: memref<1x128xf32, #tpu.memory_space<vmem>>, %arg10: memref<128x256xbf16, #tpu.memory_space<vmem>>, %arg11: memref<3x256xf32, #tpu.memory_space<vmem>>, %arg12: memref<256x128xbf16, #tpu.memory_space<vmem>>, %arg13: memref<3x128xf32, #tpu.memory_space<vmem>>, %arg14: memref<128x256xbf16, #tpu.memory_space<vmem>>, %arg15: memref<3x256xf32, #tpu.memory_space<vmem>>, %arg16: memref<256x128xbf16, #tpu.memory_space<vmem>>, %arg17: memref<3x128xf32, #tpu.memory_space<vmem>>, %arg18: memref<128x128xbf16, #tpu.memory_space<vmem>>, %arg19: memref<3x128xf32, #tpu.memory_space<vmem>>, %arg20: memref<128x128xbf16, #tpu.memory_space<vmem>>, %arg21: memref<1x128xf32, #tpu.memory_space<vmem>>, %arg22: memref<128x128xbf16, #tpu.memory_space<vmem>>, %arg23: memref<256x128xbf16, #tpu.memory_space<vmem>>, %arg24: memref<128x128xbf16, #tpu.memory_space<vmem>>, %arg25: memref<128x128xbf16, #tpu.memory_space<vmem>>, %arg26: memref<8x128xf32, #tpu.memory_space<vmem>>) attributes {dimension_semantics = [#tpu.dimension_semantics<parallel>], iteration_bounds = array<i64: 1>, scalar_prefetch = 0 : i64, scratch_operands = 0 : i64, tpu.core_type = #tpu.core_type<tc>, window_params = [{transform_indices = @transform_0, window_bounds = array<i64: 8, 128>}, {pipeline_mode = #tpu.pipeline_mode<synchronous>, transform_indices = @transform_1, window_bounds = array<i64: 8, 128, 128>}, {pipeline_mode = #tpu.pipeline_mode<synchronous>, transform_indices = @transform_2, window_bounds = array<i64: 8, 128>}, {pipeline_mode = #tpu.pipeline_mode<synchronous>, transform_indices = @transform_3, window_bounds = array<i64: 8, 128>}, {pipeline_mode = #tpu.pipeline_mode<synchronous>, transform_indices = @transform_4, window_bounds = array<i64: 8, 128>}, {pipeline_mode = #tpu.pipeline_mode<synchronous>, transform_indices = @transform_5, window_bounds = array<i64: 128, 256>}, {pipeline_mode = #tpu.pipeline_mode<synchronous>, transform_indices = @transform_6, window_bounds = array<i64: 1, 256>}, {pipeline_mode = #tpu.pipeline_mode<synchronous>, transform_indices = @transform_7, window_bounds = array<i64: 256, 128>}, {pipeline_mode = #tpu.pipeline_mode<synchronous>, transform_indices = @transform_8, window_bounds = array<i64: 1, 128>}, {pipeline_mode = #tpu.pipeline_mode<synchronous>, transform_indices = @transform_9, window_bounds = array<i64: 128, 256>}, {pipeline_mode = #tpu.pipeline_mode<synchronous>, transform_indices = @transform_10, window_bounds = array<i64: 3, 256>}, {pipeline_mode = #tpu.pipeline_mode<synchronous>, transform_indices = @transform_11, window_bounds = array<i64: 256, 128>}, {pipeline_mode = #tpu.pipeline_mode<synchronous>, transform_indices = @transform_12, window_bounds = array<i64: 3, 128>}, {pipeline_mode = #tpu.pipeline_mode<synchronous>, transform_indices = @transform_13, window_bounds = array<i64: 128, 256>}, {pipeline_mode = #tpu.pipeline_mode<synchronous>, transform_indices = @transform_14, window_bounds = array<i64: 3, 256>}, {pipeline_mode = #tpu.pipeline_mode<synchronous>, transform_indices = @transform_15, window_bounds = array<i64: 256, 128>}, {pipeline_mode = #tpu.pipeline_mode<synchronous>, transform_indices = @transform_16, window_bounds = array<i64: 3, 128>}, {pipeline_mode = #tpu.pipeline_mode<synchronous>, transform_indices = @transform_17, window_bounds = array<i64: 128, 128>}, {pipeline_mode = #tpu.pipeline_mode<synchronous>, transform_indices = @transform_18, window_bounds = array<i64: 3, 128>}, {pipeline_mode = #tpu.pipeline_mode<synchronous>, transform_indices = @transform_19, window_bounds = array<i64: 128, 128>}, {pipeline_mode = #tpu.pipeline_mode<synchronous>, transform_indices = @transform_20, window_bounds = array<i64: 1, 128>}, {pipeline_mode = #tpu.pipeline_mode<synchronous>, transform_indices = @transform_21, window_bounds = array<i64: 128, 128>}, {pipeline_mode = #tpu.pipeline_mode<synchronous>, transform_indices = @transform_22, window_bounds = array<i64: 256, 128>}, {pipeline_mode = #tpu.pipeline_mode<synchronous>, transform_indices = @transform_23, window_bounds = array<i64: 128, 128>}, {pipeline_mode = #tpu.pipeline_mode<synchronous>, transform_indices = @transform_24, window_bounds = array<i64: 128, 128>}, {transform_indices = @transform_25, window_bounds = array<i64: 8, 128>}]} {
    %c0 = arith.constant 0 : index
    %c0_0 = arith.constant 0 : index
    %0 = vector.load %arg1[%c0, %c0_0] : memref<8x128xf32, #tpu.memory_space<vmem>>, vector<8x128xf32>
    %c0_1 = arith.constant 0 : index
    %c0_2 = arith.constant 0 : index
    %1 = vector.load %arg22[%c0_1, %c0_2] : memref<128x128xbf16, #tpu.memory_space<vmem>>, vector<128x128xbf16>
    %c0_3 = arith.constant 0 : index
    %c0_4 = arith.constant 0 : index
    %c0_5 = arith.constant 0 : index
    %2 = vector.load %arg2[%c0_3, %c0_4, %c0_5] : memref<8x128x128xbf16, #tpu.memory_space<vmem>>, vector<1x128x128xbf16>
    %3 = vector.shape_cast %2 : vector<1x128x128xbf16> to vector<128x128xbf16>
    %4 = arith.truncf %0 : vector<8x128xf32> to vector<8x128xbf16>
    %cst = arith.constant dense<0.000000e+00> : vector<8x128xf32>
    %5 = tpu.matmul %4, %3, %cst {dimension_numbers = #tpu.dot_dimension_numbers<[1], [0], [0], [1], [0, 0, 1, 1], [], []>} : vector<8x128xbf16>, vector<128x128xbf16>, vector<8x128xf32> -> vector<8x128xf32>
    %c0_6 = arith.constant 0 : index
    %c0_7 = arith.constant 0 : index
    %6 = vector.load %arg3[%c0_6, %c0_7] : memref<8x128xf32, #tpu.memory_space<vmem>>, vector<1x128xf32>
    %7 = vector.broadcast %6 : vector<1x128xf32> to vector<8x128xf32>
    %8 = arith.addf %5, %7 : vector<8x128xf32>
    %c0_8 = arith.constant 0 : index
    %c0_9 = arith.constant 0 : index
    %9 = vector.load %arg4[%c0_8, %c0_9] : memref<8x128xf32, #tpu.memory_space<vmem>>, vector<1x128xf32>
    %c0_10 = arith.constant 0 : index
    %c0_11 = arith.constant 0 : index
    %10 = vector.load %arg5[%c0_10, %c0_11] : memref<8x128xf32, #tpu.memory_space<vmem>>, vector<1x128xf32>
    %11 = arith.truncf %8 : vector<8x128xf32> to vector<8x128xbf16>
    %cst_12 = arith.constant dense<0.000000e+00> : vector<8x128xf32>
    %12 = tpu.matmul %11, %1, %cst_12 {dimension_numbers = #tpu.dot_dimension_numbers<[1], [0], [0], [1], [0, 0, 1, 1], [], []>} : vector<8x128xbf16>, vector<128x128xbf16>, vector<8x128xf32> -> vector<8x128xf32>
    %13 = arith.mulf %8, %8 : vector<8x128xf32>
    %14 = arith.truncf %13 : vector<8x128xf32> to vector<8x128xbf16>
    %cst_13 = arith.constant dense<0.000000e+00> : vector<8x128xf32>
    %15 = tpu.matmul %14, %1, %cst_13 {dimension_numbers = #tpu.dot_dimension_numbers<[1], [0], [0], [1], [0, 0, 1, 1], [], []>} : vector<8x128xbf16>, vector<128x128xbf16>, vector<8x128xf32> -> vector<8x128xf32>
    %16 = vector.extract_strided_slice %12 {offsets = [0, 0], sizes = [8, 1], strides = [1, 1]} : vector<8x128xf32> to vector<8x1xf32>
    %17 = vector.extract_strided_slice %15 {offsets = [0, 0], sizes = [8, 1], strides = [1, 1]} : vector<8x128xf32> to vector<8x1xf32>
    %18 = arith.mulf %16, %16 : vector<8x1xf32>
    %19 = arith.subf %17, %18 : vector<8x1xf32>
    %20 = vector.broadcast %16 : vector<8x1xf32> to vector<8x128xf32>
    %21 = arith.subf %8, %20 : vector<8x128xf32>
    %cst_14 = arith.constant 9.99999974E-6 : f32
    %22 = vector.broadcast %cst_14 : f32 to vector<8x1xf32>
    %23 = arith.addf %19, %22 : vector<8x1xf32>
    %24 = math.rsqrt %23 : vector<8x1xf32>
    %25 = vector.broadcast %24 : vector<8x1xf32> to vector<8x128xf32>
    %26 = arith.mulf %21, %25 : vector<8x128xf32>
    %27 = vector.broadcast %9 : vector<1x128xf32> to vector<8x128xf32>
    %28 = arith.mulf %26, %27 : vector<8x128xf32>
    %29 = vector.broadcast %10 : vector<1x128xf32> to vector<8x128xf32>
    %30 = arith.addf %28, %29 : vector<8x128xf32>
    %cst_15 = arith.constant 5.000000e-01 : f32
    %31 = vector.broadcast %cst_15 : f32 to vector<8x128xf32>
    %32 = arith.mulf %31, %30 : vector<8x128xf32>
    %33 = arith.mulf %30, %30 : vector<8x128xf32>
    %34 = arith.mulf %33, %30 : vector<8x128xf32>
    %cst_16 = arith.constant 4.471500e-02 : f32
    %35 = vector.broadcast %cst_16 : f32 to vector<8x128xf32>
    %36 = arith.mulf %35, %34 : vector<8x128xf32>
    %37 = arith.addf %30, %36 : vector<8x128xf32>
    %cst_17 = arith.constant 0.797884583 : f32
    %38 = vector.broadcast %cst_17 : f32 to vector<8x128xf32>
    %39 = arith.mulf %38, %37 : vector<8x128xf32>
    %40 = math.tanh %39 : vector<8x128xf32>
    %cst_18 = arith.constant 1.000000e+00 : f32
    %41 = vector.broadcast %cst_18 : f32 to vector<8x128xf32>
    %42 = arith.addf %41, %40 : vector<8x128xf32>
    %43 = arith.mulf %32, %42 : vector<8x128xf32>
    %c1 = arith.constant 1 : index
    %c0_19 = arith.constant 0 : index
    %c0_20 = arith.constant 0 : index
    %44 = vector.load %arg2[%c1, %c0_19, %c0_20] : memref<8x128x128xbf16, #tpu.memory_space<vmem>>, vector<1x128x128xbf16>
    %45 = vector.shape_cast %44 : vector<1x128x128xbf16> to vector<128x128xbf16>
    %46 = arith.truncf %43 : vector<8x128xf32> to vector<8x128xbf16>
    %cst_21 = arith.constant dense<0.000000e+00> : vector<8x128xf32>
    %47 = tpu.matmul %46, %45, %cst_21 {dimension_numbers = #tpu.dot_dimension_numbers<[1], [0], [0], [1], [0, 0, 1, 1], [], []>} : vector<8x128xbf16>, vector<128x128xbf16>, vector<8x128xf32> -> vector<8x128xf32>
    %c1_22 = arith.constant 1 : index
    %c0_23 = arith.constant 0 : index
    %48 = vector.load %arg3[%c1_22, %c0_23] : memref<8x128xf32, #tpu.memory_space<vmem>>, vector<1x128xf32>
    %49 = vector.broadcast %48 : vector<1x128xf32> to vector<8x128xf32>
    %50 = arith.addf %47, %49 : vector<8x128xf32>
    %c1_24 = arith.constant 1 : index
    %c0_25 = arith.constant 0 : index
    %51 = vector.load %arg4[%c1_24, %c0_25] : memref<8x128xf32, #tpu.memory_space<vmem>>, vector<1x128xf32>
    %c1_26 = arith.constant 1 : index
    %c0_27 = arith.constant 0 : index
    %52 = vector.load %arg5[%c1_26, %c0_27] : memref<8x128xf32, #tpu.memory_space<vmem>>, vector<1x128xf32>
    %53 = arith.truncf %50 : vector<8x128xf32> to vector<8x128xbf16>
    %cst_28 = arith.constant dense<0.000000e+00> : vector<8x128xf32>
    %54 = tpu.matmul %53, %1, %cst_28 {dimension_numbers = #tpu.dot_dimension_numbers<[1], [0], [0], [1], [0, 0, 1, 1], [], []>} : vector<8x128xbf16>, vector<128x128xbf16>, vector<8x128xf32> -> vector<8x128xf32>
    %55 = arith.mulf %50, %50 : vector<8x128xf32>
    %56 = arith.truncf %55 : vector<8x128xf32> to vector<8x128xbf16>
    %cst_29 = arith.constant dense<0.000000e+00> : vector<8x128xf32>
    %57 = tpu.matmul %56, %1, %cst_29 {dimension_numbers = #tpu.dot_dimension_numbers<[1], [0], [0], [1], [0, 0, 1, 1], [], []>} : vector<8x128xbf16>, vector<128x128xbf16>, vector<8x128xf32> -> vector<8x128xf32>
    %58 = vector.extract_strided_slice %54 {offsets = [0, 0], sizes = [8, 1], strides = [1, 1]} : vector<8x128xf32> to vector<8x1xf32>
    %59 = vector.extract_strided_slice %57 {offsets = [0, 0], sizes = [8, 1], strides = [1, 1]} : vector<8x128xf32> to vector<8x1xf32>
    %60 = arith.mulf %58, %58 : vector<8x1xf32>
    %61 = arith.subf %59, %60 : vector<8x1xf32>
    %62 = vector.broadcast %58 : vector<8x1xf32> to vector<8x128xf32>
    %63 = arith.subf %50, %62 : vector<8x128xf32>
    %cst_30 = arith.constant 9.99999974E-6 : f32
    %64 = vector.broadcast %cst_30 : f32 to vector<8x1xf32>
    %65 = arith.addf %61, %64 : vector<8x1xf32>
    %66 = math.rsqrt %65 : vector<8x1xf32>
    %67 = vector.broadcast %66 : vector<8x1xf32> to vector<8x128xf32>
    %68 = arith.mulf %63, %67 : vector<8x128xf32>
    %69 = vector.broadcast %51 : vector<1x128xf32> to vector<8x128xf32>
    %70 = arith.mulf %68, %69 : vector<8x128xf32>
    %71 = vector.broadcast %52 : vector<1x128xf32> to vector<8x128xf32>
    %72 = arith.addf %70, %71 : vector<8x128xf32>
    %cst_31 = arith.constant 5.000000e-01 : f32
    %73 = vector.broadcast %cst_31 : f32 to vector<8x128xf32>
    %74 = arith.mulf %73, %72 : vector<8x128xf32>
    %75 = arith.mulf %72, %72 : vector<8x128xf32>
    %76 = arith.mulf %75, %72 : vector<8x128xf32>
    %cst_32 = arith.constant 4.471500e-02 : f32
    %77 = vector.broadcast %cst_32 : f32 to vector<8x128xf32>
    %78 = arith.mulf %77, %76 : vector<8x128xf32>
    %79 = arith.addf %72, %78 : vector<8x128xf32>
    %cst_33 = arith.constant 0.797884583 : f32
    %80 = vector.broadcast %cst_33 : f32 to vector<8x128xf32>
    %81 = arith.mulf %80, %79 : vector<8x128xf32>
    %82 = math.tanh %81 : vector<8x128xf32>
    %cst_34 = arith.constant 1.000000e+00 : f32
    %83 = vector.broadcast %cst_34 : f32 to vector<8x128xf32>
    %84 = arith.addf %83, %82 : vector<8x128xf32>
    %85 = arith.mulf %74, %84 : vector<8x128xf32>
    %86 = arith.addf %85, %43 : vector<8x128xf32>
    %c2 = arith.constant 2 : index
    %c0_35 = arith.constant 0 : index
    %c0_36 = arith.constant 0 : index
    %87 = vector.load %arg2[%c2, %c0_35, %c0_36] : memref<8x128x128xbf16, #tpu.memory_space<vmem>>, vector<1x128x128xbf16>
    %88 = vector.shape_cast %87 : vector<1x128x128xbf16> to vector<128x128xbf16>
    %89 = arith.truncf %86 : vector<8x128xf32> to vector<8x128xbf16>
    %cst_37 = arith.constant dense<0.000000e+00> : vector<8x128xf32>
    %90 = tpu.matmul %89, %88, %cst_37 {dimension_numbers = #tpu.dot_dimension_numbers<[1], [0], [0], [1], [0, 0, 1, 1], [], []>} : vector<8x128xbf16>, vector<128x128xbf16>, vector<8x128xf32> -> vector<8x128xf32>
    %c2_38 = arith.constant 2 : index
    %c0_39 = arith.constant 0 : index
    %91 = vector.load %arg3[%c2_38, %c0_39] : memref<8x128xf32, #tpu.memory_space<vmem>>, vector<1x128xf32>
    %92 = vector.broadcast %91 : vector<1x128xf32> to vector<8x128xf32>
    %93 = arith.addf %90, %92 : vector<8x128xf32>
    %c2_40 = arith.constant 2 : index
    %c0_41 = arith.constant 0 : index
    %94 = vector.load %arg4[%c2_40, %c0_41] : memref<8x128xf32, #tpu.memory_space<vmem>>, vector<1x128xf32>
    %c2_42 = arith.constant 2 : index
    %c0_43 = arith.constant 0 : index
    %95 = vector.load %arg5[%c2_42, %c0_43] : memref<8x128xf32, #tpu.memory_space<vmem>>, vector<1x128xf32>
    %96 = arith.truncf %93 : vector<8x128xf32> to vector<8x128xbf16>
    %cst_44 = arith.constant dense<0.000000e+00> : vector<8x128xf32>
    %97 = tpu.matmul %96, %1, %cst_44 {dimension_numbers = #tpu.dot_dimension_numbers<[1], [0], [0], [1], [0, 0, 1, 1], [], []>} : vector<8x128xbf16>, vector<128x128xbf16>, vector<8x128xf32> -> vector<8x128xf32>
    %98 = arith.mulf %93, %93 : vector<8x128xf32>
    %99 = arith.truncf %98 : vector<8x128xf32> to vector<8x128xbf16>
    %cst_45 = arith.constant dense<0.000000e+00> : vector<8x128xf32>
    %100 = tpu.matmul %99, %1, %cst_45 {dimension_numbers = #tpu.dot_dimension_numbers<[1], [0], [0], [1], [0, 0, 1, 1], [], []>} : vector<8x128xbf16>, vector<128x128xbf16>, vector<8x128xf32> -> vector<8x128xf32>
    %101 = vector.extract_strided_slice %97 {offsets = [0, 0], sizes = [8, 1], strides = [1, 1]} : vector<8x128xf32> to vector<8x1xf32>
    %102 = vector.extract_strided_slice %100 {offsets = [0, 0], sizes = [8, 1], strides = [1, 1]} : vector<8x128xf32> to vector<8x1xf32>
    %103 = arith.mulf %101, %101 : vector<8x1xf32>
    %104 = arith.subf %102, %103 : vector<8x1xf32>
    %105 = vector.broadcast %101 : vector<8x1xf32> to vector<8x128xf32>
    %106 = arith.subf %93, %105 : vector<8x128xf32>
    %cst_46 = arith.constant 9.99999974E-6 : f32
    %107 = vector.broadcast %cst_46 : f32 to vector<8x1xf32>
    %108 = arith.addf %104, %107 : vector<8x1xf32>
    %109 = math.rsqrt %108 : vector<8x1xf32>
    %110 = vector.broadcast %109 : vector<8x1xf32> to vector<8x128xf32>
    %111 = arith.mulf %106, %110 : vector<8x128xf32>
    %112 = vector.broadcast %94 : vector<1x128xf32> to vector<8x128xf32>
    %113 = arith.mulf %111, %112 : vector<8x128xf32>
    %114 = vector.broadcast %95 : vector<1x128xf32> to vector<8x128xf32>
    %115 = arith.addf %113, %114 : vector<8x128xf32>
    %cst_47 = arith.constant 5.000000e-01 : f32
    %116 = vector.broadcast %cst_47 : f32 to vector<8x128xf32>
    %117 = arith.mulf %116, %115 : vector<8x128xf32>
    %118 = arith.mulf %115, %115 : vector<8x128xf32>
    %119 = arith.mulf %118, %115 : vector<8x128xf32>
    %cst_48 = arith.constant 4.471500e-02 : f32
    %120 = vector.broadcast %cst_48 : f32 to vector<8x128xf32>
    %121 = arith.mulf %120, %119 : vector<8x128xf32>
    %122 = arith.addf %115, %121 : vector<8x128xf32>
    %cst_49 = arith.constant 0.797884583 : f32
    %123 = vector.broadcast %cst_49 : f32 to vector<8x128xf32>
    %124 = arith.mulf %123, %122 : vector<8x128xf32>
    %125 = math.tanh %124 : vector<8x128xf32>
    %cst_50 = arith.constant 1.000000e+00 : f32
    %126 = vector.broadcast %cst_50 : f32 to vector<8x128xf32>
    %127 = arith.addf %126, %125 : vector<8x128xf32>
    %128 = arith.mulf %117, %127 : vector<8x128xf32>
    %129 = arith.addf %128, %86 : vector<8x128xf32>
    %c3 = arith.constant 3 : index
    %c0_51 = arith.constant 0 : index
    %c0_52 = arith.constant 0 : index
    %130 = vector.load %arg2[%c3, %c0_51, %c0_52] : memref<8x128x128xbf16, #tpu.memory_space<vmem>>, vector<1x128x128xbf16>
    %131 = vector.shape_cast %130 : vector<1x128x128xbf16> to vector<128x128xbf16>
    %132 = arith.truncf %129 : vector<8x128xf32> to vector<8x128xbf16>
    %cst_53 = arith.constant dense<0.000000e+00> : vector<8x128xf32>
    %133 = tpu.matmul %132, %131, %cst_53 {dimension_numbers = #tpu.dot_dimension_numbers<[1], [0], [0], [1], [0, 0, 1, 1], [], []>} : vector<8x128xbf16>, vector<128x128xbf16>, vector<8x128xf32> -> vector<8x128xf32>
    %c3_54 = arith.constant 3 : index
    %c0_55 = arith.constant 0 : index
    %134 = vector.load %arg3[%c3_54, %c0_55] : memref<8x128xf32, #tpu.memory_space<vmem>>, vector<1x128xf32>
    %135 = vector.broadcast %134 : vector<1x128xf32> to vector<8x128xf32>
    %136 = arith.addf %133, %135 : vector<8x128xf32>
    %c3_56 = arith.constant 3 : index
    %c0_57 = arith.constant 0 : index
    %137 = vector.load %arg4[%c3_56, %c0_57] : memref<8x128xf32, #tpu.memory_space<vmem>>, vector<1x128xf32>
    %c3_58 = arith.constant 3 : index
    %c0_59 = arith.constant 0 : index
    %138 = vector.load %arg5[%c3_58, %c0_59] : memref<8x128xf32, #tpu.memory_space<vmem>>, vector<1x128xf32>
    %139 = arith.truncf %136 : vector<8x128xf32> to vector<8x128xbf16>
    %cst_60 = arith.constant dense<0.000000e+00> : vector<8x128xf32>
    %140 = tpu.matmul %139, %1, %cst_60 {dimension_numbers = #tpu.dot_dimension_numbers<[1], [0], [0], [1], [0, 0, 1, 1], [], []>} : vector<8x128xbf16>, vector<128x128xbf16>, vector<8x128xf32> -> vector<8x128xf32>
    %141 = arith.mulf %136, %136 : vector<8x128xf32>
    %142 = arith.truncf %141 : vector<8x128xf32> to vector<8x128xbf16>
    %cst_61 = arith.constant dense<0.000000e+00> : vector<8x128xf32>
    %143 = tpu.matmul %142, %1, %cst_61 {dimension_numbers = #tpu.dot_dimension_numbers<[1], [0], [0], [1], [0, 0, 1, 1], [], []>} : vector<8x128xbf16>, vector<128x128xbf16>, vector<8x128xf32> -> vector<8x128xf32>
    %144 = vector.extract_strided_slice %140 {offsets = [0, 0], sizes = [8, 1], strides = [1, 1]} : vector<8x128xf32> to vector<8x1xf32>
    %145 = vector.extract_strided_slice %143 {offsets = [0, 0], sizes = [8, 1], strides = [1, 1]} : vector<8x128xf32> to vector<8x1xf32>
    %146 = arith.mulf %144, %144 : vector<8x1xf32>
    %147 = arith.subf %145, %146 : vector<8x1xf32>
    %148 = vector.broadcast %144 : vector<8x1xf32> to vector<8x128xf32>
    %149 = arith.subf %136, %148 : vector<8x128xf32>
    %cst_62 = arith.constant 9.99999974E-6 : f32
    %150 = vector.broadcast %cst_62 : f32 to vector<8x1xf32>
    %151 = arith.addf %147, %150 : vector<8x1xf32>
    %152 = math.rsqrt %151 : vector<8x1xf32>
    %153 = vector.broadcast %152 : vector<8x1xf32> to vector<8x128xf32>
    %154 = arith.mulf %149, %153 : vector<8x128xf32>
    %155 = vector.broadcast %137 : vector<1x128xf32> to vector<8x128xf32>
    %156 = arith.mulf %154, %155 : vector<8x128xf32>
    %157 = vector.broadcast %138 : vector<1x128xf32> to vector<8x128xf32>
    %158 = arith.addf %156, %157 : vector<8x128xf32>
    %cst_63 = arith.constant 5.000000e-01 : f32
    %159 = vector.broadcast %cst_63 : f32 to vector<8x128xf32>
    %160 = arith.mulf %159, %158 : vector<8x128xf32>
    %161 = arith.mulf %158, %158 : vector<8x128xf32>
    %162 = arith.mulf %161, %158 : vector<8x128xf32>
    %cst_64 = arith.constant 4.471500e-02 : f32
    %163 = vector.broadcast %cst_64 : f32 to vector<8x128xf32>
    %164 = arith.mulf %163, %162 : vector<8x128xf32>
    %165 = arith.addf %158, %164 : vector<8x128xf32>
    %cst_65 = arith.constant 0.797884583 : f32
    %166 = vector.broadcast %cst_65 : f32 to vector<8x128xf32>
    %167 = arith.mulf %166, %165 : vector<8x128xf32>
    %168 = math.tanh %167 : vector<8x128xf32>
    %cst_66 = arith.constant 1.000000e+00 : f32
    %169 = vector.broadcast %cst_66 : f32 to vector<8x128xf32>
    %170 = arith.addf %169, %168 : vector<8x128xf32>
    %171 = arith.mulf %160, %170 : vector<8x128xf32>
    %172 = arith.addf %171, %129 : vector<8x128xf32>
    %c4 = arith.constant 4 : index
    %c0_67 = arith.constant 0 : index
    %c0_68 = arith.constant 0 : index
    %173 = vector.load %arg2[%c4, %c0_67, %c0_68] : memref<8x128x128xbf16, #tpu.memory_space<vmem>>, vector<1x128x128xbf16>
    %174 = vector.shape_cast %173 : vector<1x128x128xbf16> to vector<128x128xbf16>
    %175 = arith.truncf %172 : vector<8x128xf32> to vector<8x128xbf16>
    %cst_69 = arith.constant dense<0.000000e+00> : vector<8x128xf32>
    %176 = tpu.matmul %175, %174, %cst_69 {dimension_numbers = #tpu.dot_dimension_numbers<[1], [0], [0], [1], [0, 0, 1, 1], [], []>} : vector<8x128xbf16>, vector<128x128xbf16>, vector<8x128xf32> -> vector<8x128xf32>
    %c4_70 = arith.constant 4 : index
    %c0_71 = arith.constant 0 : index
    %177 = vector.load %arg3[%c4_70, %c0_71] : memref<8x128xf32, #tpu.memory_space<vmem>>, vector<1x128xf32>
    %178 = vector.broadcast %177 : vector<1x128xf32> to vector<8x128xf32>
    %179 = arith.addf %176, %178 : vector<8x128xf32>
    %c4_72 = arith.constant 4 : index
    %c0_73 = arith.constant 0 : index
    %180 = vector.load %arg4[%c4_72, %c0_73] : memref<8x128xf32, #tpu.memory_space<vmem>>, vector<1x128xf32>
    %c4_74 = arith.constant 4 : index
    %c0_75 = arith.constant 0 : index
    %181 = vector.load %arg5[%c4_74, %c0_75] : memref<8x128xf32, #tpu.memory_space<vmem>>, vector<1x128xf32>
    %182 = arith.truncf %179 : vector<8x128xf32> to vector<8x128xbf16>
    %cst_76 = arith.constant dense<0.000000e+00> : vector<8x128xf32>
    %183 = tpu.matmul %182, %1, %cst_76 {dimension_numbers = #tpu.dot_dimension_numbers<[1], [0], [0], [1], [0, 0, 1, 1], [], []>} : vector<8x128xbf16>, vector<128x128xbf16>, vector<8x128xf32> -> vector<8x128xf32>
    %184 = arith.mulf %179, %179 : vector<8x128xf32>
    %185 = arith.truncf %184 : vector<8x128xf32> to vector<8x128xbf16>
    %cst_77 = arith.constant dense<0.000000e+00> : vector<8x128xf32>
    %186 = tpu.matmul %185, %1, %cst_77 {dimension_numbers = #tpu.dot_dimension_numbers<[1], [0], [0], [1], [0, 0, 1, 1], [], []>} : vector<8x128xbf16>, vector<128x128xbf16>, vector<8x128xf32> -> vector<8x128xf32>
    %187 = vector.extract_strided_slice %183 {offsets = [0, 0], sizes = [8, 1], strides = [1, 1]} : vector<8x128xf32> to vector<8x1xf32>
    %188 = vector.extract_strided_slice %186 {offsets = [0, 0], sizes = [8, 1], strides = [1, 1]} : vector<8x128xf32> to vector<8x1xf32>
    %189 = arith.mulf %187, %187 : vector<8x1xf32>
    %190 = arith.subf %188, %189 : vector<8x1xf32>
    %191 = vector.broadcast %187 : vector<8x1xf32> to vector<8x128xf32>
    %192 = arith.subf %179, %191 : vector<8x128xf32>
    %cst_78 = arith.constant 9.99999974E-6 : f32
    %193 = vector.broadcast %cst_78 : f32 to vector<8x1xf32>
    %194 = arith.addf %190, %193 : vector<8x1xf32>
    %195 = math.rsqrt %194 : vector<8x1xf32>
    %196 = vector.broadcast %195 : vector<8x1xf32> to vector<8x128xf32>
    %197 = arith.mulf %192, %196 : vector<8x128xf32>
    %198 = vector.broadcast %180 : vector<1x128xf32> to vector<8x128xf32>
    %199 = arith.mulf %197, %198 : vector<8x128xf32>
    %200 = vector.broadcast %181 : vector<1x128xf32> to vector<8x128xf32>
    %201 = arith.addf %199, %200 : vector<8x128xf32>
    %cst_79 = arith.constant 5.000000e-01 : f32
    %202 = vector.broadcast %cst_79 : f32 to vector<8x128xf32>
    %203 = arith.mulf %202, %201 : vector<8x128xf32>
    %204 = arith.mulf %201, %201 : vector<8x128xf32>
    %205 = arith.mulf %204, %201 : vector<8x128xf32>
    %cst_80 = arith.constant 4.471500e-02 : f32
    %206 = vector.broadcast %cst_80 : f32 to vector<8x128xf32>
    %207 = arith.mulf %206, %205 : vector<8x128xf32>
    %208 = arith.addf %201, %207 : vector<8x128xf32>
    %cst_81 = arith.constant 0.797884583 : f32
    %209 = vector.broadcast %cst_81 : f32 to vector<8x128xf32>
    %210 = arith.mulf %209, %208 : vector<8x128xf32>
    %211 = math.tanh %210 : vector<8x128xf32>
    %cst_82 = arith.constant 1.000000e+00 : f32
    %212 = vector.broadcast %cst_82 : f32 to vector<8x128xf32>
    %213 = arith.addf %212, %211 : vector<8x128xf32>
    %214 = arith.mulf %203, %213 : vector<8x128xf32>
    %215 = arith.addf %214, %172 : vector<8x128xf32>
    %c5 = arith.constant 5 : index
    %c0_83 = arith.constant 0 : index
    %c0_84 = arith.constant 0 : index
    %216 = vector.load %arg2[%c5, %c0_83, %c0_84] : memref<8x128x128xbf16, #tpu.memory_space<vmem>>, vector<1x128x128xbf16>
    %217 = vector.shape_cast %216 : vector<1x128x128xbf16> to vector<128x128xbf16>
    %218 = arith.truncf %215 : vector<8x128xf32> to vector<8x128xbf16>
    %cst_85 = arith.constant dense<0.000000e+00> : vector<8x128xf32>
    %219 = tpu.matmul %218, %217, %cst_85 {dimension_numbers = #tpu.dot_dimension_numbers<[1], [0], [0], [1], [0, 0, 1, 1], [], []>} : vector<8x128xbf16>, vector<128x128xbf16>, vector<8x128xf32> -> vector<8x128xf32>
    %c5_86 = arith.constant 5 : index
    %c0_87 = arith.constant 0 : index
    %220 = vector.load %arg3[%c5_86, %c0_87] : memref<8x128xf32, #tpu.memory_space<vmem>>, vector<1x128xf32>
    %221 = vector.broadcast %220 : vector<1x128xf32> to vector<8x128xf32>
    %222 = arith.addf %219, %221 : vector<8x128xf32>
    %c5_88 = arith.constant 5 : index
    %c0_89 = arith.constant 0 : index
    %223 = vector.load %arg4[%c5_88, %c0_89] : memref<8x128xf32, #tpu.memory_space<vmem>>, vector<1x128xf32>
    %c5_90 = arith.constant 5 : index
    %c0_91 = arith.constant 0 : index
    %224 = vector.load %arg5[%c5_90, %c0_91] : memref<8x128xf32, #tpu.memory_space<vmem>>, vector<1x128xf32>
    %225 = arith.truncf %222 : vector<8x128xf32> to vector<8x128xbf16>
    %cst_92 = arith.constant dense<0.000000e+00> : vector<8x128xf32>
    %226 = tpu.matmul %225, %1, %cst_92 {dimension_numbers = #tpu.dot_dimension_numbers<[1], [0], [0], [1], [0, 0, 1, 1], [], []>} : vector<8x128xbf16>, vector<128x128xbf16>, vector<8x128xf32> -> vector<8x128xf32>
    %227 = arith.mulf %222, %222 : vector<8x128xf32>
    %228 = arith.truncf %227 : vector<8x128xf32> to vector<8x128xbf16>
    %cst_93 = arith.constant dense<0.000000e+00> : vector<8x128xf32>
    %229 = tpu.matmul %228, %1, %cst_93 {dimension_numbers = #tpu.dot_dimension_numbers<[1], [0], [0], [1], [0, 0, 1, 1], [], []>} : vector<8x128xbf16>, vector<128x128xbf16>, vector<8x128xf32> -> vector<8x128xf32>
    %230 = vector.extract_strided_slice %226 {offsets = [0, 0], sizes = [8, 1], strides = [1, 1]} : vector<8x128xf32> to vector<8x1xf32>
    %231 = vector.extract_strided_slice %229 {offsets = [0, 0], sizes = [8, 1], strides = [1, 1]} : vector<8x128xf32> to vector<8x1xf32>
    %232 = arith.mulf %230, %230 : vector<8x1xf32>
    %233 = arith.subf %231, %232 : vector<8x1xf32>
    %234 = vector.broadcast %230 : vector<8x1xf32> to vector<8x128xf32>
    %235 = arith.subf %222, %234 : vector<8x128xf32>
    %cst_94 = arith.constant 9.99999974E-6 : f32
    %236 = vector.broadcast %cst_94 : f32 to vector<8x1xf32>
    %237 = arith.addf %233, %236 : vector<8x1xf32>
    %238 = math.rsqrt %237 : vector<8x1xf32>
    %239 = vector.broadcast %238 : vector<8x1xf32> to vector<8x128xf32>
    %240 = arith.mulf %235, %239 : vector<8x128xf32>
    %241 = vector.broadcast %223 : vector<1x128xf32> to vector<8x128xf32>
    %242 = arith.mulf %240, %241 : vector<8x128xf32>
    %243 = vector.broadcast %224 : vector<1x128xf32> to vector<8x128xf32>
    %244 = arith.addf %242, %243 : vector<8x128xf32>
    %cst_95 = arith.constant 5.000000e-01 : f32
    %245 = vector.broadcast %cst_95 : f32 to vector<8x128xf32>
    %246 = arith.mulf %245, %244 : vector<8x128xf32>
    %247 = arith.mulf %244, %244 : vector<8x128xf32>
    %248 = arith.mulf %247, %244 : vector<8x128xf32>
    %cst_96 = arith.constant 4.471500e-02 : f32
    %249 = vector.broadcast %cst_96 : f32 to vector<8x128xf32>
    %250 = arith.mulf %249, %248 : vector<8x128xf32>
    %251 = arith.addf %244, %250 : vector<8x128xf32>
    %cst_97 = arith.constant 0.797884583 : f32
    %252 = vector.broadcast %cst_97 : f32 to vector<8x128xf32>
    %253 = arith.mulf %252, %251 : vector<8x128xf32>
    %254 = math.tanh %253 : vector<8x128xf32>
    %cst_98 = arith.constant 1.000000e+00 : f32
    %255 = vector.broadcast %cst_98 : f32 to vector<8x128xf32>
    %256 = arith.addf %255, %254 : vector<8x128xf32>
    %257 = arith.mulf %246, %256 : vector<8x128xf32>
    %258 = arith.addf %257, %215 : vector<8x128xf32>
    %c6 = arith.constant 6 : index
    %c0_99 = arith.constant 0 : index
    %c0_100 = arith.constant 0 : index
    %259 = vector.load %arg2[%c6, %c0_99, %c0_100] : memref<8x128x128xbf16, #tpu.memory_space<vmem>>, vector<1x128x128xbf16>
    %260 = vector.shape_cast %259 : vector<1x128x128xbf16> to vector<128x128xbf16>
    %261 = arith.truncf %258 : vector<8x128xf32> to vector<8x128xbf16>
    %cst_101 = arith.constant dense<0.000000e+00> : vector<8x128xf32>
    %262 = tpu.matmul %261, %260, %cst_101 {dimension_numbers = #tpu.dot_dimension_numbers<[1], [0], [0], [1], [0, 0, 1, 1], [], []>} : vector<8x128xbf16>, vector<128x128xbf16>, vector<8x128xf32> -> vector<8x128xf32>
    %c6_102 = arith.constant 6 : index
    %c0_103 = arith.constant 0 : index
    %263 = vector.load %arg3[%c6_102, %c0_103] : memref<8x128xf32, #tpu.memory_space<vmem>>, vector<1x128xf32>
    %264 = vector.broadcast %263 : vector<1x128xf32> to vector<8x128xf32>
    %265 = arith.addf %262, %264 : vector<8x128xf32>
    %c6_104 = arith.constant 6 : index
    %c0_105 = arith.constant 0 : index
    %266 = vector.load %arg4[%c6_104, %c0_105] : memref<8x128xf32, #tpu.memory_space<vmem>>, vector<1x128xf32>
    %c6_106 = arith.constant 6 : index
    %c0_107 = arith.constant 0 : index
    %267 = vector.load %arg5[%c6_106, %c0_107] : memref<8x128xf32, #tpu.memory_space<vmem>>, vector<1x128xf32>
    %268 = arith.truncf %265 : vector<8x128xf32> to vector<8x128xbf16>
    %cst_108 = arith.constant dense<0.000000e+00> : vector<8x128xf32>
    %269 = tpu.matmul %268, %1, %cst_108 {dimension_numbers = #tpu.dot_dimension_numbers<[1], [0], [0], [1], [0, 0, 1, 1], [], []>} : vector<8x128xbf16>, vector<128x128xbf16>, vector<8x128xf32> -> vector<8x128xf32>
    %270 = arith.mulf %265, %265 : vector<8x128xf32>
    %271 = arith.truncf %270 : vector<8x128xf32> to vector<8x128xbf16>
    %cst_109 = arith.constant dense<0.000000e+00> : vector<8x128xf32>
    %272 = tpu.matmul %271, %1, %cst_109 {dimension_numbers = #tpu.dot_dimension_numbers<[1], [0], [0], [1], [0, 0, 1, 1], [], []>} : vector<8x128xbf16>, vector<128x128xbf16>, vector<8x128xf32> -> vector<8x128xf32>
    %273 = vector.extract_strided_slice %269 {offsets = [0, 0], sizes = [8, 1], strides = [1, 1]} : vector<8x128xf32> to vector<8x1xf32>
    %274 = vector.extract_strided_slice %272 {offsets = [0, 0], sizes = [8, 1], strides = [1, 1]} : vector<8x128xf32> to vector<8x1xf32>
    %275 = arith.mulf %273, %273 : vector<8x1xf32>
    %276 = arith.subf %274, %275 : vector<8x1xf32>
    %277 = vector.broadcast %273 : vector<8x1xf32> to vector<8x128xf32>
    %278 = arith.subf %265, %277 : vector<8x128xf32>
    %cst_110 = arith.constant 9.99999974E-6 : f32
    %279 = vector.broadcast %cst_110 : f32 to vector<8x1xf32>
    %280 = arith.addf %276, %279 : vector<8x1xf32>
    %281 = math.rsqrt %280 : vector<8x1xf32>
    %282 = vector.broadcast %281 : vector<8x1xf32> to vector<8x128xf32>
    %283 = arith.mulf %278, %282 : vector<8x128xf32>
    %284 = vector.broadcast %266 : vector<1x128xf32> to vector<8x128xf32>
    %285 = arith.mulf %283, %284 : vector<8x128xf32>
    %286 = vector.broadcast %267 : vector<1x128xf32> to vector<8x128xf32>
    %287 = arith.addf %285, %286 : vector<8x128xf32>
    %cst_111 = arith.constant 5.000000e-01 : f32
    %288 = vector.broadcast %cst_111 : f32 to vector<8x128xf32>
    %289 = arith.mulf %288, %287 : vector<8x128xf32>
    %290 = arith.mulf %287, %287 : vector<8x128xf32>
    %291 = arith.mulf %290, %287 : vector<8x128xf32>
    %cst_112 = arith.constant 4.471500e-02 : f32
    %292 = vector.broadcast %cst_112 : f32 to vector<8x128xf32>
    %293 = arith.mulf %292, %291 : vector<8x128xf32>
    %294 = arith.addf %287, %293 : vector<8x128xf32>
    %cst_113 = arith.constant 0.797884583 : f32
    %295 = vector.broadcast %cst_113 : f32 to vector<8x128xf32>
    %296 = arith.mulf %295, %294 : vector<8x128xf32>
    %297 = math.tanh %296 : vector<8x128xf32>
    %cst_114 = arith.constant 1.000000e+00 : f32
    %298 = vector.broadcast %cst_114 : f32 to vector<8x128xf32>
    %299 = arith.addf %298, %297 : vector<8x128xf32>
    %300 = arith.mulf %289, %299 : vector<8x128xf32>
    %301 = arith.addf %300, %258 : vector<8x128xf32>
    %c7 = arith.constant 7 : index
    %c0_115 = arith.constant 0 : index
    %c0_116 = arith.constant 0 : index
    %302 = vector.load %arg2[%c7, %c0_115, %c0_116] : memref<8x128x128xbf16, #tpu.memory_space<vmem>>, vector<1x128x128xbf16>
    %303 = vector.shape_cast %302 : vector<1x128x128xbf16> to vector<128x128xbf16>
    %304 = arith.truncf %301 : vector<8x128xf32> to vector<8x128xbf16>
    %cst_117 = arith.constant dense<0.000000e+00> : vector<8x128xf32>
    %305 = tpu.matmul %304, %303, %cst_117 {dimension_numbers = #tpu.dot_dimension_numbers<[1], [0], [0], [1], [0, 0, 1, 1], [], []>} : vector<8x128xbf16>, vector<128x128xbf16>, vector<8x128xf32> -> vector<8x128xf32>
    %c7_118 = arith.constant 7 : index
    %c0_119 = arith.constant 0 : index
    %306 = vector.load %arg3[%c7_118, %c0_119] : memref<8x128xf32, #tpu.memory_space<vmem>>, vector<1x128xf32>
    %307 = vector.broadcast %306 : vector<1x128xf32> to vector<8x128xf32>
    %308 = arith.addf %305, %307 : vector<8x128xf32>
    %c7_120 = arith.constant 7 : index
    %c0_121 = arith.constant 0 : index
    %309 = vector.load %arg4[%c7_120, %c0_121] : memref<8x128xf32, #tpu.memory_space<vmem>>, vector<1x128xf32>
    %c7_122 = arith.constant 7 : index
    %c0_123 = arith.constant 0 : index
    %310 = vector.load %arg5[%c7_122, %c0_123] : memref<8x128xf32, #tpu.memory_space<vmem>>, vector<1x128xf32>
    %311 = arith.truncf %308 : vector<8x128xf32> to vector<8x128xbf16>
    %cst_124 = arith.constant dense<0.000000e+00> : vector<8x128xf32>
    %312 = tpu.matmul %311, %1, %cst_124 {dimension_numbers = #tpu.dot_dimension_numbers<[1], [0], [0], [1], [0, 0, 1, 1], [], []>} : vector<8x128xbf16>, vector<128x128xbf16>, vector<8x128xf32> -> vector<8x128xf32>
    %313 = arith.mulf %308, %308 : vector<8x128xf32>
    %314 = arith.truncf %313 : vector<8x128xf32> to vector<8x128xbf16>
    %cst_125 = arith.constant dense<0.000000e+00> : vector<8x128xf32>
    %315 = tpu.matmul %314, %1, %cst_125 {dimension_numbers = #tpu.dot_dimension_numbers<[1], [0], [0], [1], [0, 0, 1, 1], [], []>} : vector<8x128xbf16>, vector<128x128xbf16>, vector<8x128xf32> -> vector<8x128xf32>
    %316 = vector.extract_strided_slice %312 {offsets = [0, 0], sizes = [8, 1], strides = [1, 1]} : vector<8x128xf32> to vector<8x1xf32>
    %317 = vector.extract_strided_slice %315 {offsets = [0, 0], sizes = [8, 1], strides = [1, 1]} : vector<8x128xf32> to vector<8x1xf32>
    %318 = arith.mulf %316, %316 : vector<8x1xf32>
    %319 = arith.subf %317, %318 : vector<8x1xf32>
    %320 = vector.broadcast %316 : vector<8x1xf32> to vector<8x128xf32>
    %321 = arith.subf %308, %320 : vector<8x128xf32>
    %cst_126 = arith.constant 9.99999974E-6 : f32
    %322 = vector.broadcast %cst_126 : f32 to vector<8x1xf32>
    %323 = arith.addf %319, %322 : vector<8x1xf32>
    %324 = math.rsqrt %323 : vector<8x1xf32>
    %325 = vector.broadcast %324 : vector<8x1xf32> to vector<8x128xf32>
    %326 = arith.mulf %321, %325 : vector<8x128xf32>
    %327 = vector.broadcast %309 : vector<1x128xf32> to vector<8x128xf32>
    %328 = arith.mulf %326, %327 : vector<8x128xf32>
    %329 = vector.broadcast %310 : vector<1x128xf32> to vector<8x128xf32>
    %330 = arith.addf %328, %329 : vector<8x128xf32>
    %cst_127 = arith.constant 5.000000e-01 : f32
    %331 = vector.broadcast %cst_127 : f32 to vector<8x128xf32>
    %332 = arith.mulf %331, %330 : vector<8x128xf32>
    %333 = arith.mulf %330, %330 : vector<8x128xf32>
    %334 = arith.mulf %333, %330 : vector<8x128xf32>
    %cst_128 = arith.constant 4.471500e-02 : f32
    %335 = vector.broadcast %cst_128 : f32 to vector<8x128xf32>
    %336 = arith.mulf %335, %334 : vector<8x128xf32>
    %337 = arith.addf %330, %336 : vector<8x128xf32>
    %cst_129 = arith.constant 0.797884583 : f32
    %338 = vector.broadcast %cst_129 : f32 to vector<8x128xf32>
    %339 = arith.mulf %338, %337 : vector<8x128xf32>
    %340 = math.tanh %339 : vector<8x128xf32>
    %cst_130 = arith.constant 1.000000e+00 : f32
    %341 = vector.broadcast %cst_130 : f32 to vector<8x128xf32>
    %342 = arith.addf %341, %340 : vector<8x128xf32>
    %343 = arith.mulf %332, %342 : vector<8x128xf32>
    %344 = arith.addf %343, %301 : vector<8x128xf32>
    %c0_131 = arith.constant 0 : index
    %c0_132 = arith.constant 0 : index
    %345 = vector.load %arg6[%c0_131, %c0_132] : memref<128x256xbf16, #tpu.memory_space<vmem>>, vector<128x256xbf16>
    %346 = arith.truncf %344 : vector<8x128xf32> to vector<8x128xbf16>
    %cst_133 = arith.constant dense<0.000000e+00> : vector<8x256xf32>
    %347 = tpu.matmul %346, %345, %cst_133 {dimension_numbers = #tpu.dot_dimension_numbers<[1], [0], [0], [1], [0, 0, 1, 1], [], []>} : vector<8x128xbf16>, vector<128x256xbf16>, vector<8x256xf32> -> vector<8x256xf32>
    %c0_134 = arith.constant 0 : index
    %c0_135 = arith.constant 0 : index
    %348 = vector.load %arg7[%c0_134, %c0_135] : memref<1x256xf32, #tpu.memory_space<vmem>>, vector<1x256xf32>
    %349 = vector.broadcast %348 : vector<1x256xf32> to vector<8x256xf32>
    %350 = arith.addf %347, %349 : vector<8x256xf32>
    %c0_136 = arith.constant 0 : index
    %c0_137 = arith.constant 0 : index
    %351 = vector.load %arg8[%c0_136, %c0_137] : memref<256x128xbf16, #tpu.memory_space<vmem>>, vector<256x128xbf16>
    %352 = arith.truncf %350 : vector<8x256xf32> to vector<8x256xbf16>
    %cst_138 = arith.constant dense<0.000000e+00> : vector<8x128xf32>
    %353 = tpu.matmul %352, %351, %cst_138 {dimension_numbers = #tpu.dot_dimension_numbers<[1], [0], [0], [1], [0, 0, 1, 1], [], []>} : vector<8x256xbf16>, vector<256x128xbf16>, vector<8x128xf32> -> vector<8x128xf32>
    %354 = arith.addf %344, %353 : vector<8x128xf32>
    %c0_139 = arith.constant 0 : index
    %c0_140 = arith.constant 0 : index
    %355 = vector.load %arg9[%c0_139, %c0_140] : memref<1x128xf32, #tpu.memory_space<vmem>>, vector<1x128xf32>
    %356 = vector.broadcast %355 : vector<1x128xf32> to vector<8x128xf32>
    %357 = arith.addf %354, %356 : vector<8x128xf32>
    %c0_141 = arith.constant 0 : index
    %c0_142 = arith.constant 0 : index
    %358 = vector.load %arg10[%c0_141, %c0_142] : memref<128x256xbf16, #tpu.memory_space<vmem>>, vector<128x256xbf16>
    %359 = arith.truncf %357 : vector<8x128xf32> to vector<8x128xbf16>
    %cst_143 = arith.constant dense<0.000000e+00> : vector<8x256xf32>
    %360 = tpu.matmul %359, %358, %cst_143 {dimension_numbers = #tpu.dot_dimension_numbers<[1], [0], [0], [1], [0, 0, 1, 1], [], []>} : vector<8x128xbf16>, vector<128x256xbf16>, vector<8x256xf32> -> vector<8x256xf32>
    %c0_144 = arith.constant 0 : index
    %c0_145 = arith.constant 0 : index
    %361 = vector.load %arg11[%c0_144, %c0_145] : memref<3x256xf32, #tpu.memory_space<vmem>>, vector<1x256xf32>
    %362 = vector.broadcast %361 : vector<1x256xf32> to vector<8x256xf32>
    %363 = arith.addf %360, %362 : vector<8x256xf32>
    %c1_146 = arith.constant 1 : index
    %c0_147 = arith.constant 0 : index
    %364 = vector.load %arg11[%c1_146, %c0_147] : memref<3x256xf32, #tpu.memory_space<vmem>>, vector<1x256xf32>
    %c2_148 = arith.constant 2 : index
    %c0_149 = arith.constant 0 : index
    %365 = vector.load %arg11[%c2_148, %c0_149] : memref<3x256xf32, #tpu.memory_space<vmem>>, vector<1x256xf32>
    %c0_150 = arith.constant 0 : index
    %c0_151 = arith.constant 0 : index
    %366 = vector.load %arg23[%c0_150, %c0_151] : memref<256x128xbf16, #tpu.memory_space<vmem>>, vector<256x128xbf16>
    %367 = arith.truncf %363 : vector<8x256xf32> to vector<8x256xbf16>
    %cst_152 = arith.constant dense<0.000000e+00> : vector<8x128xf32>
    %368 = tpu.matmul %367, %366, %cst_152 {dimension_numbers = #tpu.dot_dimension_numbers<[1], [0], [0], [1], [0, 0, 1, 1], [], []>} : vector<8x256xbf16>, vector<256x128xbf16>, vector<8x128xf32> -> vector<8x128xf32>
    %369 = arith.mulf %363, %363 : vector<8x256xf32>
    %370 = arith.truncf %369 : vector<8x256xf32> to vector<8x256xbf16>
    %cst_153 = arith.constant dense<0.000000e+00> : vector<8x128xf32>
    %371 = tpu.matmul %370, %366, %cst_153 {dimension_numbers = #tpu.dot_dimension_numbers<[1], [0], [0], [1], [0, 0, 1, 1], [], []>} : vector<8x256xbf16>, vector<256x128xbf16>, vector<8x128xf32> -> vector<8x128xf32>
    %372 = tpu.iota {dimensions = array<i32: 1>} : vector<8x256xi32>
    %c128_i32 = arith.constant 128 : i32
    %373 = vector.broadcast %c128_i32 : i32 to vector<8x256xi32>
    %374 = arith.cmpi slt, %372, %373 : vector<8x256xi32>
    %375 = vector.extract_strided_slice %368 {offsets = [0, 0], sizes = [8, 1], strides = [1, 1]} : vector<8x128xf32> to vector<8x1xf32>
    %376 = vector.extract_strided_slice %368 {offsets = [0, 1], sizes = [8, 1], strides = [1, 1]} : vector<8x128xf32> to vector<8x1xf32>
    %377 = vector.shape_cast %375 : vector<8x1xf32> to vector<8x1xf32>
    %378 = vector.broadcast %377 : vector<8x1xf32> to vector<8x256xf32>
    %379 = vector.shape_cast %376 : vector<8x1xf32> to vector<8x1xf32>
    %380 = vector.broadcast %379 : vector<8x1xf32> to vector<8x256xf32>
    %381 = arith.select %374, %378, %380 : vector<8x256xi1>, vector<8x256xf32>
    %382 = vector.extract_strided_slice %371 {offsets = [0, 0], sizes = [8, 1], strides = [1, 1]} : vector<8x128xf32> to vector<8x1xf32>
    %383 = vector.extract_strided_slice %371 {offsets = [0, 1], sizes = [8, 1], strides = [1, 1]} : vector<8x128xf32> to vector<8x1xf32>
    %384 = vector.shape_cast %382 : vector<8x1xf32> to vector<8x1xf32>
    %385 = vector.broadcast %384 : vector<8x1xf32> to vector<8x256xf32>
    %386 = vector.shape_cast %383 : vector<8x1xf32> to vector<8x1xf32>
    %387 = vector.broadcast %386 : vector<8x1xf32> to vector<8x256xf32>
    %388 = arith.select %374, %385, %387 : vector<8x256xi1>, vector<8x256xf32>
    %389 = arith.mulf %381, %381 : vector<8x256xf32>
    %390 = arith.subf %388, %389 : vector<8x256xf32>
    %391 = arith.subf %363, %381 : vector<8x256xf32>
    %cst_154 = arith.constant 9.99999974E-6 : f32
    %392 = vector.broadcast %cst_154 : f32 to vector<8x256xf32>
    %393 = arith.addf %390, %392 : vector<8x256xf32>
    %394 = math.rsqrt %393 : vector<8x256xf32>
    %395 = arith.mulf %391, %394 : vector<8x256xf32>
    %396 = vector.broadcast %364 : vector<1x256xf32> to vector<8x256xf32>
    %397 = arith.mulf %395, %396 : vector<8x256xf32>
    %398 = vector.broadcast %365 : vector<1x256xf32> to vector<8x256xf32>
    %399 = arith.addf %397, %398 : vector<8x256xf32>
    %cst_155 = arith.constant 5.000000e-01 : f32
    %400 = vector.broadcast %cst_155 : f32 to vector<8x256xf32>
    %401 = arith.mulf %400, %399 : vector<8x256xf32>
    %402 = arith.mulf %399, %399 : vector<8x256xf32>
    %403 = arith.mulf %402, %399 : vector<8x256xf32>
    %cst_156 = arith.constant 4.471500e-02 : f32
    %404 = vector.broadcast %cst_156 : f32 to vector<8x256xf32>
    %405 = arith.mulf %404, %403 : vector<8x256xf32>
    %406 = arith.addf %399, %405 : vector<8x256xf32>
    %cst_157 = arith.constant 0.797884583 : f32
    %407 = vector.broadcast %cst_157 : f32 to vector<8x256xf32>
    %408 = arith.mulf %407, %406 : vector<8x256xf32>
    %409 = math.tanh %408 : vector<8x256xf32>
    %cst_158 = arith.constant 1.000000e+00 : f32
    %410 = vector.broadcast %cst_158 : f32 to vector<8x256xf32>
    %411 = arith.addf %410, %409 : vector<8x256xf32>
    %412 = arith.mulf %401, %411 : vector<8x256xf32>
    %c0_159 = arith.constant 0 : index
    %c0_160 = arith.constant 0 : index
    %413 = vector.load %arg12[%c0_159, %c0_160] : memref<256x128xbf16, #tpu.memory_space<vmem>>, vector<256x128xbf16>
    %414 = arith.truncf %412 : vector<8x256xf32> to vector<8x256xbf16>
    %cst_161 = arith.constant dense<0.000000e+00> : vector<8x128xf32>
    %415 = tpu.matmul %414, %413, %cst_161 {dimension_numbers = #tpu.dot_dimension_numbers<[1], [0], [0], [1], [0, 0, 1, 1], [], []>} : vector<8x256xbf16>, vector<256x128xbf16>, vector<8x128xf32> -> vector<8x128xf32>
    %c0_162 = arith.constant 0 : index
    %c0_163 = arith.constant 0 : index
    %416 = vector.load %arg13[%c0_162, %c0_163] : memref<3x128xf32, #tpu.memory_space<vmem>>, vector<1x128xf32>
    %417 = vector.broadcast %416 : vector<1x128xf32> to vector<8x128xf32>
    %418 = arith.addf %415, %417 : vector<8x128xf32>
    %c1_164 = arith.constant 1 : index
    %c0_165 = arith.constant 0 : index
    %419 = vector.load %arg13[%c1_164, %c0_165] : memref<3x128xf32, #tpu.memory_space<vmem>>, vector<1x128xf32>
    %c2_166 = arith.constant 2 : index
    %c0_167 = arith.constant 0 : index
    %420 = vector.load %arg13[%c2_166, %c0_167] : memref<3x128xf32, #tpu.memory_space<vmem>>, vector<1x128xf32>
    %c0_168 = arith.constant 0 : index
    %c0_169 = arith.constant 0 : index
    %421 = vector.load %arg24[%c0_168, %c0_169] : memref<128x128xbf16, #tpu.memory_space<vmem>>, vector<128x128xbf16>
    %422 = arith.truncf %418 : vector<8x128xf32> to vector<8x128xbf16>
    %cst_170 = arith.constant dense<0.000000e+00> : vector<8x128xf32>
    %423 = tpu.matmul %422, %421, %cst_170 {dimension_numbers = #tpu.dot_dimension_numbers<[1], [0], [0], [1], [0, 0, 1, 1], [], []>} : vector<8x128xbf16>, vector<128x128xbf16>, vector<8x128xf32> -> vector<8x128xf32>
    %424 = arith.mulf %418, %418 : vector<8x128xf32>
    %425 = arith.truncf %424 : vector<8x128xf32> to vector<8x128xbf16>
    %cst_171 = arith.constant dense<0.000000e+00> : vector<8x128xf32>
    %426 = tpu.matmul %425, %421, %cst_171 {dimension_numbers = #tpu.dot_dimension_numbers<[1], [0], [0], [1], [0, 0, 1, 1], [], []>} : vector<8x128xbf16>, vector<128x128xbf16>, vector<8x128xf32> -> vector<8x128xf32>
    %427 = tpu.iota {dimensions = array<i32: 1>} : vector<8x128xi32>
    %c64_i32 = arith.constant 64 : i32
    %428 = vector.broadcast %c64_i32 : i32 to vector<8x128xi32>
    %429 = arith.cmpi slt, %427, %428 : vector<8x128xi32>
    %430 = vector.extract_strided_slice %423 {offsets = [0, 0], sizes = [8, 1], strides = [1, 1]} : vector<8x128xf32> to vector<8x1xf32>
    %431 = vector.extract_strided_slice %423 {offsets = [0, 1], sizes = [8, 1], strides = [1, 1]} : vector<8x128xf32> to vector<8x1xf32>
    %432 = vector.shape_cast %430 : vector<8x1xf32> to vector<8x1xf32>
    %433 = vector.broadcast %432 : vector<8x1xf32> to vector<8x128xf32>
    %434 = vector.shape_cast %431 : vector<8x1xf32> to vector<8x1xf32>
    %435 = vector.broadcast %434 : vector<8x1xf32> to vector<8x128xf32>
    %436 = arith.select %429, %433, %435 : vector<8x128xi1>, vector<8x128xf32>
    %437 = vector.extract_strided_slice %426 {offsets = [0, 0], sizes = [8, 1], strides = [1, 1]} : vector<8x128xf32> to vector<8x1xf32>
    %438 = vector.extract_strided_slice %426 {offsets = [0, 1], sizes = [8, 1], strides = [1, 1]} : vector<8x128xf32> to vector<8x1xf32>
    %439 = vector.shape_cast %437 : vector<8x1xf32> to vector<8x1xf32>
    %440 = vector.broadcast %439 : vector<8x1xf32> to vector<8x128xf32>
    %441 = vector.shape_cast %438 : vector<8x1xf32> to vector<8x1xf32>
    %442 = vector.broadcast %441 : vector<8x1xf32> to vector<8x128xf32>
    %443 = arith.select %429, %440, %442 : vector<8x128xi1>, vector<8x128xf32>
    %444 = arith.mulf %436, %436 : vector<8x128xf32>
    %445 = arith.subf %443, %444 : vector<8x128xf32>
    %446 = arith.subf %418, %436 : vector<8x128xf32>
    %cst_172 = arith.constant 9.99999974E-6 : f32
    %447 = vector.broadcast %cst_172 : f32 to vector<8x128xf32>
    %448 = arith.addf %445, %447 : vector<8x128xf32>
    %449 = math.rsqrt %448 : vector<8x128xf32>
    %450 = arith.mulf %446, %449 : vector<8x128xf32>
    %451 = vector.broadcast %419 : vector<1x128xf32> to vector<8x128xf32>
    %452 = arith.mulf %450, %451 : vector<8x128xf32>
    %453 = vector.broadcast %420 : vector<1x128xf32> to vector<8x128xf32>
    %454 = arith.addf %452, %453 : vector<8x128xf32>
    %cst_173 = arith.constant 5.000000e-01 : f32
    %455 = vector.broadcast %cst_173 : f32 to vector<8x128xf32>
    %456 = arith.mulf %455, %454 : vector<8x128xf32>
    %457 = arith.mulf %454, %454 : vector<8x128xf32>
    %458 = arith.mulf %457, %454 : vector<8x128xf32>
    %cst_174 = arith.constant 4.471500e-02 : f32
    %459 = vector.broadcast %cst_174 : f32 to vector<8x128xf32>
    %460 = arith.mulf %459, %458 : vector<8x128xf32>
    %461 = arith.addf %454, %460 : vector<8x128xf32>
    %cst_175 = arith.constant 0.797884583 : f32
    %462 = vector.broadcast %cst_175 : f32 to vector<8x128xf32>
    %463 = arith.mulf %462, %461 : vector<8x128xf32>
    %464 = math.tanh %463 : vector<8x128xf32>
    %cst_176 = arith.constant 1.000000e+00 : f32
    %465 = vector.broadcast %cst_176 : f32 to vector<8x128xf32>
    %466 = arith.addf %465, %464 : vector<8x128xf32>
    %467 = arith.mulf %456, %466 : vector<8x128xf32>
    %c0_177 = arith.constant 0 : index
    %c0_178 = arith.constant 0 : index
    %468 = vector.load %arg14[%c0_177, %c0_178] : memref<128x256xbf16, #tpu.memory_space<vmem>>, vector<128x256xbf16>
    %469 = arith.truncf %467 : vector<8x128xf32> to vector<8x128xbf16>
    %cst_179 = arith.constant dense<0.000000e+00> : vector<8x256xf32>
    %470 = tpu.matmul %469, %468, %cst_179 {dimension_numbers = #tpu.dot_dimension_numbers<[1], [0], [0], [1], [0, 0, 1, 1], [], []>} : vector<8x128xbf16>, vector<128x256xbf16>, vector<8x256xf32> -> vector<8x256xf32>
    %c0_180 = arith.constant 0 : index
    %c0_181 = arith.constant 0 : index
    %471 = vector.load %arg15[%c0_180, %c0_181] : memref<3x256xf32, #tpu.memory_space<vmem>>, vector<1x256xf32>
    %472 = vector.broadcast %471 : vector<1x256xf32> to vector<8x256xf32>
    %473 = arith.addf %470, %472 : vector<8x256xf32>
    %c1_182 = arith.constant 1 : index
    %c0_183 = arith.constant 0 : index
    %474 = vector.load %arg15[%c1_182, %c0_183] : memref<3x256xf32, #tpu.memory_space<vmem>>, vector<1x256xf32>
    %c2_184 = arith.constant 2 : index
    %c0_185 = arith.constant 0 : index
    %475 = vector.load %arg15[%c2_184, %c0_185] : memref<3x256xf32, #tpu.memory_space<vmem>>, vector<1x256xf32>
    %c0_186 = arith.constant 0 : index
    %c0_187 = arith.constant 0 : index
    %476 = vector.load %arg23[%c0_186, %c0_187] : memref<256x128xbf16, #tpu.memory_space<vmem>>, vector<256x128xbf16>
    %477 = arith.truncf %473 : vector<8x256xf32> to vector<8x256xbf16>
    %cst_188 = arith.constant dense<0.000000e+00> : vector<8x128xf32>
    %478 = tpu.matmul %477, %476, %cst_188 {dimension_numbers = #tpu.dot_dimension_numbers<[1], [0], [0], [1], [0, 0, 1, 1], [], []>} : vector<8x256xbf16>, vector<256x128xbf16>, vector<8x128xf32> -> vector<8x128xf32>
    %479 = arith.mulf %473, %473 : vector<8x256xf32>
    %480 = arith.truncf %479 : vector<8x256xf32> to vector<8x256xbf16>
    %cst_189 = arith.constant dense<0.000000e+00> : vector<8x128xf32>
    %481 = tpu.matmul %480, %476, %cst_189 {dimension_numbers = #tpu.dot_dimension_numbers<[1], [0], [0], [1], [0, 0, 1, 1], [], []>} : vector<8x256xbf16>, vector<256x128xbf16>, vector<8x128xf32> -> vector<8x128xf32>
    %482 = tpu.iota {dimensions = array<i32: 1>} : vector<8x256xi32>
    %c128_i32_190 = arith.constant 128 : i32
    %483 = vector.broadcast %c128_i32_190 : i32 to vector<8x256xi32>
    %484 = arith.cmpi slt, %482, %483 : vector<8x256xi32>
    %485 = vector.extract_strided_slice %478 {offsets = [0, 0], sizes = [8, 1], strides = [1, 1]} : vector<8x128xf32> to vector<8x1xf32>
    %486 = vector.extract_strided_slice %478 {offsets = [0, 1], sizes = [8, 1], strides = [1, 1]} : vector<8x128xf32> to vector<8x1xf32>
    %487 = vector.shape_cast %485 : vector<8x1xf32> to vector<8x1xf32>
    %488 = vector.broadcast %487 : vector<8x1xf32> to vector<8x256xf32>
    %489 = vector.shape_cast %486 : vector<8x1xf32> to vector<8x1xf32>
    %490 = vector.broadcast %489 : vector<8x1xf32> to vector<8x256xf32>
    %491 = arith.select %484, %488, %490 : vector<8x256xi1>, vector<8x256xf32>
    %492 = vector.extract_strided_slice %481 {offsets = [0, 0], sizes = [8, 1], strides = [1, 1]} : vector<8x128xf32> to vector<8x1xf32>
    %493 = vector.extract_strided_slice %481 {offsets = [0, 1], sizes = [8, 1], strides = [1, 1]} : vector<8x128xf32> to vector<8x1xf32>
    %494 = vector.shape_cast %492 : vector<8x1xf32> to vector<8x1xf32>
    %495 = vector.broadcast %494 : vector<8x1xf32> to vector<8x256xf32>
    %496 = vector.shape_cast %493 : vector<8x1xf32> to vector<8x1xf32>
    %497 = vector.broadcast %496 : vector<8x1xf32> to vector<8x256xf32>
    %498 = arith.select %484, %495, %497 : vector<8x256xi1>, vector<8x256xf32>
    %499 = arith.mulf %491, %491 : vector<8x256xf32>
    %500 = arith.subf %498, %499 : vector<8x256xf32>
    %501 = arith.subf %473, %491 : vector<8x256xf32>
    %cst_191 = arith.constant 9.99999974E-6 : f32
    %502 = vector.broadcast %cst_191 : f32 to vector<8x256xf32>
    %503 = arith.addf %500, %502 : vector<8x256xf32>
    %504 = math.rsqrt %503 : vector<8x256xf32>
    %505 = arith.mulf %501, %504 : vector<8x256xf32>
    %506 = vector.broadcast %474 : vector<1x256xf32> to vector<8x256xf32>
    %507 = arith.mulf %505, %506 : vector<8x256xf32>
    %508 = vector.broadcast %475 : vector<1x256xf32> to vector<8x256xf32>
    %509 = arith.addf %507, %508 : vector<8x256xf32>
    %cst_192 = arith.constant 5.000000e-01 : f32
    %510 = vector.broadcast %cst_192 : f32 to vector<8x256xf32>
    %511 = arith.mulf %510, %509 : vector<8x256xf32>
    %512 = arith.mulf %509, %509 : vector<8x256xf32>
    %513 = arith.mulf %512, %509 : vector<8x256xf32>
    %cst_193 = arith.constant 4.471500e-02 : f32
    %514 = vector.broadcast %cst_193 : f32 to vector<8x256xf32>
    %515 = arith.mulf %514, %513 : vector<8x256xf32>
    %516 = arith.addf %509, %515 : vector<8x256xf32>
    %cst_194 = arith.constant 0.797884583 : f32
    %517 = vector.broadcast %cst_194 : f32 to vector<8x256xf32>
    %518 = arith.mulf %517, %516 : vector<8x256xf32>
    %519 = math.tanh %518 : vector<8x256xf32>
    %cst_195 = arith.constant 1.000000e+00 : f32
    %520 = vector.broadcast %cst_195 : f32 to vector<8x256xf32>
    %521 = arith.addf %520, %519 : vector<8x256xf32>
    %522 = arith.mulf %511, %521 : vector<8x256xf32>
    %c0_196 = arith.constant 0 : index
    %c0_197 = arith.constant 0 : index
    %523 = vector.load %arg16[%c0_196, %c0_197] : memref<256x128xbf16, #tpu.memory_space<vmem>>, vector<256x128xbf16>
    %524 = arith.truncf %522 : vector<8x256xf32> to vector<8x256xbf16>
    %cst_198 = arith.constant dense<0.000000e+00> : vector<8x128xf32>
    %525 = tpu.matmul %524, %523, %cst_198 {dimension_numbers = #tpu.dot_dimension_numbers<[1], [0], [0], [1], [0, 0, 1, 1], [], []>} : vector<8x256xbf16>, vector<256x128xbf16>, vector<8x128xf32> -> vector<8x128xf32>
    %c0_199 = arith.constant 0 : index
    %c0_200 = arith.constant 0 : index
    %526 = vector.load %arg17[%c0_199, %c0_200] : memref<3x128xf32, #tpu.memory_space<vmem>>, vector<1x128xf32>
    %527 = vector.broadcast %526 : vector<1x128xf32> to vector<8x128xf32>
    %528 = arith.addf %525, %527 : vector<8x128xf32>
    %c1_201 = arith.constant 1 : index
    %c0_202 = arith.constant 0 : index
    %529 = vector.load %arg17[%c1_201, %c0_202] : memref<3x128xf32, #tpu.memory_space<vmem>>, vector<1x128xf32>
    %c2_203 = arith.constant 2 : index
    %c0_204 = arith.constant 0 : index
    %530 = vector.load %arg17[%c2_203, %c0_204] : memref<3x128xf32, #tpu.memory_space<vmem>>, vector<1x128xf32>
    %c0_205 = arith.constant 0 : index
    %c0_206 = arith.constant 0 : index
    %531 = vector.load %arg24[%c0_205, %c0_206] : memref<128x128xbf16, #tpu.memory_space<vmem>>, vector<128x128xbf16>
    %532 = arith.truncf %528 : vector<8x128xf32> to vector<8x128xbf16>
    %cst_207 = arith.constant dense<0.000000e+00> : vector<8x128xf32>
    %533 = tpu.matmul %532, %531, %cst_207 {dimension_numbers = #tpu.dot_dimension_numbers<[1], [0], [0], [1], [0, 0, 1, 1], [], []>} : vector<8x128xbf16>, vector<128x128xbf16>, vector<8x128xf32> -> vector<8x128xf32>
    %534 = arith.mulf %528, %528 : vector<8x128xf32>
    %535 = arith.truncf %534 : vector<8x128xf32> to vector<8x128xbf16>
    %cst_208 = arith.constant dense<0.000000e+00> : vector<8x128xf32>
    %536 = tpu.matmul %535, %531, %cst_208 {dimension_numbers = #tpu.dot_dimension_numbers<[1], [0], [0], [1], [0, 0, 1, 1], [], []>} : vector<8x128xbf16>, vector<128x128xbf16>, vector<8x128xf32> -> vector<8x128xf32>
    %537 = tpu.iota {dimensions = array<i32: 1>} : vector<8x128xi32>
    %c64_i32_209 = arith.constant 64 : i32
    %538 = vector.broadcast %c64_i32_209 : i32 to vector<8x128xi32>
    %539 = arith.cmpi slt, %537, %538 : vector<8x128xi32>
    %540 = vector.extract_strided_slice %533 {offsets = [0, 0], sizes = [8, 1], strides = [1, 1]} : vector<8x128xf32> to vector<8x1xf32>
    %541 = vector.extract_strided_slice %533 {offsets = [0, 1], sizes = [8, 1], strides = [1, 1]} : vector<8x128xf32> to vector<8x1xf32>
    %542 = vector.shape_cast %540 : vector<8x1xf32> to vector<8x1xf32>
    %543 = vector.broadcast %542 : vector<8x1xf32> to vector<8x128xf32>
    %544 = vector.shape_cast %541 : vector<8x1xf32> to vector<8x1xf32>
    %545 = vector.broadcast %544 : vector<8x1xf32> to vector<8x128xf32>
    %546 = arith.select %539, %543, %545 : vector<8x128xi1>, vector<8x128xf32>
    %547 = vector.extract_strided_slice %536 {offsets = [0, 0], sizes = [8, 1], strides = [1, 1]} : vector<8x128xf32> to vector<8x1xf32>
    %548 = vector.extract_strided_slice %536 {offsets = [0, 1], sizes = [8, 1], strides = [1, 1]} : vector<8x128xf32> to vector<8x1xf32>
    %549 = vector.shape_cast %547 : vector<8x1xf32> to vector<8x1xf32>
    %550 = vector.broadcast %549 : vector<8x1xf32> to vector<8x128xf32>
    %551 = vector.shape_cast %548 : vector<8x1xf32> to vector<8x1xf32>
    %552 = vector.broadcast %551 : vector<8x1xf32> to vector<8x128xf32>
    %553 = arith.select %539, %550, %552 : vector<8x128xi1>, vector<8x128xf32>
    %554 = arith.mulf %546, %546 : vector<8x128xf32>
    %555 = arith.subf %553, %554 : vector<8x128xf32>
    %556 = arith.subf %528, %546 : vector<8x128xf32>
    %cst_210 = arith.constant 9.99999974E-6 : f32
    %557 = vector.broadcast %cst_210 : f32 to vector<8x128xf32>
    %558 = arith.addf %555, %557 : vector<8x128xf32>
    %559 = math.rsqrt %558 : vector<8x128xf32>
    %560 = arith.mulf %556, %559 : vector<8x128xf32>
    %561 = vector.broadcast %529 : vector<1x128xf32> to vector<8x128xf32>
    %562 = arith.mulf %560, %561 : vector<8x128xf32>
    %563 = vector.broadcast %530 : vector<1x128xf32> to vector<8x128xf32>
    %564 = arith.addf %562, %563 : vector<8x128xf32>
    %cst_211 = arith.constant 5.000000e-01 : f32
    %565 = vector.broadcast %cst_211 : f32 to vector<8x128xf32>
    %566 = arith.mulf %565, %564 : vector<8x128xf32>
    %567 = arith.mulf %564, %564 : vector<8x128xf32>
    %568 = arith.mulf %567, %564 : vector<8x128xf32>
    %cst_212 = arith.constant 4.471500e-02 : f32
    %569 = vector.broadcast %cst_212 : f32 to vector<8x128xf32>
    %570 = arith.mulf %569, %568 : vector<8x128xf32>
    %571 = arith.addf %564, %570 : vector<8x128xf32>
    %cst_213 = arith.constant 0.797884583 : f32
    %572 = vector.broadcast %cst_213 : f32 to vector<8x128xf32>
    %573 = arith.mulf %572, %571 : vector<8x128xf32>
    %574 = math.tanh %573 : vector<8x128xf32>
    %cst_214 = arith.constant 1.000000e+00 : f32
    %575 = vector.broadcast %cst_214 : f32 to vector<8x128xf32>
    %576 = arith.addf %575, %574 : vector<8x128xf32>
    %577 = arith.mulf %566, %576 : vector<8x128xf32>
    %c0_215 = arith.constant 0 : index
    %c0_216 = arith.constant 0 : index
    %578 = vector.load %arg18[%c0_215, %c0_216] : memref<128x128xbf16, #tpu.memory_space<vmem>>, vector<128x128xbf16>
    %579 = arith.truncf %577 : vector<8x128xf32> to vector<8x128xbf16>
    %cst_217 = arith.constant dense<0.000000e+00> : vector<8x128xf32>
    %580 = tpu.matmul %579, %578, %cst_217 {dimension_numbers = #tpu.dot_dimension_numbers<[1], [0], [0], [1], [0, 0, 1, 1], [], []>} : vector<8x128xbf16>, vector<128x128xbf16>, vector<8x128xf32> -> vector<8x128xf32>
    %c0_218 = arith.constant 0 : index
    %c0_219 = arith.constant 0 : index
    %581 = vector.load %arg19[%c0_218, %c0_219] : memref<3x128xf32, #tpu.memory_space<vmem>>, vector<1x128xf32>
    %582 = vector.broadcast %581 : vector<1x128xf32> to vector<8x128xf32>
    %583 = arith.addf %580, %582 : vector<8x128xf32>
    %c1_220 = arith.constant 1 : index
    %c0_221 = arith.constant 0 : index
    %584 = vector.load %arg19[%c1_220, %c0_221] : memref<3x128xf32, #tpu.memory_space<vmem>>, vector<1x128xf32>
    %c2_222 = arith.constant 2 : index
    %c0_223 = arith.constant 0 : index
    %585 = vector.load %arg19[%c2_222, %c0_223] : memref<3x128xf32, #tpu.memory_space<vmem>>, vector<1x128xf32>
    %c0_224 = arith.constant 0 : index
    %c0_225 = arith.constant 0 : index
    %586 = vector.load %arg25[%c0_224, %c0_225] : memref<128x128xbf16, #tpu.memory_space<vmem>>, vector<128x128xbf16>
    %587 = arith.truncf %583 : vector<8x128xf32> to vector<8x128xbf16>
    %cst_226 = arith.constant dense<0.000000e+00> : vector<8x128xf32>
    %588 = tpu.matmul %587, %586, %cst_226 {dimension_numbers = #tpu.dot_dimension_numbers<[1], [0], [0], [1], [0, 0, 1, 1], [], []>} : vector<8x128xbf16>, vector<128x128xbf16>, vector<8x128xf32> -> vector<8x128xf32>
    %589 = arith.mulf %583, %583 : vector<8x128xf32>
    %590 = arith.truncf %589 : vector<8x128xf32> to vector<8x128xbf16>
    %cst_227 = arith.constant dense<0.000000e+00> : vector<8x128xf32>
    %591 = tpu.matmul %590, %586, %cst_227 {dimension_numbers = #tpu.dot_dimension_numbers<[1], [0], [0], [1], [0, 0, 1, 1], [], []>} : vector<8x128xbf16>, vector<128x128xbf16>, vector<8x128xf32> -> vector<8x128xf32>
    %592 = tpu.iota {dimensions = array<i32: 1>} : vector<8x128xi32>
    %c64_i32_228 = arith.constant 64 : i32
    %593 = vector.broadcast %c64_i32_228 : i32 to vector<8x128xi32>
    %594 = arith.cmpi slt, %592, %593 : vector<8x128xi32>
    %595 = vector.extract_strided_slice %588 {offsets = [0, 0], sizes = [8, 1], strides = [1, 1]} : vector<8x128xf32> to vector<8x1xf32>
    %596 = vector.extract_strided_slice %588 {offsets = [0, 1], sizes = [8, 1], strides = [1, 1]} : vector<8x128xf32> to vector<8x1xf32>
    %597 = vector.shape_cast %595 : vector<8x1xf32> to vector<8x1xf32>
    %598 = vector.broadcast %597 : vector<8x1xf32> to vector<8x128xf32>
    %599 = vector.shape_cast %596 : vector<8x1xf32> to vector<8x1xf32>
    %600 = vector.broadcast %599 : vector<8x1xf32> to vector<8x128xf32>
    %601 = arith.select %594, %598, %600 : vector<8x128xi1>, vector<8x128xf32>
    %602 = vector.extract_strided_slice %591 {offsets = [0, 0], sizes = [8, 1], strides = [1, 1]} : vector<8x128xf32> to vector<8x1xf32>
    %603 = vector.extract_strided_slice %591 {offsets = [0, 1], sizes = [8, 1], strides = [1, 1]} : vector<8x128xf32> to vector<8x1xf32>
    %604 = vector.shape_cast %602 : vector<8x1xf32> to vector<8x1xf32>
    %605 = vector.broadcast %604 : vector<8x1xf32> to vector<8x128xf32>
    %606 = vector.shape_cast %603 : vector<8x1xf32> to vector<8x1xf32>
    %607 = vector.broadcast %606 : vector<8x1xf32> to vector<8x128xf32>
    %608 = arith.select %594, %605, %607 : vector<8x128xi1>, vector<8x128xf32>
    %609 = arith.mulf %601, %601 : vector<8x128xf32>
    %610 = arith.subf %608, %609 : vector<8x128xf32>
    %611 = arith.subf %583, %601 : vector<8x128xf32>
    %cst_229 = arith.constant 9.99999974E-6 : f32
    %612 = vector.broadcast %cst_229 : f32 to vector<8x128xf32>
    %613 = arith.addf %610, %612 : vector<8x128xf32>
    %614 = math.rsqrt %613 : vector<8x128xf32>
    %615 = arith.mulf %611, %614 : vector<8x128xf32>
    %616 = vector.broadcast %584 : vector<1x128xf32> to vector<8x128xf32>
    %617 = arith.mulf %615, %616 : vector<8x128xf32>
    %618 = vector.broadcast %585 : vector<1x128xf32> to vector<8x128xf32>
    %619 = arith.addf %617, %618 : vector<8x128xf32>
    %cst_230 = arith.constant 5.000000e-01 : f32
    %620 = vector.broadcast %cst_230 : f32 to vector<8x128xf32>
    %621 = arith.mulf %620, %619 : vector<8x128xf32>
    %622 = arith.mulf %619, %619 : vector<8x128xf32>
    %623 = arith.mulf %622, %619 : vector<8x128xf32>
    %cst_231 = arith.constant 4.471500e-02 : f32
    %624 = vector.broadcast %cst_231 : f32 to vector<8x128xf32>
    %625 = arith.mulf %624, %623 : vector<8x128xf32>
    %626 = arith.addf %619, %625 : vector<8x128xf32>
    %cst_232 = arith.constant 0.797884583 : f32
    %627 = vector.broadcast %cst_232 : f32 to vector<8x128xf32>
    %628 = arith.mulf %627, %626 : vector<8x128xf32>
    %629 = math.tanh %628 : vector<8x128xf32>
    %cst_233 = arith.constant 1.000000e+00 : f32
    %630 = vector.broadcast %cst_233 : f32 to vector<8x128xf32>
    %631 = arith.addf %630, %629 : vector<8x128xf32>
    %632 = arith.mulf %621, %631 : vector<8x128xf32>
    %c0_234 = arith.constant 0 : index
    %c0_235 = arith.constant 0 : index
    %633 = vector.load %arg20[%c0_234, %c0_235] : memref<128x128xbf16, #tpu.memory_space<vmem>>, vector<128x128xbf16>
    %634 = arith.truncf %632 : vector<8x128xf32> to vector<8x128xbf16>
    %cst_236 = arith.constant dense<0.000000e+00> : vector<8x128xf32>
    %635 = tpu.matmul %634, %633, %cst_236 {dimension_numbers = #tpu.dot_dimension_numbers<[1], [0], [0], [1], [0, 0, 1, 1], [], []>} : vector<8x128xbf16>, vector<128x128xbf16>, vector<8x128xf32> -> vector<8x128xf32>
    %c0_237 = arith.constant 0 : index
    %c0_238 = arith.constant 0 : index
    %636 = vector.load %arg21[%c0_237, %c0_238] : memref<1x128xf32, #tpu.memory_space<vmem>>, vector<1x128xf32>
    %637 = vector.broadcast %636 : vector<1x128xf32> to vector<8x128xf32>
    %638 = arith.addf %635, %637 : vector<8x128xf32>
    %639 = tpu.iota {dimensions = array<i32: 1>} : vector<8x128xi32>
    %c12_i32 = arith.constant 12 : i32
    %640 = vector.broadcast %c12_i32 : i32 to vector<8x128xi32>
    %641 = arith.cmpi slt, %639, %640 : vector<8x128xi32>
    %642 = math.tanh %638 : vector<8x128xf32>
    %643 = arith.select %641, %642, %638 : vector<8x128xi1>, vector<8x128xf32>
    %c0_239 = arith.constant 0 : index
    %c0_240 = arith.constant 0 : index
    %644 = vector.load %arg26[%c0_239, %c0_240] : memref<8x128xf32, #tpu.memory_space<vmem>>, vector<8x128xf32>
    tpu.vector_store %arg26[%c0_239, %c0_240], %643 {strides = array<i32>} : memref<8x128xf32, #tpu.memory_space<vmem>>, vector<8x128xf32>,
    return
  }
  func.func @transform_0(%arg0: i32) -> (i32, i32) {
    %c0_i32 = arith.constant 0 : i32
    %c0_i32_0 = arith.constant 0 : i32
    return %arg0, %c0_i32 : i32, i32
  }
  func.func @transform_1(%arg0: i32) -> (i32, i32, i32) {
    %c0_i32 = arith.constant 0 : i32
    %c0_i32_0 = arith.constant 0 : i32
    %c0_i32_1 = arith.constant 0 : i32
    %c0_i32_2 = arith.constant 0 : i32
    return %c0_i32, %c0_i32_0, %c0_i32_1 : i32, i32, i32
  }
  func.func @transform_2(%arg0: i32) -> (i32, i32) {
    %c0_i32 = arith.constant 0 : i32
    %c0_i32_0 = arith.constant 0 : i32
    %c0_i32_1 = arith.constant 0 : i32
    return %c0_i32, %c0_i32_0 : i32, i32
  }
  func.func @transform_3(%arg0: i32) -> (i32, i32) {
    %c0_i32 = arith.constant 0 : i32
    %c0_i32_0 = arith.constant 0 : i32
    %c0_i32_1 = arith.constant 0 : i32
    return %c0_i32, %c0_i32_0 : i32, i32
  }
  func.func @transform_4(%arg0: i32) -> (i32, i32) {
    %c0_i32 = arith.constant 0 : i32
    %c0_i32_0 = arith.constant 0 : i32
    %c0_i32_1 = arith.constant 0 : i32
    return %c0_i32, %c0_i32_0 : i32, i32
  }
  func.func @transform_5(%arg0: i32) -> (i32, i32) {
    %c0_i32 = arith.constant 0 : i32
    %c0_i32_0 = arith.constant 0 : i32
    %c0_i32_1 = arith.constant 0 : i32
    return %c0_i32, %c0_i32_0 : i32, i32
  }
  func.func @transform_6(%arg0: i32) -> (i32, i32) {
    %c0_i32 = arith.constant 0 : i32
    %c0_i32_0 = arith.constant 0 : i32
    %c0_i32_1 = arith.constant 0 : i32
    return %c0_i32, %c0_i32_0 : i32, i32
  }
  func.func @transform_7(%arg0: i32) -> (i32, i32) {
    %c0_i32 = arith.constant 0 : i32
    %c0_i32_0 = arith.constant 0 : i32
    %c0_i32_1 = arith.constant 0 : i32
    return %c0_i32, %c0_i32_0 : i32, i32
  }
  func.func @transform_8(%arg0: i32) -> (i32, i32) {
    %c0_i32 = arith.constant 0 : i32
    %c0_i32_0 = arith.constant 0 : i32
    %c0_i32_1 = arith.constant 0 : i32
    return %c0_i32, %c0_i32_0 : i32, i32
  }
  func.func @transform_9(%arg0: i32) -> (i32, i32) {
    %c0_i32 = arith.constant 0 : i32
    %c0_i32_0 = arith.constant 0 : i32
    %c0_i32_1 = arith.constant 0 : i32
    return %c0_i32, %c0_i32_0 : i32, i32
  }
  func.func @transform_10(%arg0: i32) -> (i32, i32) {
    %c0_i32 = arith.constant 0 : i32
    %c0_i32_0 = arith.constant 0 : i32
    %c0_i32_1 = arith.constant 0 : i32
    return %c0_i32, %c0_i32_0 : i32, i32
  }
  func.func @transform_11(%arg0: i32) -> (i32, i32) {
    %c0_i32 = arith.constant 0 : i32
    %c0_i32_0 = arith.constant 0 : i32
    %c0_i32_1 = arith.constant 0 : i32
    return %c0_i32, %c0_i32_0 : i32, i32
  }
  func.func @transform_12(%arg0: i32) -> (i32, i32) {
    %c0_i32 = arith.constant 0 : i32
    %c0_i32_0 = arith.constant 0 : i32
    %c0_i32_1 = arith.constant 0 : i32
    return %c0_i32, %c0_i32_0 : i32, i32
  }
  func.func @transform_13(%arg0: i32) -> (i32, i32) {
    %c0_i32 = arith.constant 0 : i32
    %c0_i32_0 = arith.constant 0 : i32
    %c0_i32_1 = arith.constant 0 : i32
    return %c0_i32, %c0_i32_0 : i32, i32
  }
  func.func @transform_14(%arg0: i32) -> (i32, i32) {
    %c0_i32 = arith.constant 0 : i32
    %c0_i32_0 = arith.constant 0 : i32
    %c0_i32_1 = arith.constant 0 : i32
    return %c0_i32, %c0_i32_0 : i32, i32
  }
  func.func @transform_15(%arg0: i32) -> (i32, i32) {
    %c0_i32 = arith.constant 0 : i32
    %c0_i32_0 = arith.constant 0 : i32
    %c0_i32_1 = arith.constant 0 : i32
    return %c0_i32, %c0_i32_0 : i32, i32
  }
  func.func @transform_16(%arg0: i32) -> (i32, i32) {
    %c0_i32 = arith.constant 0 : i32
    %c0_i32_0 = arith.constant 0 : i32
    %c0_i32_1 = arith.constant 0 : i32
    return %c0_i32, %c0_i32_0 : i32, i32
  }
  func.func @transform_17(%arg0: i32) -> (i32, i32) {
    %c0_i32 = arith.constant 0 : i32
    %c0_i32_0 = arith.constant 0 : i32
    %c0_i32_1 = arith.constant 0 : i32
    return %c0_i32, %c0_i32_0 : i32, i32
  }
  func.func @transform_18(%arg0: i32) -> (i32, i32) {
    %c0_i32 = arith.constant 0 : i32
    %c0_i32_0 = arith.constant 0 : i32
    %c0_i32_1 = arith.constant 0 : i32
    return %c0_i32, %c0_i32_0 : i32, i32
  }
  func.func @transform_19(%arg0: i32) -> (i32, i32) {
    %c0_i32 = arith.constant 0 : i32
    %c0_i32_0 = arith.constant 0 : i32
    %c0_i32_1 = arith.constant 0 : i32
    return %c0_i32, %c0_i32_0 : i32, i32
  }
  func.func @transform_20(%arg0: i32) -> (i32, i32) {
    %c0_i32 = arith.constant 0 : i32
    %c0_i32_0 = arith.constant 0 : i32
    %c0_i32_1 = arith.constant 0 : i32
    return %c0_i32, %c0_i32_0 : i32, i32
  }
  func.func @transform_21(%arg0: i32) -> (i32, i32) {
    %c0_i32 = arith.constant 0 : i32
    %c0_i32_0 = arith.constant 0 : i32
    %c0_i32_1 = arith.constant 0 : i32
    return %c0_i32, %c0_i32_0 : i32, i32
  }
  func.func @transform_22(%arg0: i32) -> (i32, i32) {
    %c0_i32 = arith.constant 0 : i32
    %c0_i32_0 = arith.constant 0 : i32
    %c0_i32_1 = arith.constant 0 : i32
    return %c0_i32, %c0_i32_0 : i32, i32
  }
  func.func @transform_23(%arg0: i32) -> (i32, i32) {
    %c0_i32 = arith.constant 0 : i32
    %c0_i32_0 = arith.constant 0 : i32
    %c0_i32_1 = arith.constant 0 : i32
    return %c0_i32, %c0_i32_0 : i32, i32
  }
  func.func @transform_24(%arg0: i32) -> (i32, i32) {
    %c0_i32 = arith.constant 0 : i32
    %c0_i32_0 = arith.constant 0 : i32
    %c0_i32_1 = arith.constant 0 : i32
    return %c0_i32, %c0_i32_0 : i32, i32
  }
  func.func @transform_25(%arg0: i32) -> (i32, i32) {
    %c0_i32 = arith.constant 0 : i32
    %c0_i32_0 = arith.constant 0 : i32
    return %arg0, %c0_i32 : i32, i32
  }
}

</mosaic_0001>

<bundles_post_ra>
// kernel: tpu_custom_call.1
= control target key start
LH: loop header
LB: loop body
LE: loop exit
PB: predicated region body
PF: predicated region fallthrough
CT: control target
= control target key end

     0   :  { %s7706_s0 = inlined_call_operand.hbm [shape: f32[8,128], index: 0, kind: input, shape index: {}]   ;;  %s7707_s1 = inlined_call_operand.hbm [shape: bf16[8,128,128], index: 1, kind: input, shape index: {}]   ;;  %s7708_s2 = inlined_call_operand.hbm [shape: f32[8,128], index: 2, kind: input, shape index: {}]   ;;  %s7709_s3 = inlined_call_operand.hbm [shape: f32[8,128], index: 3, kind: input, shape index: {}]   ;;  %s7710_s4 = inlined_call_operand.hbm [shape: f32[8,128], index: 4, kind: input, shape index: {}]   ;;  %s7711_s5 = inlined_call_operand.hbm [shape: bf16[128,256], index: 5, kind: input, shape index: {}]   ;;  %s7712_s6 = inlined_call_operand.hbm [shape: f32[1,256], index: 6, kind: input, shape index: {}]   ;;  %s7713_s7 = inlined_call_operand.hbm [shape: bf16[256,128], index: 7, kind: input, shape index: {}]   ;;  %s7714_s8 = inlined_call_operand.hbm [shape: f32[1,128], index: 8, kind: input, shape index: {}]   ;;  %s7715_s9 = inlined_call_operand.hbm [shape: bf16[128,256], index: 9, kind: input, shape index: {}]   ;;  %s7716_s10 = inlined_call_operand.vmem [shape: f32[3,256], index: 10, kind: input, shape index: {}]   ;;  %s7717_s11 = inlined_call_operand.hbm [shape: bf16[256,128], index: 11, kind: input, shape index: {}]   ;;  %s7718_s12 = inlined_call_operand.vmem [shape: f32[3,128], index: 12, kind: input, shape index: {}]   ;;  %s7719_s13 = inlined_call_operand.hbm [shape: bf16[128,256], index: 13, kind: input, shape index: {}]   ;;  %s7720_s14 = inlined_call_operand.vmem [shape: f32[3,256], index: 14, kind: input, shape index: {}]   ;;  %s7721_s15 = inlined_call_operand.hbm [shape: bf16[256,128], index: 15, kind: input, shape index: {}]   ;;  %s7722_s16 = inlined_call_operand.vmem [shape: f32[3,128], index: 16, kind: input, shape index: {}]   ;;  %s7723_s17 = inlined_call_operand.hbm [shape: bf16[128,128], index: 17, kind: input, shape index: {}]   ;;  %s7724_s18 = inlined_call_operand.vmem [shape: f32[3,128], index: 18, kind: input, shape index: {}]   ;;  %s7725_s19 = inlined_call_operand.hbm [shape: bf16[128,128], index: 19, kind: input, shape index: {}]   ;;  %s7726_s20 = inlined_call_operand.vmem [shape: f32[1,128], index: 20, kind: input, shape index: {}]   ;;  %s7727_s21 = inlined_call_operand.hbm [shape: bf16[128,128], index: 21, kind: input, shape index: {}]   ;;  %s7728_s22 = inlined_call_operand.hbm [shape: bf16[256,128], index: 22, kind: input, shape index: {}]   ;;  %s7729_s23 = inlined_call_operand.hbm [shape: bf16[128,128], index: 23, kind: input, shape index: {}]   ;;  %s7730_s24 = inlined_call_operand.hbm [shape: bf16[128,128], index: 24, kind: input, shape index: {}]   ;;  %s7731_s25 = inlined_call_operand.hbm [shape: f32[8,128], index: 25, kind: output, shape index: {}]  }
   0x1   :  { %7732 = sst [smem:[#allocation44_spill]] %s7706_s0 }
   0x2   :  { %7733 = sst [smem:[#allocation45_spill]] %s7707_s1 }
   0x3   :  { %7734 = sst [smem:[#allocation46_spill]] %s7708_s2 }
   0x4   :  { %7735 = sst [smem:[#allocation47_spill]] %s7709_s3 }
   0x5   :  { %7736 = sst [smem:[#allocation48_spill]] %s7710_s4 }
   0x6   :  { %7737 = sst [smem:[#allocation49_spill]] %s7711_s5 }
   0x7   :  { %7738 = sst [smem:[#allocation50_spill]] %s7712_s6 }
   0x8   :  { %7739 = sst [smem:[#allocation51_spill]] %s7713_s7 }
   0x9   :  { %7740 = sst [smem:[#allocation52_spill]] %s7714_s8 }
   0xa   :  { %7741 = sst [smem:[#allocation53_spill]] %s7715_s9 }
   0xb   :  { %7742 = sst [smem:[#allocation54_spill]] %s7731_s25 }
   0xc   :  { %30 = vsyncpa [#allocation3], 0 }
   0xd   :  { %31 = vsyncpa [#allocation6], 0 }
   0xe   :  { %32 = vsyncpa [#allocation9], 0 }
   0xf   :  { %33 = vsyncpa [#allocation12], 0 }
  0x10   :  { %34 = vsyncpa [#allocation15], 0 }
  0x11   :  { %35 = vsyncpa [#allocation18], 0 }
  0x12   :  { %36 = vsyncpa [#allocation21], 0 }
  0x13   :  { %37 = vsyncpa [#allocation24], 0 }
  0x14   :  { %38 = vsyncpa [#allocation27], 0 }
  0x15   :  { %39 = vsyncpa [#allocation30], 0 }
  0x16   :  { %40 = vsyncpa [#allocation4], 0  ;;  %s6581_s29 = smov [#allocation5]  }
  0x17   :  { %s56_s2 = sshll.u32 %s6581_s29, 4  ;;  %s57_s2 = int_to_ptr.vmem [resolvable:$true] %s56_s2 }
  0x18   :  { %s6167_s6 = scalar_lea.vmem %s57_s2, 8192  ;;  %p6172_p1 = scmp.lt.s32.totalorder %s57_s2, %s57_s2 }
  0x19   :  { %p6168_p0 = scmp.ne.s32.totalorder %s57_s2, %s6167_s6  ;;  %p6173_p2 = scmp.lt.s32.totalorder %s6167_s6, %s6167_s6 }
  0x1b   :  { %p6174_p3 = por %p6173_p2, %p6172_p1 }
  0x1d   :  { %p6175_p4 = pnand %p6174_p3, %p6168_p0 }
  0x1f   :  { %6178 = shalt.err (!%p6175_p4)
}
  0x20   :  { %s6582_s30 = smov 64   ;;  %s6583_s7 = smov 4  }
  0x21   :  { %s7743_s1 = sld [smem:[#allocation45_spill]]  ;;  %s6584_s8 = smov [#allocation8]  }
  0x22   :  { %s79_s27 = sshll.u32 %s6584_s8, 4  ;;  %s6585_s4 = smov [#allocation11]   ;;  %s80_s27 = int_to_ptr.vmem [resolvable:$true] %s79_s27 }
  0x23   :  { %s98_s28 = sshll.u32 %s6585_s4, 4  ;;  %s6187_s9 = scalar_lea.vmem %s80_s27, 128  ;;  %s99_s28 = int_to_ptr.vmem [resolvable:$true] %s98_s28 }
  0x24   :  { %p6188_p5 = scmp.ne.s32.totalorder %s80_s27, %s6187_s9  ;;  %p6192_p6 = scmp.lt.s32.totalorder %s80_s27, %s80_s27 }
  0x25   :  { %p6193_p7 = scmp.lt.s32.totalorder %s6187_s9, %s6187_s9 }
  0x27   :  { %62 = dma.hbm_to_vmem [thread:$0]  %s7743_s1, 8192, %s57_s2, [#allocation6], %s6582_s30, %s6582_s30, %s6583_s7  }
  0x28   :  { %p6194_p8 = por %p6193_p7, %p6192_p6 }
  0x2a   :  { %p6195_p9 = pnand %p6194_p8, %p6188_p5 }
  0x2c   :  { %6198 = shalt.err (!%p6195_p9)
}
  0x2d   :  { %s7744_s29 = sld [smem:[#allocation47_spill]]  ;;  %s6207_s6 = scalar_lea.vmem %s99_s28, 2048 }
  0x2e   :  { %p6208_p10 = scmp.ne.s32.totalorder %s99_s28, %s6207_s6  ;;  %p6212_p11 = scmp.lt.s32.totalorder %s99_s28, %s99_s28 }
  0x2f   :  { %p6213_p12 = scmp.lt.s32.totalorder %s6207_s6, %s6207_s6 }
  0x31   :  { %p6214_p13 = por %p6213_p12, %p6212_p11 }
  0x33   :  { %82 = dma.hbm_to_vmem [thread:$0]  %s7744_s29, 128, %s80_s27, [#allocation9]  }
  0x34   :  { %p6215_p0 = pnand %p6214_p13, %p6208_p10 }
  0x36   :  { %6218 = shalt.err (!%p6215_p0)
}
  0x37   :  { %s6586_s2 = smov 128   ;;  %s6587_s3 = smov 8  }
  0x38   :  { %s7745_s8 = sld [smem:[#allocation49_spill]]  ;;  %s6588_s4 = smov [#allocation14]  }
  0x39   :  { %s120_s9 = sshll.u32 %s6588_s4, 4  ;;  %s6589_s27 = smov [#allocation17]   ;;  %s121_s9 = int_to_ptr.vmem [resolvable:$true] %s120_s9 }
  0x3a   :  { %s142_s5 = sshll.u32 %s6589_s27, 4  ;;  %s6227_s0 = scalar_lea.vmem %s121_s9, 2048  ;;  %s143_s5 = int_to_ptr.vmem [resolvable:$true] %s142_s5 }
  0x3b   :  { %p6228_p1 = scmp.ne.s32.totalorder %s121_s9, %s6227_s0  ;;  %p6232_p2 = scmp.lt.s32.totalorder %s121_s9, %s121_s9 }
  0x3c   :  { %p6233_p3 = scmp.lt.s32.totalorder %s6227_s0, %s6227_s0 }
  0x3e   :  { %104 = dma.hbm_to_vmem [thread:$0]  %s7745_s8, 2048, %s99_s28, [#allocation12], %s6586_s2, %s6586_s2, %s6587_s3  }
  0x3f   :  { %p6234_p4 = por %p6233_p3, %p6232_p2 }
  0x41   :  { %p6235_p5 = pnand %p6234_p4, %p6228_p1 }
  0x43   :  { %6238 = shalt.err (!%p6235_p5)
}
  0x44   :  { %s7746_s25 = sld [smem:[#allocation51_spill]]  ;;  %s6247_s28 = scalar_lea.vmem %s143_s5, 2048 }
  0x45   :  { %p6248_p6 = scmp.ne.s32.totalorder %s143_s5, %s6247_s28  ;;  %p6252_p7 = scmp.lt.s32.totalorder %s143_s5, %s143_s5 }
  0x46   :  { %p6253_p8 = scmp.lt.s32.totalorder %s6247_s28, %s6247_s28 }
  0x48   :  { %p6254_p9 = por %p6253_p8, %p6252_p7 }
  0x4a   :  { %126 = dma.hbm_to_vmem [thread:$0]  %s7746_s25, 2048, %s121_s9, [#allocation15], %s6582_s30, %s6582_s30, %s6583_s7  }
  0x4b   :  { %p6255_p10 = pnand %p6254_p9, %p6248_p6 }
  0x4d   :  { %6258 = shalt.err (!%p6255_p10)
}
  0x4e   :  { %s7747_s8 = sld [smem:[#allocation53_spill]]  ;;  %s6590_s4 = smov [#allocation20]  }
  0x4f   :  { %s170_s27 = sshll.u32 %s6590_s4, 4  ;;  %s6591_s0 = smov [#allocation23]   ;;  %s171_s27 = int_to_ptr.vmem [resolvable:$true] %s170_s27 }
  0x50   :  { %s198_s25 = sshll.u32 %s6591_s0, 4  ;;  %s6267_s9 = scalar_lea.vmem %s171_s27, 2048  ;;  %s199_s25 = int_to_ptr.vmem [resolvable:$true] %s198_s25 }
  0x51   :  { %p6268_p11 = scmp.ne.s32.totalorder %s171_s27, %s6267_s9  ;;  %p6272_p12 = scmp.lt.s32.totalorder %s171_s27, %s171_s27 }
  0x52   :  { %p6273_p13 = scmp.lt.s32.totalorder %s6267_s9, %s6267_s9 }
  0x54   :  { %148 = dma.hbm_to_vmem [thread:$0]  %s7747_s8, 2048, %s143_s5, [#allocation18], %s6586_s2, %s6586_s2, %s6587_s3  }
  0x55   :  { %p6274_p0 = por %p6273_p13, %p6272_p12 }
  0x57   :  { %p6275_p1 = pnand %p6274_p0, %p6268_p11 }
  0x59   :  { %6278 = shalt.err (!%p6275_p1)
}
  0x5a   :  { %176 = dma.hbm_to_vmem [thread:$0]  %s7719_s13, 2048, %s171_s27, [#allocation21], %s6586_s2, %s6586_s2, %s6587_s3  }
  0x5b   :  { %s6287_s5 = scalar_lea.vmem %s199_s25, 1024  ;;  %p6292_p3 = scmp.lt.s32.totalorder %s199_s25, %s199_s25 }
  0x5c   :  { %p6288_p2 = scmp.ne.s32.totalorder %s199_s25, %s6287_s5  ;;  %p6293_p4 = scmp.lt.s32.totalorder %s6287_s5, %s6287_s5 }
  0x5e   :  { %p6294_p5 = por %p6293_p4, %p6292_p3 }
  0x60   :  { %p6295_p6 = pnand %p6294_p5, %p6288_p2 }
  0x62   :  { %6298 = shalt.err (!%p6295_p6)
}
  0x63   :  { %204 = dma.hbm_to_vmem [thread:$0]  %s7723_s17, 1024, %s199_s25, [#allocation24], %s6582_s30, %s6582_s30, %s6583_s7  }
  0x64   :  { %s6592_s1 = smov [#allocation26]   ;;  %s6593_s4 = smov [#allocation29]  }
  0x65   :  { %s226_s8 = sshll.u32 %s6592_s1, 4  ;;  %s250_s13 = sshll.u32 %s6593_s4, 4  ;;  %s227_s8 = int_to_ptr.vmem [resolvable:$true] %s226_s8  ;;  %s251_s13 = int_to_ptr.vmem [resolvable:$true] %s250_s13 }
  0x66   :  { %s6307_s2 = scalar_lea.vmem %s227_s8, 1024  ;;  %p6312_p8 = scmp.lt.s32.totalorder %s227_s8, %s227_s8 }
  0x67   :  { %p6308_p7 = scmp.ne.s32.totalorder %s227_s8, %s6307_s2  ;;  %p6313_p9 = scmp.lt.s32.totalorder %s6307_s2, %s6307_s2 }
  0x69   :  { %p6314_p10 = por %p6313_p9, %p6312_p8 }
  0x6b   :  { %p6315_p11 = pnand %p6314_p10, %p6308_p7 }
  0x6d   :  { %6318 = shalt.err (!%p6315_p11)
}
  0x6e   :  { %232 = dma.hbm_to_vmem [thread:$0]  %s7727_s21, 1024, %s227_s8, [#allocation27], %s6582_s30, %s6582_s30, %s6583_s7  }
  0x6f   :  { %s6327_s17 = scalar_lea.vmem %s251_s13, 1024  ;;  %p6332_p13 = scmp.lt.s32.totalorder %s251_s13, %s251_s13 }
  0x70   :  { %p6328_p12 = scmp.ne.s32.totalorder %s251_s13, %s6327_s17  ;;  %p6333_p0 = scmp.lt.s32.totalorder %s6327_s17, %s6327_s17 }
  0x72   :  { %p6334_p1 = por %p6333_p0, %p6332_p13 }
  0x74   :  { %p6335_p2 = pnand %p6334_p1, %p6328_p12 }
  0x76   :  { %6338 = shalt.err (!%p6335_p2)
}
  0x77   :  { %256 = dma.hbm_to_vmem [thread:$0]  %s7729_s23, 1024, %s251_s13, [#allocation30], %s6582_s30, %s6582_s30, %s6583_s7  }
  0x78   :  { %s6594_s9 = smov [#allocation2]   ;;  %s6595_s6 = smov [#allocation7]  }
  0x79   :  { %s47_s29 = sshll.u32 %s6594_s9, 4  ;;  %s69_s21 = sshll.u32 %s6595_s6, 4  ;;  %s48_s29 = int_to_ptr.vmem [resolvable:$true] %s47_s29  ;;  %s70_s21 = int_to_ptr.vmem [resolvable:$true] %s69_s21 }
  0x7a   :  { %s6347_s5 = scalar_lea.vmem %s48_s29, 128  ;;  %p6352_p4 = scmp.lt.s32.totalorder %s48_s29, %s48_s29 }
  0x7b   :  { %p6348_p3 = scmp.ne.s32.totalorder %s48_s29, %s6347_s5  ;;  %p6353_p5 = scmp.lt.s32.totalorder %s6347_s5, %s6347_s5 }
  0x7d   :  { %p6354_p6 = por %p6353_p5, %p6352_p4 }
  0x7f   :  { %p6355_p7 = pnand %p6354_p6, %p6348_p3 }
  0x81   :  { %6358 = shalt.err (!%p6355_p7)
}
  0x82   :  { %s7748_s1 = sld [smem:[#allocation44_spill]]  ;;  %s6367_s8 = scalar_lea.vmem %s70_s21, 128 }
  0x83   :  { %p6368_p8 = scmp.ne.s32.totalorder %s70_s21, %s6367_s8  ;;  %p6372_p9 = scmp.lt.s32.totalorder %s70_s21, %s70_s21 }
  0x84   :  { %p6373_p10 = scmp.lt.s32.totalorder %s6367_s8, %s6367_s8 }
  0x86   :  { %p6374_p11 = por %p6373_p10, %p6372_p9 }
  0x88   :  { %50 = dma.hbm_to_vmem [thread:$0]  %s7748_s1, 128, %s48_s29, [#allocation3]  }
  0x89   :  { %p6375_p12 = pnand %p6374_p11, %p6368_p8 }
  0x8b   :  { %6378 = shalt.err (!%p6375_p12)
}
  0x8c   :  { %s7749_s13 = sld [smem:[#allocation46_spill]]  ;;  %s6596_s2 = smov [#allocation10]  }
  0x8d   :  { %s89_s3 = sshll.u32 %s6596_s2, 4  ;;  %s6597_s27 = smov [#allocation13]   ;;  %s90_s3 = int_to_ptr.vmem [resolvable:$true] %s89_s3 }
  0x8e   :  { %s111_s17 = sshll.u32 %s6597_s27, 4  ;;  %s6387_s0 = scalar_lea.vmem %s90_s3, 128  ;;  %s112_s17 = int_to_ptr.vmem [resolvable:$true] %s111_s17 }
  0x8f   :  { %p6388_p13 = scmp.ne.s32.totalorder %s90_s3, %s6387_s0  ;;  %p6392_p0 = scmp.lt.s32.totalorder %s90_s3, %s90_s3 }
  0x90   :  { %p6393_p1 = scmp.lt.s32.totalorder %s6387_s0, %s6387_s0 }
  0x92   :  { %72 = dma.hbm_to_vmem [thread:$0]  %s7749_s13, 128, %s70_s21, [#allocation6]  }
  0x93   :  { %p6394_p2 = por %p6393_p1, %p6392_p0 }
  0x95   :  { %p6395_p3 = pnand %p6394_p2, %p6388_p13 }
  0x97   :  { %6398 = shalt.err (!%p6395_p3)
}
  0x98   :  { %s7750_s29 = sld [smem:[#allocation48_spill]]  ;;  %s6407_s6 = scalar_lea.vmem %s112_s17, 32 }
  0x99   :  { %p6408_p4 = scmp.ne.s32.totalorder %s112_s17, %s6407_s6  ;;  %p6412_p5 = scmp.lt.s32.totalorder %s112_s17, %s112_s17 }
  0x9a   :  { %p6413_p6 = scmp.lt.s32.totalorder %s6407_s6, %s6407_s6 }
  0x9c   :  { %p6414_p7 = por %p6413_p6, %p6412_p5 }
  0x9e   :  { %92 = dma.hbm_to_vmem [thread:$0]  %s7750_s29, 128, %s90_s3, [#allocation9]  }
  0x9f   :  { %p6415_p8 = pnand %p6414_p7, %p6408_p4 }
  0xa1   :  { %6418 = shalt.err (!%p6415_p8)
}
  0xa2   :  { %s7751_s28 = sld [smem:[#allocation50_spill]]  ;;  %s6598_s26 = smov [#allocation16]  }
  0xa3   :  { %s133_s1 = sshll.u32 %s6598_s26, 4  ;;  %s6599_s8 = smov [#allocation19]   ;;  %s134_s1 = int_to_ptr.vmem [resolvable:$true] %s133_s1 }
  0xa4   :  { %s156_s23 = sshll.u32 %s6599_s8, 4  ;;  %s6427_s4 = scalar_lea.vmem %s134_s1, 16  ;;  %s157_s23 = int_to_ptr.vmem [resolvable:$true] %s156_s23 }
  0xa5   :  { %p6428_p9 = scmp.ne.s32.totalorder %s134_s1, %s6427_s4  ;;  %s6431_s13 = scalar_lea.vmem %s134_s1, 32 }
  0xa6   :  { %p6432_p10 = scmp.lt.s32.totalorder %s134_s1, %s134_s1  ;;  %p6433_p11 = scmp.lt.s32.totalorder %s6431_s13, %s6427_s4 }
  0xa8   :  { %114 = dma.hbm_to_vmem [thread:$0]  %s7751_s28, 32, %s112_s17, [#allocation12]  }
  0xa9   :  { %p6434_p12 = por %p6433_p11, %p6432_p10 }
  0xab   :  { %p6435_p13 = pnand %p6434_p12, %p6428_p9 }
  0xad   :  { %6438 = shalt.err (!%p6435_p13)
}
  0xae   :  { %s7752_s27 = sld [smem:[#allocation52_spill]]  ;;  %s6447_s0 = scalar_lea.vmem %s157_s23, 2048 }
  0xaf   :  { %p6448_p0 = scmp.ne.s32.totalorder %s157_s23, %s6447_s0  ;;  %p6452_p1 = scmp.lt.s32.totalorder %s157_s23, %s157_s23 }
  0xb0   :  { %p6453_p2 = scmp.lt.s32.totalorder %s6447_s0, %s6447_s0 }
  0xb2   :  { %p6454_p3 = por %p6453_p2, %p6452_p1 }
  0xb4   :  { %136 = dma.hbm_to_vmem [thread:$0]  %s7752_s27, 16, %s134_s1, [#allocation15]  }
  0xb5   :  { %p6455_p4 = pnand %p6454_p3, %p6448_p0 }
  0xb7   :  { %6458 = shalt.err (!%p6455_p4)
}
  0xb8   :  { %162 = dma.hbm_to_vmem [thread:$0]  %s7717_s11, 2048, %s157_s23, [#allocation18], %s6582_s30, %s6582_s30, %s6583_s7  }
  0xb9   :  { %s6600_s9 = smov [#allocation22]   ;;  %s6601_s6 = smov [#allocation25]  }
  0xba   :  { %s184_s29 = sshll.u32 %s6600_s9, 4  ;;  %s212_s21 = sshll.u32 %s6601_s6, 4  ;;  %s185_s29 = int_to_ptr.vmem [resolvable:$true] %s184_s29  ;;  %s213_s21 = int_to_ptr.vmem [resolvable:$true] %s212_s21 }
  0xbb   :  { %s6467_s5 = scalar_lea.vmem %s185_s29, 2048  ;;  %p6472_p6 = scmp.lt.s32.totalorder %s185_s29, %s185_s29 }
  0xbc   :  { %p6468_p5 = scmp.ne.s32.totalorder %s185_s29, %s6467_s5  ;;  %p6473_p7 = scmp.lt.s32.totalorder %s6467_s5, %s6467_s5 }
  0xbe   :  { %p6474_p8 = por %p6473_p7, %p6472_p6 }
  0xc0   :  { %p6475_p9 = pnand %p6474_p8, %p6468_p5 }
  0xc2   :  { %6478 = shalt.err (!%p6475_p9)
}
  0xc3   :  { %190 = dma.hbm_to_vmem [thread:$0]  %s7721_s15, 2048, %s185_s29, [#allocation21], %s6582_s30, %s6582_s30, %s6583_s7  }
  0xc4   :  { %s6487_s11 = scalar_lea.vmem %s213_s21, 1024  ;;  %p6492_p11 = scmp.lt.s32.totalorder %s213_s21, %s213_s21 }
  0xc5   :  { %p6488_p10 = scmp.ne.s32.totalorder %s213_s21, %s6487_s11  ;;  %p6493_p12 = scmp.lt.s32.totalorder %s6487_s11, %s6487_s11 }
  0xc7   :  { %p6494_p13 = por %p6493_p12, %p6492_p11 }
  0xc9   :  { %p6495_p0 = pnand %p6494_p13, %p6488_p10 }
  0xcb   :  { %6498 = shalt.err (!%p6495_p0)
}
  0xcc   :  { %218 = dma.hbm_to_vmem [thread:$0]  %s7725_s19, 1024, %s213_s21, [#allocation24], %s6582_s30, %s6582_s30, %s6583_s7  }
  0xcd   :  { %s6602_s23 = smov [#allocation28]   ;;  %s6603_s13 = smov [#allocation31]  }
  0xce   :  { %s238_s4 = sshll.u32 %s6602_s23, 4  ;;  %s262_s15 = sshll.u32 %s6603_s13, 4  ;;  %s239_s4 = int_to_ptr.vmem [resolvable:$true] %s238_s4  ;;  %s263_s15 = int_to_ptr.vmem [resolvable:$true] %s262_s15 }
  0xcf   :  { %s6507_s2 = scalar_lea.vmem %s239_s4, 2048  ;;  %p6512_p2 = scmp.lt.s32.totalorder %s239_s4, %s239_s4 }
  0xd0   :  { %p6508_p1 = scmp.ne.s32.totalorder %s239_s4, %s6507_s2  ;;  %p6513_p3 = scmp.lt.s32.totalorder %s6507_s2, %s6507_s2 }
  0xd2   :  { %p6514_p4 = por %p6513_p3, %p6512_p2 }
  0xd4   :  { %p6515_p5 = pnand %p6514_p4, %p6508_p1 }
  0xd6   :  { %6518 = shalt.err (!%p6515_p5)
}
  0xd7   :  { %244 = dma.hbm_to_vmem [thread:$0]  %s7728_s22, 2048, %s239_s4, [#allocation27], %s6582_s30, %s6582_s30, %s6583_s7  }
  0xd8   :  { %s6527_s19 = scalar_lea.vmem %s263_s15, 1024  ;;  %p6532_p7 = scmp.lt.s32.totalorder %s263_s15, %s263_s15 }
  0xd9   :  { %p6528_p6 = scmp.ne.s32.totalorder %s263_s15, %s6527_s19  ;;  %p6533_p8 = scmp.lt.s32.totalorder %s6527_s19, %s6527_s19 }
  0xdb   :  { %p6534_p9 = por %p6533_p8, %p6532_p7 }
  0xdd   :  { %p6535_p10 = pnand %p6534_p9, %p6528_p6 }
  0xdf   :  { %6538 = shalt.err (!%p6535_p10)
}
  0xe0   :  { %268 = dma.hbm_to_vmem [thread:$0]  %s7730_s24, 1024, %s263_s15, [#allocation30], %s6582_s30, %s6582_s30, %s6583_s7  }
  0xe1   :  { %6559 = dma.done.wait [#allocation3], 128  }
  0xe2   :  { %6560 = vsyncadd [#allocation3], 4294967168 }
  0xe3   :  { %6561 = dma.done.wait [#allocation6], 8320  }
  0xe4   :  { %6562 = vsyncadd [#allocation6], 4294958976 }
  0xe5   :  { %6563 = dma.done.wait [#allocation9], 256  }
  0xe6   :  { %6564 = vsyncadd [#allocation9], 4294967040 }
  0xe7   :  { %6565 = dma.done.wait [#allocation12], 2080  }
  0xe8   :  { %6566 = vsyncadd [#allocation12], 4294965216 }
  0xe9   :  { %6567 = dma.done.wait [#allocation15], 2064  }
  0xea   :  { %6568 = vsyncadd [#allocation15], 4294965232 }
  0xeb   :  { %6569 = dma.done.wait [#allocation18], 4096  }
  0xec   :  { %6570 = vsyncadd [#allocation18], 4294963200 }
  0xed   :  { %6571 = dma.done.wait [#allocation21], 4096  }
  0xee   :  { %6572 = vsyncadd [#allocation21], 4294963200 }
  0xef   :  { %6573 = dma.done.wait [#allocation24], 2048  }
  0xf0   :  { %6574 = vsyncadd [#allocation24], 4294965248 }
  0xf1   :  { %6575 = dma.done.wait [#allocation27], 3072  }
  0xf2   :  { %6576 = vsyncadd [#allocation27], 4294964224 }
  0xf3   :  { %6577 = dma.done.wait [#allocation30], 2048  }
  0xf4   :  { %6578 = vsyncadd [#allocation30], 4294965248  ;;  %v6604_v0 = vmov 0.0   ;;  %vm6605_vm0 = vmmov 0   ;;  %v5842_v1 = vld [vmem:[#allocation5 + $0x38] sm:$0xff]   ;;  %v5843_v2 = vld [vmem:[#allocation5 + $0x30] sm:$0xff]  }
  0xf5   :  { %5160 = vmatprep.subr.bf16.mxu0 %v6604_v0  ;;  %5176 = vmatprep.mubr.msk.bf16.mxu0 %vm6605_vm0, %v6604_v0  ;;  %v5844_v3 = vld [vmem:[#allocation5 + $0x28] sm:$0xff]   ;;  %v6843_v4 = vld [vmem:[#allocation26 + $0x38] sm:$0xff]   ;;  %v5845_v5 = vld [vmem:[#allocation5 + $0x20] sm:$0xff]   ;;  %v6606_v19 = vmov 0  }
  0xf6   :  { %5180 = vmatprep.subr.bf16.mxu1 %v6604_v0  ;;  %5196 = vmatprep.mubr.msk.bf16.mxu1 %vm6605_vm0, %v6604_v0  ;;  %v6847_v6 = vld [vmem:[#allocation26 + $0x30] sm:$0xff]   ;;  %v5846_v7 = vld [vmem:[#allocation5 + $0x18] sm:$0xff]   ;;  %v6852_v8 = vld [vmem:[#allocation26 + $0x28] sm:$0xff]  }
  0xf7   :  { %5161 = vmatpush3.bf16.msra.mxu0 %v5842_v1  ;;  %5181 = vmatpush3.bf16.msra.mxu1 %v6843_v4  ;;  %v5847_v9 = vld [vmem:[#allocation5 + $0x10] sm:$0xff]   ;;  %v6855_v10 = vld [vmem:[#allocation26 + $0x20] sm:$0xff]   ;;  %v5848_v11 = vld [vmem:[#allocation5 + $0x8] sm:$0xff]  }
  0xf8   :  { %5162 = vmatprep.subr.bf16.mxu0 %v6604_v0  ;;  %5182 = vmatprep.subr.bf16.mxu1 %v6604_v0  ;;  %v6860_v12 = vld [vmem:[#allocation26 + $0x18] sm:$0xff]   ;;  %v5849_v13 = vld [vmem:[#allocation5] sm:$0xff]   ;;  %v6865_v15 = vld [vmem:[#allocation26 + $0x10] sm:$0xff]  }
  0xf9   :  { %v327_v14 = vld [vmem:[#allocation2] sm:$0xff]  ;;  %v6870_v17 = vld [vmem:[#allocation26 + $0x8] sm:$0xff]   ;;  %5828 = vset.pattern.permute.xlu0 %v6606_v19  ;;  %5829 = vset.pattern.permute.xlu1 %v6606_v19  ;;  %v4463_v20 = vld [vmem:[#allocation7] ss:$0 sm:$0xff] }
  0xfa   :  { %v360_v16 = vpack.c.bf16 %v327_v14, %v327_v14  ;;  %v6893_v18 = vld [vmem:[#allocation26] sm:$0xff]   ;;  %v5859_v42 = vld [vmem:[#allocation5 + $0x70] sm:$0xff]   ;;  %v5860_v43 = vld [vmem:[#allocation5 + $0x68] sm:$0xff]  }
  0xfb   :  { %5163 = vmatpush3.bf16.msra.mxu0 %v5843_v2  ;;  %5183 = vmatpush3.bf16.msra.mxu1 %v6847_v6  ;;  %v5858_v41 = vld [vmem:[#allocation5 + $0x78] sm:$0xff]   ;;  %v5861_v44 = vld [vmem:[#allocation5 + $0x60] sm:$0xff]   ;;  %v5863_v46 = vld [vmem:[#allocation5 + $0x50] sm:$0xff]  }
  0xfc   :  { %5164 = vmatprep.subr.bf16.mxu0 %v6604_v0  ;;  %5184 = vmatprep.subr.bf16.mxu1 %v6604_v0  ;;  %v5862_v45 = vld [vmem:[#allocation5 + $0x58] sm:$0xff]   ;;  %v5864_v47 = vld [vmem:[#allocation5 + $0x48] sm:$0xff]   ;;  %v5865_v48 = vld [vmem:[#allocation5 + $0x40] sm:$0xff]  }
  0xfd   :  { %v4480_v51 = vld [vmem:[#allocation8] ss:$0 sm:$0xff]  ;;  %v4481_v54 = vld [vmem:[#allocation10] ss:$0 sm:$0xff] }
  0xff   :  { %5165 = vmatpush3.bf16.msra.mxu0 %v5844_v3  ;;  %5185 = vmatpush3.bf16.msra.mxu1 %v6852_v8 }
 0x100   :  { %5166 = vmatprep.subr.bf16.mxu0 %v6604_v0  ;;  %5186 = vmatprep.subr.bf16.mxu1 %v6604_v0 }
 0x103   :  { %5167 = vmatpush3.bf16.msra.mxu0 %v5845_v5  ;;  %5187 = vmatpush3.bf16.msra.mxu1 %v6855_v10  ;;  %v6946_v5 = vld [vmem:[#allocation26 + $0x30] sm:$0xff]  }
 0x104   :  { %5168 = vmatprep.subr.bf16.mxu0 %v6604_v0  ;;  %5188 = vmatprep.subr.bf16.mxu1 %v6604_v0 }
 0x107   :  { %5169 = vmatpush3.bf16.msra.mxu0 %v5846_v7  ;;  %5189 = vmatpush3.bf16.msra.mxu1 %v6860_v12 }
 0x108   :  { %5170 = vmatprep.subr.bf16.mxu0 %v6604_v0  ;;  %5190 = vmatprep.subr.bf16.mxu1 %v6604_v0 }
 0x10b   :  { %5171 = vmatpush3.bf16.msra.mxu0 %v5847_v9  ;;  %5191 = vmatpush3.bf16.msra.mxu1 %v6865_v15 }
 0x10c   :  { %5172 = vmatprep.subr.bf16.mxu0 %v6604_v0  ;;  %5192 = vmatprep.subr.bf16.mxu1 %v6604_v0 }
 0x10f   :  { %5173 = vmatpush3.bf16.msra.mxu0 %v5848_v11  ;;  %5193 = vmatpush3.bf16.msra.mxu1 %v6870_v17 }
 0x110   :  { %5174 = vmatprep.subr.bf16.mxu0 %v6604_v0  ;;  %5194 = vmatprep.subr.bf16.mxu1 %v6604_v0 }
 0x113   :  { %5175 = vmatpush3.bf16.msra.mxu0 %v5849_v13  ;;  %5195 = vmatpush3.bf16.msra.mxu1 %v6893_v18 }
 0x114   :  { %5200 = vmatprep.subr.bf16.mxu0 %v6604_v0  ;;  %5220 = vmatprep.subr.bf16.mxu1 %v6604_v0 }
 0x116   :  { %5177 = vmatmul.mubr.bf16.vlgmr.msra.gmra.mxu0 %v360_v16 }
 0x117   :  { %5201 = vmatpush3.bf16.msra.mxu0 %v6843_v4  ;;  %5216 = vmatprep.mubr.msk.bf16.mxu0 %vm6605_vm0, %v6604_v0 }
 0x118   :  { %5202 = vmatprep.subr.bf16.mxu0 %v6604_v0 }
 0x11b   :  { %5203 = vmatpush3.bf16.msra.mxu0 %v6847_v6 }
 0x11c   :  { %5204 = vmatprep.subr.bf16.mxu0 %v6604_v0 }
 0x11f   :  { %5205 = vmatpush3.bf16.msra.mxu0 %v6852_v8 }
 0x120   :  { %5206 = vmatprep.subr.bf16.mxu0 %v6604_v0 }
 0x123   :  { %5207 = vmatpush3.bf16.msra.mxu0 %v6855_v10 }
 0x124   :  { %5208 = vmatprep.subr.bf16.mxu0 %v6604_v0 }
 0x127   :  { %5209 = vmatpush3.bf16.msra.mxu0 %v6860_v12 }
 0x128   :  { %5210 = vmatprep.subr.bf16.mxu0 %v6604_v0 }
 0x12b   :  { %5211 = vmatpush3.bf16.msra.mxu0 %v6865_v15 }
 0x12c   :  { %5212 = vmatprep.subr.bf16.mxu0 %v6604_v0 }
 0x12f   :  { %5213 = vmatpush3.bf16.msra.mxu0 %v6870_v17 }
 0x130   :  { %5214 = vmatprep.subr.bf16.mxu0 %v6604_v0 }
 0x133   :  { %5215 = vmatpush3.bf16.msra.mxu0 %v6893_v18 }
 0x134   :  { %5240 = vmatprep.subr.bf16.mxu0 %v6604_v0 }
 0x1d6   :  { %v448_v21 = vpop.f32.mrf.mxu0 }
 0x1d7   :  { %v6901_v22 = vadd.f32 %v4463_v20, %v448_v21  ;;  %v6976_v20 = vld [vmem:[#allocation26 + $0x28] sm:$0xff]   ;;  %v6980_v21 = vld [vmem:[#allocation26 + $0x20] sm:$0xff]  }
 0x1d8   :  { %v5178_v23 = vpop.f32.mrf.mxu0 }
 0x1d9   :  { %v545_v24 = vmul.f32 %v6901_v22, %v6901_v22  ;;  %v456_v25 = vpack.c.bf16 %v6901_v22, %v6901_v22 }
 0x1da   :  { %v451_v26 = vpop.f32.mrf.mxu0 }
 0x1db   :  { %v546_v27 = vpack.c.bf16 %v545_v24, %v545_v24  ;;  %5197 = vmatmul.mubr.bf16.vlgmr.msra.gmra.mxu1 %v456_v25 }
 0x1dc   :  { %v5179_v28 = vpop.f32.mrf.mxu0  ;;  %5236 = vmatprep.mubr.msk.bf16.mxu1 %vm6605_vm0, %v6604_v0  ;;  %5221 = vmatpush3.bf16.msra.mxu1 %v5858_v41  ;;  %v4491_v41 = vld [vmem:[#allocation8 + $0x1] ss:$0 sm:$0xff] }
 0x1dd   :  { %5217 = vmatmul.mubr.bf16.vlgmr.msra.gmra.mxu0 %v546_v27  ;;  %5222 = vmatprep.subr.bf16.mxu1 %v6604_v0 }
 0x1de   :  { %5241 = vmatpush3.bf16.msra.mxu0 %v6843_v4  ;;  %5256 = vmatprep.mubr.msk.bf16.mxu0 %vm6605_vm0, %v6604_v0  ;;  %v6940_v4 = vld [vmem:[#allocation26 + $0x38] sm:$0xff]  }
 0x1df   :  { %5242 = vmatprep.subr.bf16.mxu0 %v6604_v0 }
 0x1e0   :  { %5223 = vmatpush3.bf16.msra.mxu1 %v5859_v42 }
 0x1e1   :  { %5224 = vmatprep.subr.bf16.mxu1 %v6604_v0 }
 0x1e2   :  { %5243 = vmatpush3.bf16.msra.mxu0 %v6847_v6  ;;  %v4482_v6 = vld [vmem:[#allocation7 + $0x1] ss:$0 sm:$0xff] }
 0x1e3   :  { %5244 = vmatprep.subr.bf16.mxu0 %v6604_v0 }
 0x1e4   :  { %5225 = vmatpush3.bf16.msra.mxu1 %v5860_v43 }
 0x1e5   :  { %5226 = vmatprep.subr.bf16.mxu1 %v6604_v0 }
 0x1e6   :  { %5245 = vmatpush3.bf16.msra.mxu0 %v6852_v8 }
 0x1e7   :  { %5246 = vmatprep.subr.bf16.mxu0 %v6604_v0 }
 0x1e8   :  { %5227 = vmatpush3.bf16.msra.mxu1 %v5861_v44  ;;  %v4492_v44 = vld [vmem:[#allocation10 + $0x1] ss:$0 sm:$0xff] }
 0x1e9   :  { %5228 = vmatprep.subr.bf16.mxu1 %v6604_v0 }
 0x1ea   :  { %5247 = vmatpush3.bf16.msra.mxu0 %v6855_v10 }
 0x1eb   :  { %5248 = vmatprep.subr.bf16.mxu0 %v6604_v0 }
 0x1ec   :  { %5229 = vmatpush3.bf16.msra.mxu1 %v5862_v45 }
 0x1ed   :  { %5230 = vmatprep.subr.bf16.mxu1 %v6604_v0 }
 0x1ee   :  { %5249 = vmatpush3.bf16.msra.mxu0 %v6860_v12 }
 0x1ef   :  { %5250 = vmatprep.subr.bf16.mxu0 %v6604_v0 }
 0x1f0   :  { %5231 = vmatpush3.bf16.msra.mxu1 %v5863_v46 }
 0x1f1   :  { %5232 = vmatprep.subr.bf16.mxu1 %v6604_v0 }
 0x1f2   :  { %5251 = vmatpush3.bf16.msra.mxu0 %v6865_v15 }
 0x1f3   :  { %5252 = vmatprep.subr.bf16.mxu0 %v6604_v0 }
 0x1f4   :  { %5233 = vmatpush3.bf16.msra.mxu1 %v5864_v47 }
 0x1f5   :  { %5234 = vmatprep.subr.bf16.mxu1 %v6604_v0 }
 0x1f6   :  { %5253 = vmatpush3.bf16.msra.mxu0 %v6870_v17 }
 0x1f7   :  { %5254 = vmatprep.subr.bf16.mxu0 %v6604_v0 }
 0x1f8   :  { %5235 = vmatpush3.bf16.msra.mxu1 %v5865_v48 }
 0x1f9   :  { %5260 = vmatprep.subr.bf16.mxu1 %v6604_v0 }
 0x1fa   :  { %5255 = vmatpush3.bf16.msra.mxu0 %v6893_v18 }
 0x1fb   :  { %5280 = vmatprep.subr.bf16.mxu0 %v6604_v0 }
 0x29b   :  { %v539_v29 = vpop.f32.mrf.mxu1 }
 0x29c   :  { %v587_v30 = vmul.f32 %v539_v29, %v539_v29  ;;  %591 = vperm.xlu0 %5828, %v539_v29  }
 0x29d   :  { %v5198_v31 = vpop.f32.mrf.mxu1  ;;  %v581_v32 = vpop.f32.mrf.mxu0 }
 0x29e   :  { %v588_v33 = vsub.f32 %v581_v32, %v587_v30  ;;  %v5866_v31 = vld [vmem:[#allocation5 + $0xb8] sm:$0xff]   ;;  %v5867_v32 = vld [vmem:[#allocation5 + $0xb0] sm:$0xff]  }
 0x29f   :  { %v542_v34 = vpop.f32.mrf.mxu1  ;;  %v5218_v35 = vpop.f32.mrf.mxu0 }
 0x2a0   :  { %v595_v36 = vadd.f32 1e-05, %v588_v33  ;;  %v5868_v33 = vld [vmem:[#allocation5 + $0xa8] sm:$0xff]   ;;  %v5869_v34 = vld [vmem:[#allocation5 + $0xa0] sm:$0xff]   ;;  %v5870_v35 = vld [vmem:[#allocation5 + $0x98] sm:$0xff]  }
 0x2a1   :  { %v5199_v37 = vpop.f32.mrf.mxu1  ;;  %v584_v38 = vpop.f32.mrf.mxu0 }
 0x2a2   :  { %6082 = vrsqrt.f32 %v595_v36  ;;  %v5871_v36 = vld [vmem:[#allocation5 + $0x90] sm:$0xff]   ;;  %v5872_v37 = vld [vmem:[#allocation5 + $0x88] sm:$0xff]   ;;  %v5873_v38 = vld [vmem:[#allocation5 + $0x80] sm:$0xff]  }
 0x2a3   :  { %v5219_v39 = vpop.f32.mrf.mxu0 }
 0x2af   :  { %v6083_v40 = vpop.eup %6082 }
 0x2b0   :  { %599 = vperm.xlu0 %5828, %v6083_v40  }
 0x317   :  { %v592_v49 = vpop.permute.xlu0 %591 }
 0x318   :  { %v594_v50 = vsub.f32 %v6901_v22, %v592_v49 }
 0x32b   :  { %v600_v52 = vpop.permute.xlu0 %599 }
 0x32c   :  { %v602_v53 = vmul.f32 %v600_v52, %v594_v50 }
 0x32e   :  { %v607_v55 = vmul.f32 %v4480_v51, %v602_v53 }
 0x330   :  { %v612_v56 = vadd.f32 %v4481_v54, %v607_v55 }
 0x332   :  { %v614_v57 = vmul.f32 %v612_v56, %v612_v56  ;;  %v613_v63 = vmul.f32 0.5, %v612_v56 }
 0x334   :  { %v615_v58 = vmul.f32 %v614_v57, %v612_v56 }
 0x336   :  { %v616_v59 = vmul.f32 0.044715, %v615_v58  ;;  %v7016_v58 = vld [vmem:[#allocation26 + $0x18] sm:$0xff]  }
 0x338   :  { %v617_v60 = vadd.f32 %v616_v59, %v612_v56  ;;  %v7020_v59 = vld [vmem:[#allocation26 + $0x10] sm:$0xff]  }
 0x33a   :  { %v618_v61 = vmul.f32 0.7978846, %v617_v60  ;;  %v7024_v60 = vld [vmem:[#allocation26 + $0x8] sm:$0xff]  }
 0x33c   :  { %6084 = vtanh.f32 %v618_v61  ;;  %v4493_v61 = vld [vmem:[#allocation7 + $0x2] ss:$0 sm:$0xff] }
 0x349   :  { %v6085_v62 = vpop.eup %6084 }
 0x34a   :  { %v620_v1 = vadd.f32 1.0, %v6085_v62 }
 0x34c   :  { %v6936_v2 = vmul.f32 %v620_v1, %v613_v63 }
 0x34e   :  { %v639_v3 = vpack.c.bf16 %v6936_v2, %v6936_v2 }
 0x350   :  { %5237 = vmatmul.mubr.bf16.vlgmr.msra.gmra.mxu1 %v639_v3 }
 0x351   :  { %5261 = vmatpush3.bf16.msra.mxu1 %v6940_v4  ;;  %5276 = vmatprep.mubr.msk.bf16.mxu1 %vm6605_vm0, %v6604_v0 }
 0x352   :  { %5262 = vmatprep.subr.bf16.mxu1 %v6604_v0 }
 0x355   :  { %5263 = vmatpush3.bf16.msra.mxu1 %v6946_v5 }
 0x356   :  { %5264 = vmatprep.subr.bf16.mxu1 %v6604_v0 }
 0x359   :  { %5265 = vmatpush3.bf16.msra.mxu1 %v6852_v8 }
 0x35a   :  { %5266 = vmatprep.subr.bf16.mxu1 %v6604_v0 }
 0x35d   :  { %5267 = vmatpush3.bf16.msra.mxu1 %v6855_v10 }
 0x35e   :  { %5268 = vmatprep.subr.bf16.mxu1 %v6604_v0 }
 0x361   :  { %5269 = vmatpush3.bf16.msra.mxu1 %v6860_v12 }
 0x362   :  { %5270 = vmatprep.subr.bf16.mxu1 %v6604_v0 }
 0x365   :  { %5271 = vmatpush3.bf16.msra.mxu1 %v6865_v15 }
 0x366   :  { %5272 = vmatprep.subr.bf16.mxu1 %v6604_v0 }
 0x369   :  { %5273 = vmatpush3.bf16.msra.mxu1 %v6870_v17 }
 0x36a   :  { %5274 = vmatprep.subr.bf16.mxu1 %v6604_v0 }
 0x36d   :  { %5275 = vmatpush3.bf16.msra.mxu1 %v6893_v18 }
 0x36e   :  { %5300 = vmatprep.subr.bf16.mxu1 %v6604_v0 }
 0x410   :  { %v727_v7 = vpop.f32.mrf.mxu1 }
 0x411   :  { %v6962_v8 = vadd.f32 %v4482_v6, %v727_v7 }
 0x412   :  { %v5238_v9 = vpop.f32.mrf.mxu1 }
 0x413   :  { %v735_v10 = vpack.c.bf16 %v6962_v8, %v6962_v8  ;;  %v776_v11 = vmul.f32 %v6962_v8, %v6962_v8 }
 0x414   :  { %v730_v13 = vpop.f32.mrf.mxu1 }
 0x415   :  { %v777_v14 = vpack.c.bf16 %v776_v11, %v776_v11  ;;  %5257 = vmatmul.mubr.bf16.vlgmr.msra.gmra.mxu0 %v735_v10 }
 0x416   :  { %v5239_v16 = vpop.f32.mrf.mxu1  ;;  %5296 = vmatprep.mubr.msk.bf16.mxu0 %vm6605_vm0, %v6604_v0  ;;  %5281 = vmatpush3.bf16.msra.mxu0 %v5866_v31  ;;  %v5880_v31 = vld [vmem:[#allocation5 + $0xc8] sm:$0xff]  }
 0x417   :  { %5277 = vmatmul.mubr.bf16.vlgmr.msra.gmra.mxu1 %v777_v14  ;;  %5282 = vmatprep.subr.bf16.mxu0 %v6604_v0 }
 0x418   :  { %5301 = vmatpush3.bf16.msra.mxu1 %v6940_v4  ;;  %5316 = vmatprep.mubr.msk.bf16.mxu1 %vm6605_vm0, %v6604_v0 }
 0x419   :  { %5302 = vmatprep.subr.bf16.mxu1 %v6604_v0 }
 0x41a   :  { %5283 = vmatpush3.bf16.msra.mxu0 %v5867_v32  ;;  %v5881_v32 = vld [vmem:[#allocation5 + $0xc0] sm:$0xff]  }
 0x41b   :  { %5284 = vmatprep.subr.bf16.mxu0 %v6604_v0 }
 0x41c   :  { %5303 = vmatpush3.bf16.msra.mxu1 %v6946_v5 }
 0x41d   :  { %5304 = vmatprep.subr.bf16.mxu1 %v6604_v0 }
 0x41e   :  { %5285 = vmatpush3.bf16.msra.mxu0 %v5868_v33 }
 0x41f   :  { %5286 = vmatprep.subr.bf16.mxu0 %v6604_v0 }
 0x420   :  { %5305 = vmatpush3.bf16.msra.mxu1 %v6976_v20 }
 0x421   :  { %5306 = vmatprep.subr.bf16.mxu1 %v6604_v0 }
 0x422   :  { %5287 = vmatpush3.bf16.msra.mxu0 %v5869_v34 }
 0x423   :  { %5288 = vmatprep.subr.bf16.mxu0 %v6604_v0 }
 0x424   :  { %5307 = vmatpush3.bf16.msra.mxu1 %v6980_v21 }
 0x425   :  { %5308 = vmatprep.subr.bf16.mxu1 %v6604_v0 }
 0x426   :  { %5289 = vmatpush3.bf16.msra.mxu0 %v5870_v35  ;;  %v4502_v35 = vld [vmem:[#allocation8 + $0x2] ss:$0 sm:$0xff] }
 0x427   :  { %5290 = vmatprep.subr.bf16.mxu0 %v6604_v0 }
 0x428   :  { %5309 = vmatpush3.bf16.msra.mxu1 %v6860_v12 }
 0x429   :  { %5310 = vmatprep.subr.bf16.mxu1 %v6604_v0 }
 0x42a   :  { %5291 = vmatpush3.bf16.msra.mxu0 %v5871_v36 }
 0x42b   :  { %5292 = vmatprep.subr.bf16.mxu0 %v6604_v0 }
 0x42c   :  { %5311 = vmatpush3.bf16.msra.mxu1 %v6865_v15 }
 0x42d   :  { %5312 = vmatprep.subr.bf16.mxu1 %v6604_v0 }
 0x42e   :  { %5293 = vmatpush3.bf16.msra.mxu0 %v5872_v37 }
 0x42f   :  { %5294 = vmatprep.subr.bf16.mxu0 %v6604_v0 }
 0x430   :  { %5313 = vmatpush3.bf16.msra.mxu1 %v6870_v17 }
 0x431   :  { %5314 = vmatprep.subr.bf16.mxu1 %v6604_v0 }
 0x432   :  { %5295 = vmatpush3.bf16.msra.mxu0 %v5873_v38  ;;  %v4503_v38 = vld [vmem:[#allocation10 + $0x2] ss:$0 sm:$0xff] }
 0x433   :  { %5320 = vmatprep.subr.bf16.mxu0 %v6604_v0 }
 0x434   :  { %5315 = vmatpush3.bf16.msra.mxu1 %v6893_v18 }
 0x435   :  { %5340 = vmatprep.subr.bf16.mxu1 %v6604_v0 }
 0x4d5   :  { %v770_v22 = vpop.f32.mrf.mxu0 }
 0x4d6   :  { %v818_v23 = vmul.f32 %v770_v22, %v770_v22  ;;  %822 = vperm.xlu1 %5829, %v770_v22  }
 0x4d7   :  { %v5258_v24 = vpop.f32.mrf.mxu0  ;;  %v812_v25 = vpop.f32.mrf.mxu1 }
 0x4d8   :  { %v819_v12 = vsub.f32 %v812_v25, %v818_v23 }
 0x4d9   :  { %v773_v26 = vpop.f32.mrf.mxu0  ;;  %v5278_v27 = vpop.f32.mrf.mxu1 }
 0x4da   :  { %v826_v28 = vadd.f32 1e-05, %v819_v12  ;;  %v5874_v27 = vld [vmem:[#allocation5 + $0xf8] sm:$0xff]  }
 0x4db   :  { %v5259_v15 = vpop.f32.mrf.mxu0  ;;  %v815_v29 = vpop.f32.mrf.mxu1 }
 0x4dc   :  { %6086 = vrsqrt.f32 %v826_v28  ;;  %v5875_v28 = vld [vmem:[#allocation5 + $0xf0] sm:$0xff]   ;;  %v5876_v15 = vld [vmem:[#allocation5 + $0xe8] sm:$0xff]   ;;  %v5877_v29 = vld [vmem:[#allocation5 + $0xe0] sm:$0xff]  }
 0x4dd   :  { %v5279_v30 = vpop.f32.mrf.mxu1 }
 0x4de   :  { %v5878_v30 = vld [vmem:[#allocation5 + $0xd8] sm:$0xff]  }
 0x4e9   :  { %v6087_v17 = vpop.eup %6086 }
 0x4ea   :  { %830 = vperm.xlu1 %5829, %v6087_v17   ;;  %v5879_v17 = vld [vmem:[#allocation5 + $0xd0] sm:$0xff]  }
 0x551   :  { %v823_v39 = vpop.permute.xlu1 %822 }
 0x552   :  { %v825_v40 = vsub.f32 %v6962_v8, %v823_v39 }
 0x565   :  { %v831_v42 = vpop.permute.xlu1 %830 }
 0x566   :  { %v833_v43 = vmul.f32 %v831_v42, %v825_v40 }
 0x568   :  { %v838_v45 = vmul.f32 %v4491_v41, %v833_v43 }
 0x56a   :  { %v843_v46 = vadd.f32 %v4492_v44, %v838_v45 }
 0x56c   :  { %v845_v47 = vmul.f32 %v843_v46, %v843_v46  ;;  %v844_v53 = vmul.f32 0.5, %v843_v46 }
 0x56e   :  { %v846_v48 = vmul.f32 %v845_v47, %v843_v46 }
 0x570   :  { %v847_v49 = vmul.f32 0.044715, %v846_v48 }
 0x572   :  { %v848_v50 = vadd.f32 %v847_v49, %v843_v46 }
 0x574   :  { %v849_v51 = vmul.f32 0.7978846, %v848_v50 }
 0x576   :  { %6088 = vtanh.f32 %v849_v51 }
 0x583   :  { %v6089_v52 = vpop.eup %6088 }
 0x584   :  { %v851_v54 = vadd.f32 1.0, %v6089_v52  ;;  %v4504_v52 = vld [vmem:[#allocation7 + $0x3] ss:$0 sm:$0xff] }
 0x586   :  { %v852_v55 = vmul.f32 %v851_v54, %v844_v53 }
 0x588   :  { %v7002_v56 = vadd.f32 %v852_v55, %v6936_v2 }
 0x58a   :  { %v871_v57 = vpack.c.bf16 %v7002_v56, %v7002_v56 }
 0x58c   :  { %5297 = vmatmul.mubr.bf16.vlgmr.msra.gmra.mxu0 %v871_v57 }
 0x58d   :  { %5321 = vmatpush3.bf16.msra.mxu0 %v6940_v4  ;;  %5336 = vmatprep.mubr.msk.bf16.mxu0 %vm6605_vm0, %v6604_v0 }
 0x58e   :  { %5322 = vmatprep.subr.bf16.mxu0 %v6604_v0 }
 0x591   :  { %5323 = vmatpush3.bf16.msra.mxu0 %v6946_v5 }
 0x592   :  { %5324 = vmatprep.subr.bf16.mxu0 %v6604_v0 }
 0x595   :  { %5325 = vmatpush3.bf16.msra.mxu0 %v6976_v20 }
 0x596   :  { %5326 = vmatprep.subr.bf16.mxu0 %v6604_v0 }
 0x599   :  { %5327 = vmatpush3.bf16.msra.mxu0 %v6980_v21 }
 0x59a   :  { %5328 = vmatprep.subr.bf16.mxu0 %v6604_v0 }
 0x59d   :  { %5329 = vmatpush3.bf16.msra.mxu0 %v7016_v58 }
 0x59e   :  { %5330 = vmatprep.subr.bf16.mxu0 %v6604_v0 }
 0x5a1   :  { %5331 = vmatpush3.bf16.msra.mxu0 %v7020_v59 }
 0x5a2   :  { %5332 = vmatprep.subr.bf16.mxu0 %v6604_v0 }
 0x5a5   :  { %5333 = vmatpush3.bf16.msra.mxu0 %v7024_v60 }
 0x5a6   :  { %5334 = vmatprep.subr.bf16.mxu0 %v6604_v0 }
 0x5a9   :  { %5335 = vmatpush3.bf16.msra.mxu0 %v6893_v18 }
 0x5aa   :  { %5360 = vmatprep.subr.bf16.mxu0 %v6604_v0 }
 0x64c   :  { %v959_v62 = vpop.f32.mrf.mxu0 }
 0x64d   :  { %v7030_v63 = vadd.f32 %v4493_v61, %v959_v62 }
 0x64e   :  { %v5298_v1 = vpop.f32.mrf.mxu0 }
 0x64f   :  { %v967_v2 = vpack.c.bf16 %v7030_v63, %v7030_v63  ;;  %v1008_v3 = vmul.f32 %v7030_v63, %v7030_v63 }
 0x650   :  { %v962_v6 = vpop.f32.mrf.mxu0 }
 0x651   :  { %v1009_v7 = vpack.c.bf16 %v1008_v3, %v1008_v3  ;;  %5317 = vmatmul.mubr.bf16.vlgmr.msra.gmra.mxu1 %v967_v2 }
 0x652   :  { %v5299_v8 = vpop.f32.mrf.mxu0  ;;  %5356 = vmatprep.mubr.msk.bf16.mxu1 %vm6605_vm0, %v6604_v0  ;;  %5341 = vmatpush3.bf16.msra.mxu1 %v5874_v27  ;;  %v5889_v27 = vld [vmem:[#allocation5 + $0x100] sm:$0xff]  }
 0x653   :  { %5337 = vmatmul.mubr.bf16.vlgmr.msra.gmra.mxu0 %v1009_v7  ;;  %5342 = vmatprep.subr.bf16.mxu1 %v6604_v0 }
 0x654   :  { %5361 = vmatpush3.bf16.msra.mxu0 %v6940_v4  ;;  %5376 = vmatprep.mubr.msk.bf16.mxu0 %vm6605_vm0, %v6604_v0 }
 0x655   :  { %5362 = vmatprep.subr.bf16.mxu0 %v6604_v0 }
 0x656   :  { %5343 = vmatpush3.bf16.msra.mxu1 %v5875_v28 }
 0x657   :  { %5344 = vmatprep.subr.bf16.mxu1 %v6604_v0 }
 0x658   :  { %5363 = vmatpush3.bf16.msra.mxu0 %v6946_v5 }
 0x659   :  { %5364 = vmatprep.subr.bf16.mxu0 %v6604_v0 }
 0x65a   :  { %5345 = vmatpush3.bf16.msra.mxu1 %v5876_v15 }
 0x65b   :  { %5346 = vmatprep.subr.bf16.mxu1 %v6604_v0 }
 0x65c   :  { %5365 = vmatpush3.bf16.msra.mxu0 %v6976_v20 }
 0x65d   :  { %5366 = vmatprep.subr.bf16.mxu0 %v6604_v0 }
 0x65e   :  { %5347 = vmatpush3.bf16.msra.mxu1 %v5877_v29  ;;  %v4513_v29 = vld [vmem:[#allocation8 + $0x3] ss:$0 sm:$0xff] }
 0x65f   :  { %5348 = vmatprep.subr.bf16.mxu1 %v6604_v0 }
 0x660   :  { %5367 = vmatpush3.bf16.msra.mxu0 %v6980_v21 }
 0x661   :  { %5368 = vmatprep.subr.bf16.mxu0 %v6604_v0 }
 0x662   :  { %5349 = vmatpush3.bf16.msra.mxu1 %v5878_v30 }
 0x663   :  { %5350 = vmatprep.subr.bf16.mxu1 %v6604_v0 }
 0x664   :  { %5369 = vmatpush3.bf16.msra.mxu0 %v7016_v58 }
 0x665   :  { %5370 = vmatprep.subr.bf16.mxu0 %v6604_v0 }
 0x666   :  { %5351 = vmatpush3.bf16.msra.mxu1 %v5879_v17 }
 0x667   :  { %5352 = vmatprep.subr.bf16.mxu1 %v6604_v0 }
 0x668   :  { %5371 = vmatpush3.bf16.msra.mxu0 %v7020_v59 }
 0x669   :  { %5372 = vmatprep.subr.bf16.mxu0 %v6604_v0 }
 0x66a   :  { %5353 = vmatpush3.bf16.msra.mxu1 %v5880_v31  ;;  %v4514_v31 = vld [vmem:[#allocation10 + $0x3] ss:$0 sm:$0xff] }
 0x66b   :  { %5354 = vmatprep.subr.bf16.mxu1 %v6604_v0 }
 0x66c   :  { %5373 = vmatpush3.bf16.msra.mxu0 %v7024_v60 }
 0x66d   :  { %5374 = vmatprep.subr.bf16.mxu0 %v6604_v0 }
 0x66e   :  { %5355 = vmatpush3.bf16.msra.mxu1 %v5881_v32 }
 0x66f   :  { %5380 = vmatprep.subr.bf16.mxu1 %v6604_v0 }
 0x670   :  { %5375 = vmatpush3.bf16.msra.mxu0 %v6893_v18 }
 0x671   :  { %5400 = vmatprep.subr.bf16.mxu0 %v6604_v0 }
 0x711   :  { %v1002_v9 = vpop.f32.mrf.mxu1 }
 0x712   :  { %v1050_v10 = vmul.f32 %v1002_v9, %v1002_v9  ;;  %1054 = vperm.xlu0 %5828, %v1002_v9  }
 0x713   :  { %v5318_v11 = vpop.f32.mrf.mxu1  ;;  %v1044_v13 = vpop.f32.mrf.mxu0 }
 0x714   :  { %v1051_v14 = vsub.f32 %v1044_v13, %v1050_v10 }
 0x715   :  { %v1005_v16 = vpop.f32.mrf.mxu1  ;;  %v5338_v22 = vpop.f32.mrf.mxu0 }
 0x716   :  { %v1058_v23 = vadd.f32 1e-05, %v1051_v14  ;;  %v5882_v22 = vld [vmem:[#allocation5 + $0x138] sm:$0xff]  }
 0x717   :  { %v5319_v24 = vpop.f32.mrf.mxu1  ;;  %v1047_v25 = vpop.f32.mrf.mxu0 }
 0x718   :  { %6090 = vrsqrt.f32 %v1058_v23  ;;  %v5884_v23 = vld [vmem:[#allocation5 + $0x128] sm:$0xff]   ;;  %v5885_v24 = vld [vmem:[#allocation5 + $0x120] sm:$0xff]   ;;  %v5886_v25 = vld [vmem:[#allocation5 + $0x118] sm:$0xff]  }
 0x719   :  { %v5339_v12 = vpop.f32.mrf.mxu0 }
 0x71a   :  { %v5887_v12 = vld [vmem:[#allocation5 + $0x110] sm:$0xff]  }
 0x725   :  { %v6091_v26 = vpop.eup %6090 }
 0x726   :  { %1062 = vperm.xlu1 %5829, %v6091_v26   ;;  %v5888_v26 = vld [vmem:[#allocation5 + $0x108] sm:$0xff]  }
 0x78d   :  { %v1055_v33 = vpop.permute.xlu0 %1054 }
 0x78e   :  { %v1057_v34 = vsub.f32 %v7030_v63, %v1055_v33 }
 0x7a1   :  { %v1063_v36 = vpop.permute.xlu1 %1062 }
 0x7a2   :  { %v1065_v37 = vmul.f32 %v1063_v36, %v1057_v34 }
 0x7a4   :  { %v1070_v39 = vmul.f32 %v4502_v35, %v1065_v37 }
 0x7a6   :  { %v1075_v40 = vadd.f32 %v4503_v38, %v1070_v39 }
 0x7a8   :  { %v1077_v41 = vmul.f32 %v1075_v40, %v1075_v40  ;;  %v1076_v47 = vmul.f32 0.5, %v1075_v40 }
 0x7aa   :  { %v1078_v42 = vmul.f32 %v1077_v41, %v1075_v40 }
 0x7ac   :  { %v1079_v43 = vmul.f32 0.044715, %v1078_v42 }
 0x7ae   :  { %v1080_v44 = vadd.f32 %v1079_v43, %v1075_v40 }
 0x7b0   :  { %v1081_v45 = vmul.f32 0.7978846, %v1080_v44 }
 0x7b2   :  { %6092 = vtanh.f32 %v1081_v45  ;;  %v7144_v45 = vld [vmem:[#allocation26] sm:$0xff]  }
 0x7bf   :  { %v6093_v46 = vpop.eup %6092 }
 0x7c0   :  { %v1083_v48 = vadd.f32 1.0, %v6093_v46  ;;  %v4515_v46 = vld [vmem:[#allocation7 + $0x4] ss:$0 sm:$0xff] }
 0x7c2   :  { %v1084_v49 = vmul.f32 %v1083_v48, %v1076_v47 }
 0x7c4   :  { %v7066_v50 = vadd.f32 %v1084_v49, %v7002_v56 }
 0x7c6   :  { %v1103_v51 = vpack.c.bf16 %v7066_v50, %v7066_v50 }
 0x7c8   :  { %5357 = vmatmul.mubr.bf16.vlgmr.msra.gmra.mxu1 %v1103_v51 }
 0x7c9   :  { %5381 = vmatpush3.bf16.msra.mxu1 %v6940_v4  ;;  %5396 = vmatprep.mubr.msk.bf16.mxu1 %vm6605_vm0, %v6604_v0 }
 0x7ca   :  { %5382 = vmatprep.subr.bf16.mxu1 %v6604_v0 }
 0x7cd   :  { %5383 = vmatpush3.bf16.msra.mxu1 %v6946_v5 }
 0x7ce   :  { %5384 = vmatprep.subr.bf16.mxu1 %v6604_v0 }
 0x7d1   :  { %5385 = vmatpush3.bf16.msra.mxu1 %v6976_v20 }
 0x7d2   :  { %5386 = vmatprep.subr.bf16.mxu1 %v6604_v0 }
 0x7d5   :  { %5387 = vmatpush3.bf16.msra.mxu1 %v6980_v21 }
 0x7d6   :  { %5388 = vmatprep.subr.bf16.mxu1 %v6604_v0 }
 0x7d9   :  { %5389 = vmatpush3.bf16.msra.mxu1 %v7016_v58 }
 0x7da   :  { %5390 = vmatprep.subr.bf16.mxu1 %v6604_v0 }
 0x7dd   :  { %5391 = vmatpush3.bf16.msra.mxu1 %v7020_v59 }
 0x7de   :  { %5392 = vmatprep.subr.bf16.mxu1 %v6604_v0 }
 0x7e1   :  { %5393 = vmatpush3.bf16.msra.mxu1 %v7024_v60 }
 0x7e2   :  { %5394 = vmatprep.subr.bf16.mxu1 %v6604_v0 }
 0x7e5   :  { %5395 = vmatpush3.bf16.msra.mxu1 %v6893_v18 }
 0x7e6   :  { %5420 = vmatprep.subr.bf16.mxu1 %v6604_v0 }
 0x888   :  { %v1191_v53 = vpop.f32.mrf.mxu1 }
 0x889   :  { %v7088_v54 = vadd.f32 %v4504_v52, %v1191_v53 }
 0x88a   :  { %v5358_v55 = vpop.f32.mrf.mxu1 }
 0x88b   :  { %v1199_v56 = vpack.c.bf16 %v7088_v54, %v7088_v54  ;;  %v1240_v57 = vmul.f32 %v7088_v54, %v7088_v54 }
 0x88c   :  { %v1194_v61 = vpop.f32.mrf.mxu1 }
 0x88d   :  { %v1241_v62 = vpack.c.bf16 %v1240_v57, %v1240_v57  ;;  %5377 = vmatmul.mubr.bf16.vlgmr.msra.gmra.mxu0 %v1199_v56 }
 0x88e   :  { %v5359_v63 = vpop.f32.mrf.mxu1  ;;  %5416 = vmatprep.mubr.msk.bf16.mxu0 %vm6605_vm0, %v6604_v0  ;;  %5401 = vmatpush3.bf16.msra.mxu0 %v5882_v22  ;;  %v5896_v22 = vld [vmem:[#allocation5 + $0x148] sm:$0xff]  }
 0x88f   :  { %5397 = vmatmul.mubr.bf16.vlgmr.msra.gmra.mxu1 %v1241_v62  ;;  %5402 = vmatprep.subr.bf16.mxu0 %v6604_v0 }
 0x890   :  { %5421 = vmatpush3.bf16.msra.mxu1 %v6940_v4  ;;  %5436 = vmatprep.mubr.msk.bf16.mxu1 %vm6605_vm0, %v6604_v0 }
 0x891   :  { %5422 = vmatprep.subr.bf16.mxu1 %v6604_v0 }
 0x894   :  { %5423 = vmatpush3.bf16.msra.mxu1 %v6946_v5 }
 0x895   :  { %5424 = vmatprep.subr.bf16.mxu1 %v6604_v0 }
 0x898   :  { %5425 = vmatpush3.bf16.msra.mxu1 %v6976_v20 }
 0x899   :  { %5426 = vmatprep.subr.bf16.mxu1 %v6604_v0 }
 0x89c   :  { %5427 = vmatpush3.bf16.msra.mxu1 %v6980_v21 }
 0x89d   :  { %5428 = vmatprep.subr.bf16.mxu1 %v6604_v0 }
 0x8a0   :  { %5429 = vmatpush3.bf16.msra.mxu1 %v7016_v58 }
 0x8a1   :  { %5430 = vmatprep.subr.bf16.mxu1 %v6604_v0 }
 0x8a4   :  { %5431 = vmatpush3.bf16.msra.mxu1 %v7020_v59 }
 0x8a5   :  { %5432 = vmatprep.subr.bf16.mxu1 %v6604_v0 }
 0x8a8   :  { %5433 = vmatpush3.bf16.msra.mxu1 %v7024_v60 }
 0x8a9   :  { %5434 = vmatprep.subr.bf16.mxu1 %v6604_v0 }
 0x8ac   :  { %5435 = vmatpush3.bf16.msra.mxu1 %v6893_v18  ;;  %v5883_v18 = vld [vmem:[#allocation5 + $0x130] sm:$0xff]  }
 0x8ad   :  { %5460 = vmatprep.subr.bf16.mxu1 %v6604_v0  ;;  %5403 = vmatpush3.bf16.msra.mxu0 %v5883_v18  ;;  %v5897_v18 = vld [vmem:[#allocation5 + $0x140] sm:$0xff]  }
 0x8ae   :  { %5404 = vmatprep.subr.bf16.mxu0 %v6604_v0 }
 0x8b1   :  { %5405 = vmatpush3.bf16.msra.mxu0 %v5884_v23 }
 0x8b2   :  { %5406 = vmatprep.subr.bf16.mxu0 %v6604_v0 }
 0x8b5   :  { %5407 = vmatpush3.bf16.msra.mxu0 %v5885_v24 }
 0x8b6   :  { %5408 = vmatprep.subr.bf16.mxu0 %v6604_v0 }
 0x8b9   :  { %5409 = vmatpush3.bf16.msra.mxu0 %v5886_v25  ;;  %v4524_v25 = vld [vmem:[#allocation8 + $0x4] ss:$0 sm:$0xff] }
 0x8ba   :  { %5410 = vmatprep.subr.bf16.mxu0 %v6604_v0 }
 0x8bd   :  { %5411 = vmatpush3.bf16.msra.mxu0 %v5887_v12 }
 0x8be   :  { %5412 = vmatprep.subr.bf16.mxu0 %v6604_v0 }
 0x8c1   :  { %5413 = vmatpush3.bf16.msra.mxu0 %v5888_v26 }
 0x8c2   :  { %5414 = vmatprep.subr.bf16.mxu0 %v6604_v0 }
 0x8c5   :  { %5415 = vmatpush3.bf16.msra.mxu0 %v5889_v27  ;;  %v4525_v27 = vld [vmem:[#allocation10 + $0x4] ss:$0 sm:$0xff] }
 0x8c6   :  { %5440 = vmatprep.subr.bf16.mxu0 %v6604_v0 }
 0x94d   :  { %v1234_v1 = vpop.f32.mrf.mxu0 }
 0x94e   :  { %v1282_v2 = vmul.f32 %v1234_v1, %v1234_v1  ;;  %1286 = vperm.xlu0 %5828, %v1234_v1  }
 0x94f   :  { %v5378_v3 = vpop.f32.mrf.mxu0  ;;  %v1276_v6 = vpop.f32.mrf.mxu1 }
 0x950   :  { %v1283_v7 = vsub.f32 %v1276_v6, %v1282_v2 }
 0x951   :  { %v1237_v8 = vpop.f32.mrf.mxu0  ;;  %v5398_v9 = vpop.f32.mrf.mxu1 }
 0x952   :  { %v1290_v10 = vadd.f32 1e-05, %v1283_v7  ;;  %v5890_v9 = vld [vmem:[#allocation5 + $0x178] sm:$0xff]  }
 0x953   :  { %v5379_v11 = vpop.f32.mrf.mxu0  ;;  %v1279_v13 = vpop.f32.mrf.mxu1 }
 0x954   :  { %6094 = vrsqrt.f32 %v1290_v10  ;;  %v5891_v10 = vld [vmem:[#allocation5 + $0x170] sm:$0xff]   ;;  %v5892_v11 = vld [vmem:[#allocation5 + $0x168] sm:$0xff]   ;;  %v5893_v13 = vld [vmem:[#allocation5 + $0x160] sm:$0xff]  }
 0x955   :  { %v5399_v14 = vpop.f32.mrf.mxu1 }
 0x956   :  { %v5894_v14 = vld [vmem:[#allocation5 + $0x158] sm:$0xff]  }
 0x961   :  { %v6095_v16 = vpop.eup %6094 }
 0x962   :  { %1294 = vperm.xlu1 %5829, %v6095_v16   ;;  %v5895_v16 = vld [vmem:[#allocation5 + $0x150] sm:$0xff]  }
 0x9c9   :  { %v1287_v28 = vpop.permute.xlu0 %1286 }
 0x9ca   :  { %v1289_v15 = vsub.f32 %v7088_v54, %v1287_v28 }
 0x9dd   :  { %v1295_v30 = vpop.permute.xlu1 %1294 }
 0x9de   :  { %v1297_v17 = vmul.f32 %v1295_v30, %v1289_v15 }
 0x9e0   :  { %v1302_v32 = vmul.f32 %v4513_v29, %v1297_v17 }
 0x9e2   :  { %v1307_v33 = vadd.f32 %v4514_v31, %v1302_v32 }
 0x9e4   :  { %v1309_v34 = vmul.f32 %v1307_v33, %v1307_v33  ;;  %v1308_v40 = vmul.f32 0.5, %v1307_v33 }
 0x9e6   :  { %v1310_v35 = vmul.f32 %v1309_v34, %v1307_v33 }
 0x9e8   :  { %v1311_v36 = vmul.f32 0.044715, %v1310_v35 }
 0x9ea   :  { %v1312_v37 = vadd.f32 %v1311_v36, %v1307_v33 }
 0x9ec   :  { %v1313_v38 = vmul.f32 0.7978846, %v1312_v37 }
 0x9ee   :  { %6096 = vtanh.f32 %v1313_v38 }
 0x9fb   :  { %v6097_v39 = vpop.eup %6096 }
 0x9fc   :  { %v1315_v41 = vadd.f32 1.0, %v6097_v39  ;;  %v4526_v39 = vld [vmem:[#allocation7 + $0x5] ss:$0 sm:$0xff] }
 0x9fe   :  { %v1316_v42 = vmul.f32 %v1315_v41, %v1308_v40 }
 0xa00   :  { %v7124_v43 = vadd.f32 %v1316_v42, %v7066_v50 }
 0xa02   :  { %v1335_v44 = vpack.c.bf16 %v7124_v43, %v7124_v43 }
 0xa04   :  { %5417 = vmatmul.mubr.bf16.vlgmr.msra.gmra.mxu0 %v1335_v44 }
 0xa05   :  { %5441 = vmatpush3.bf16.msra.mxu0 %v6940_v4  ;;  %5456 = vmatprep.mubr.msk.bf16.mxu0 %vm6605_vm0, %v6604_v0 }
 0xa06   :  { %5442 = vmatprep.subr.bf16.mxu0 %v6604_v0 }
 0xa09   :  { %5443 = vmatpush3.bf16.msra.mxu0 %v6946_v5 }
 0xa0a   :  { %5444 = vmatprep.subr.bf16.mxu0 %v6604_v0 }
 0xa0d   :  { %5445 = vmatpush3.bf16.msra.mxu0 %v6976_v20 }
 0xa0e   :  { %5446 = vmatprep.subr.bf16.mxu0 %v6604_v0 }
 0xa11   :  { %5447 = vmatpush3.bf16.msra.mxu0 %v6980_v21 }
 0xa12   :  { %5448 = vmatprep.subr.bf16.mxu0 %v6604_v0 }
 0xa15   :  { %5449 = vmatpush3.bf16.msra.mxu0 %v7016_v58 }
 0xa16   :  { %5450 = vmatprep.subr.bf16.mxu0 %v6604_v0 }
 0xa19   :  { %5451 = vmatpush3.bf16.msra.mxu0 %v7020_v59 }
 0xa1a   :  { %5452 = vmatprep.subr.bf16.mxu0 %v6604_v0 }
 0xa1d   :  { %5453 = vmatpush3.bf16.msra.mxu0 %v7024_v60 }
 0xa1e   :  { %5454 = vmatprep.subr.bf16.mxu0 %v6604_v0 }
 0xa21   :  { %5455 = vmatpush3.bf16.msra.mxu0 %v7144_v45 }
 0xa22   :  { %5480 = vmatprep.subr.bf16.mxu0 %v6604_v0 }
 0xac4   :  { %v1423_v47 = vpop.f32.mrf.mxu0 }
 0xac5   :  { %v7148_v48 = vadd.f32 %v4515_v46, %v1423_v47 }
 0xac6   :  { %v5418_v49 = vpop.f32.mrf.mxu0 }
 0xac7   :  { %v1431_v50 = vpack.c.bf16 %v7148_v48, %v7148_v48  ;;  %v1472_v51 = vmul.f32 %v7148_v48, %v7148_v48 }
 0xac8   :  { %v1426_v52 = vpop.f32.mrf.mxu0 }
 0xac9   :  { %v1473_v53 = vpack.c.bf16 %v1472_v51, %v1472_v51  ;;  %5437 = vmatmul.mubr.bf16.vlgmr.msra.gmra.mxu1 %v1431_v50 }
 0xaca   :  { %v5419_v54 = vpop.f32.mrf.mxu0  ;;  %5476 = vmatprep.mubr.msk.bf16.mxu1 %vm6605_vm0, %v6604_v0  ;;  %5461 = vmatpush3.bf16.msra.mxu1 %v5890_v9 }
 0xacb   :  { %5457 = vmatmul.mubr.bf16.vlgmr.msra.gmra.mxu0 %v1473_v53  ;;  %5462 = vmatprep.subr.bf16.mxu1 %v6604_v0 }
 0xacc   :  { %5481 = vmatpush3.bf16.msra.mxu0 %v6940_v4  ;;  %5496 = vmatprep.mubr.msk.bf16.mxu0 %vm6605_vm0, %v6604_v0 }
 0xacd   :  { %5482 = vmatprep.subr.bf16.mxu0 %v6604_v0 }
 0xace   :  { %5463 = vmatpush3.bf16.msra.mxu1 %v5891_v10 }
 0xacf   :  { %5464 = vmatprep.subr.bf16.mxu1 %v6604_v0 }
 0xad0   :  { %5483 = vmatpush3.bf16.msra.mxu0 %v6946_v5 }
 0xad1   :  { %5484 = vmatprep.subr.bf16.mxu0 %v6604_v0 }
 0xad2   :  { %5465 = vmatpush3.bf16.msra.mxu1 %v5892_v11  ;;  %v4535_v11 = vld [vmem:[#allocation8 + $0x5] ss:$0 sm:$0xff] }
 0xad3   :  { %5466 = vmatprep.subr.bf16.mxu1 %v6604_v0 }
 0xad4   :  { %5485 = vmatpush3.bf16.msra.mxu0 %v6976_v20 }
 0xad5   :  { %5486 = vmatprep.subr.bf16.mxu0 %v6604_v0 }
 0xad6   :  { %5467 = vmatpush3.bf16.msra.mxu1 %v5893_v13 }
 0xad7   :  { %5468 = vmatprep.subr.bf16.mxu1 %v6604_v0 }
 0xad8   :  { %5487 = vmatpush3.bf16.msra.mxu0 %v6980_v21 }
 0xad9   :  { %5488 = vmatprep.subr.bf16.mxu0 %v6604_v0 }
 0xada   :  { %5469 = vmatpush3.bf16.msra.mxu1 %v5894_v14 }
 0xadb   :  { %5470 = vmatprep.subr.bf16.mxu1 %v6604_v0 }
 0xadc   :  { %5489 = vmatpush3.bf16.msra.mxu0 %v7016_v58 }
 0xadd   :  { %5490 = vmatprep.subr.bf16.mxu0 %v6604_v0 }
 0xade   :  { %5471 = vmatpush3.bf16.msra.mxu1 %v5895_v16  ;;  %v4536_v16 = vld [vmem:[#allocation10 + $0x5] ss:$0 sm:$0xff] }
 0xadf   :  { %5472 = vmatprep.subr.bf16.mxu1 %v6604_v0 }
 0xae0   :  { %5491 = vmatpush3.bf16.msra.mxu0 %v7020_v59 }
 0xae1   :  { %5492 = vmatprep.subr.bf16.mxu0 %v6604_v0 }
 0xae2   :  { %5473 = vmatpush3.bf16.msra.mxu1 %v5896_v22 }
 0xae3   :  { %5474 = vmatprep.subr.bf16.mxu1 %v6604_v0 }
 0xae4   :  { %5493 = vmatpush3.bf16.msra.mxu0 %v7024_v60 }
 0xae5   :  { %5494 = vmatprep.subr.bf16.mxu0 %v6604_v0 }
 0xae6   :  { %5475 = vmatpush3.bf16.msra.mxu1 %v5897_v18 }
 0xae7   :  { %5500 = vmatprep.subr.bf16.mxu1 %v6604_v0 }
 0xae8   :  { %5495 = vmatpush3.bf16.msra.mxu0 %v7144_v45 }
 0xae9   :  { %5520 = vmatprep.subr.bf16.mxu0 %v6604_v0 }
 0xb89   :  { %v1466_v55 = vpop.f32.mrf.mxu1 }
 0xb8a   :  { %v1514_v56 = vmul.f32 %v1466_v55, %v1466_v55  ;;  %1518 = vperm.xlu0 %5828, %v1466_v55  }
 0xb8b   :  { %v5438_v57 = vpop.f32.mrf.mxu1  ;;  %v1508_v61 = vpop.f32.mrf.mxu0 }
 0xb8c   :  { %v1515_v62 = vsub.f32 %v1508_v61, %v1514_v56 }
 0xb8d   :  { %v1469_v63 = vpop.f32.mrf.mxu1  ;;  %v5458_v1 = vpop.f32.mrf.mxu0 }
 0xb8e   :  { %v1522_v2 = vadd.f32 1e-05, %v1515_v62  ;;  %v5898_v62 = vld [vmem:[#allocation5 + $0x1b8] sm:$0xff]   ;;  %v5899_v63 = vld [vmem:[#allocation5 + $0x1b0] sm:$0xff]   ;;  %v5900_v1 = vld [vmem:[#allocation5 + $0x1a8] sm:$0xff]  }
 0xb8f   :  { %v5439_v3 = vpop.f32.mrf.mxu1  ;;  %v1511_v6 = vpop.f32.mrf.mxu0 }
 0xb90   :  { %6098 = vrsqrt.f32 %v1522_v2  ;;  %v5901_v2 = vld [vmem:[#allocation5 + $0x1a0] sm:$0xff]   ;;  %v5902_v3 = vld [vmem:[#allocation5 + $0x198] sm:$0xff]   ;;  %v5903_v6 = vld [vmem:[#allocation5 + $0x190] sm:$0xff]  }
 0xb91   :  { %v5459_v7 = vpop.f32.mrf.mxu0 }
 0xb92   :  { %v5904_v7 = vld [vmem:[#allocation5 + $0x188] sm:$0xff]  }
 0xb9d   :  { %v6099_v8 = vpop.eup %6098 }
 0xb9e   :  { %1526 = vperm.xlu1 %5829, %v6099_v8   ;;  %v5905_v8 = vld [vmem:[#allocation5 + $0x180] sm:$0xff]  }
 0xc05   :  { %v1519_v23 = vpop.permute.xlu0 %1518 }
 0xc06   :  { %v1521_v24 = vsub.f32 %v7148_v48, %v1519_v23 }
 0xc19   :  { %v1527_v12 = vpop.permute.xlu1 %1526 }
 0xc1a   :  { %v1529_v26 = vmul.f32 %v1527_v12, %v1521_v24 }
 0xc1c   :  { %v1534_v28 = vmul.f32 %v4524_v25, %v1529_v26 }
 0xc1e   :  { %v1539_v15 = vadd.f32 %v4525_v27, %v1534_v28 }
 0xc20   :  { %v1541_v29 = vmul.f32 %v1539_v15, %v1539_v15  ;;  %v1540_v34 = vmul.f32 0.5, %v1539_v15 }
 0xc22   :  { %v1542_v30 = vmul.f32 %v1541_v29, %v1539_v15 }
 0xc24   :  { %v1543_v17 = vmul.f32 0.044715, %v1542_v30 }
 0xc26   :  { %v1544_v31 = vadd.f32 %v1543_v17, %v1539_v15 }
 0xc28   :  { %v1545_v32 = vmul.f32 0.7978846, %v1544_v31  ;;  %v7246_v31 = vld [vmem:[#allocation26 + $0x38] sm:$0xff]  }
 0xc2a   :  { %6100 = vtanh.f32 %v1545_v32  ;;  %v7252_v32 = vld [vmem:[#allocation26 + $0x30] sm:$0xff]  }
 0xc37   :  { %v6101_v33 = vpop.eup %6100 }
 0xc38   :  { %v1547_v35 = vadd.f32 1.0, %v6101_v33 }
 0xc3a   :  { %v1548_v36 = vmul.f32 %v1547_v35, %v1540_v34 }
 0xc3c   :  { %v7184_v37 = vadd.f32 %v1548_v36, %v7124_v43 }
 0xc3e   :  { %v1567_v38 = vpack.c.bf16 %v7184_v37, %v7184_v37 }
 0xc40   :  { %5477 = vmatmul.mubr.bf16.vlgmr.msra.gmra.mxu1 %v1567_v38 }
 0xc41   :  { %5501 = vmatpush3.bf16.msra.mxu1 %v6940_v4  ;;  %5516 = vmatprep.mubr.msk.bf16.mxu1 %vm6605_vm0, %v6604_v0 }
 0xc42   :  { %5502 = vmatprep.subr.bf16.mxu1 %v6604_v0 }
 0xc45   :  { %5503 = vmatpush3.bf16.msra.mxu1 %v6946_v5 }
 0xc46   :  { %5504 = vmatprep.subr.bf16.mxu1 %v6604_v0 }
 0xc49   :  { %5505 = vmatpush3.bf16.msra.mxu1 %v6976_v20 }
 0xc4a   :  { %5506 = vmatprep.subr.bf16.mxu1 %v6604_v0 }
 0xc4d   :  { %5507 = vmatpush3.bf16.msra.mxu1 %v6980_v21 }
 0xc4e   :  { %5508 = vmatprep.subr.bf16.mxu1 %v6604_v0 }
 0xc51   :  { %5509 = vmatpush3.bf16.msra.mxu1 %v7016_v58 }
 0xc52   :  { %5510 = vmatprep.subr.bf16.mxu1 %v6604_v0 }
 0xc55   :  { %5511 = vmatpush3.bf16.msra.mxu1 %v7020_v59 }
 0xc56   :  { %5512 = vmatprep.subr.bf16.mxu1 %v6604_v0 }
 0xc59   :  { %5513 = vmatpush3.bf16.msra.mxu1 %v7024_v60 }
 0xc5a   :  { %5514 = vmatprep.subr.bf16.mxu1 %v6604_v0 }
 0xc5d   :  { %5515 = vmatpush3.bf16.msra.mxu1 %v7144_v45 }
 0xc5e   :  { %5540 = vmatprep.subr.bf16.mxu1 %v6604_v0 }
 0xd00   :  { %v1655_v40 = vpop.f32.mrf.mxu1 }
 0xd01   :  { %v7206_v41 = vadd.f32 %v4526_v39, %v1655_v40  ;;  %v7282_v40 = vld [vmem:[#allocation26 + $0x28] sm:$0xff]  }
 0xd02   :  { %v5478_v42 = vpop.f32.mrf.mxu1 }
 0xd03   :  { %v1663_v43 = vpack.c.bf16 %v7206_v41, %v7206_v41  ;;  %v1704_v44 = vmul.f32 %v7206_v41, %v7206_v41 }
 0xd04   :  { %v1658_v46 = vpop.f32.mrf.mxu1 }
 0xd05   :  { %v1705_v47 = vpack.c.bf16 %v1704_v44, %v1704_v44  ;;  %5497 = vmatmul.mubr.bf16.vlgmr.msra.gmra.mxu0 %v1663_v43 }
 0xd06   :  { %v5479_v48 = vpop.f32.mrf.mxu1  ;;  %5536 = vmatprep.mubr.msk.bf16.mxu0 %vm6605_vm0, %v6604_v0  ;;  %5521 = vmatpush3.bf16.msra.mxu0 %v5898_v62 }
 0xd07   :  { %5517 = vmatmul.mubr.bf16.vlgmr.msra.gmra.mxu1 %v1705_v47  ;;  %5522 = vmatprep.subr.bf16.mxu0 %v6604_v0 }
 0xd08   :  { %5541 = vmatpush3.bf16.msra.mxu1 %v6940_v4  ;;  %5556 = vmatprep.mubr.msk.bf16.mxu1 %vm6605_vm0, %v6604_v0 }
 0xd09   :  { %5542 = vmatprep.subr.bf16.mxu1 %v6604_v0 }
 0xd0a   :  { %5523 = vmatpush3.bf16.msra.mxu0 %v5899_v63  ;;  %v4546_v63 = vld [vmem:[#allocation8 + $0x6] ss:$0 sm:$0xff] }
 0xd0b   :  { %5524 = vmatprep.subr.bf16.mxu0 %v6604_v0 }
 0xd0c   :  { %5543 = vmatpush3.bf16.msra.mxu1 %v6946_v5 }
 0xd0d   :  { %5544 = vmatprep.subr.bf16.mxu1 %v6604_v0 }
 0xd0e   :  { %5525 = vmatpush3.bf16.msra.mxu0 %v5900_v1 }
 0xd0f   :  { %5526 = vmatprep.subr.bf16.mxu0 %v6604_v0 }
 0xd10   :  { %5545 = vmatpush3.bf16.msra.mxu1 %v6976_v20 }
 0xd11   :  { %5546 = vmatprep.subr.bf16.mxu1 %v6604_v0 }
 0xd12   :  { %5527 = vmatpush3.bf16.msra.mxu0 %v5901_v2 }
 0xd13   :  { %5528 = vmatprep.subr.bf16.mxu0 %v6604_v0 }
 0xd14   :  { %5547 = vmatpush3.bf16.msra.mxu1 %v6980_v21 }
 0xd15   :  { %5548 = vmatprep.subr.bf16.mxu1 %v6604_v0 }
 0xd16   :  { %5529 = vmatpush3.bf16.msra.mxu0 %v5902_v3  ;;  %v4547_v3 = vld [vmem:[#allocation10 + $0x6] ss:$0 sm:$0xff] }
 0xd17   :  { %5530 = vmatprep.subr.bf16.mxu0 %v6604_v0 }
 0xd18   :  { %5549 = vmatpush3.bf16.msra.mxu1 %v7016_v58 }
 0xd19   :  { %5550 = vmatprep.subr.bf16.mxu1 %v6604_v0 }
 0xd1a   :  { %5531 = vmatpush3.bf16.msra.mxu0 %v5903_v6 }
 0xd1b   :  { %5532 = vmatprep.subr.bf16.mxu0 %v6604_v0 }
 0xd1c   :  { %5551 = vmatpush3.bf16.msra.mxu1 %v7020_v59 }
 0xd1d   :  { %5552 = vmatprep.subr.bf16.mxu1 %v6604_v0 }
 0xd1e   :  { %5533 = vmatpush3.bf16.msra.mxu0 %v5904_v7 }
 0xd1f   :  { %5534 = vmatprep.subr.bf16.mxu0 %v6604_v0 }
 0xd20   :  { %5553 = vmatpush3.bf16.msra.mxu1 %v7024_v60 }
 0xd21   :  { %5554 = vmatprep.subr.bf16.mxu1 %v6604_v0 }
 0xd22   :  { %5535 = vmatpush3.bf16.msra.mxu0 %v5905_v8 }
 0xd23   :  { %5560 = vmatprep.subr.bf16.mxu0 %v6604_v0 }
 0xd24   :  { %5555 = vmatpush3.bf16.msra.mxu1 %v7144_v45 }
 0xd25   :  { %5580 = vmatprep.subr.bf16.mxu1 %v6604_v0 }
 0xdc5   :  { %v1698_v4 = vpop.f32.mrf.mxu0 }
 0xdc6   :  { %v1746_v5 = vmul.f32 %v1698_v4, %v1698_v4  ;;  %1750 = vperm.xlu0 %5828, %v1698_v4  }
 0xdc7   :  { %v5498_v49 = vpop.f32.mrf.mxu0  ;;  %v1740_v50 = vpop.f32.mrf.mxu1 }
 0xdc8   :  { %v1747_v51 = vsub.f32 %v1740_v50, %v1746_v5 }
 0xdc9   :  { %v1701_v52 = vpop.f32.mrf.mxu0  ;;  %v5518_v53 = vpop.f32.mrf.mxu1 }
 0xdca   :  { %v1754_v54 = vadd.f32 1e-05, %v1747_v51  ;;  %v5907_v51 = vld [vmem:[#allocation5 + $0x1f0] sm:$0xff]   ;;  %v5908_v52 = vld [vmem:[#allocation5 + $0x1e8] sm:$0xff]   ;;  %v5909_v53 = vld [vmem:[#allocation5 + $0x1e0] sm:$0xff]  }
 0xdcb   :  { %v5499_v55 = vpop.f32.mrf.mxu0  ;;  %v1743_v56 = vpop.f32.mrf.mxu1 }
 0xdcc   :  { %6102 = vrsqrt.f32 %v1754_v54  ;;  %v5910_v54 = vld [vmem:[#allocation5 + $0x1d8] sm:$0xff]   ;;  %v5911_v55 = vld [vmem:[#allocation5 + $0x1d0] sm:$0xff]   ;;  %v5912_v56 = vld [vmem:[#allocation5 + $0x1c8] sm:$0xff]  }
 0xdcd   :  { %v5519_v57 = vpop.f32.mrf.mxu1 }
 0xdce   :  { %v5913_v57 = vld [vmem:[#allocation5 + $0x1c0] sm:$0xff]  }
 0xdd9   :  { %v6103_v61 = vpop.eup %6102 }
 0xdda   :  { %1758 = vperm.xlu1 %5829, %v6103_v61  }
 0xe41   :  { %v1751_v9 = vpop.permute.xlu0 %1750 }
 0xe42   :  { %v1753_v10 = vsub.f32 %v7206_v41, %v1751_v9  ;;  %v7286_v41 = vld [vmem:[#allocation26 + $0x20] sm:$0xff]  }
 0xe55   :  { %v1759_v13 = vpop.permute.xlu1 %1758 }
 0xe56   :  { %v1761_v14 = vmul.f32 %v1759_v13, %v1753_v10 }
 0xe58   :  { %v1766_v22 = vmul.f32 %v4535_v11, %v1761_v14 }
 0xe5a   :  { %v1771_v18 = vadd.f32 %v4536_v16, %v1766_v22 }
 0xe5c   :  { %v1773_v23 = vmul.f32 %v1771_v18, %v1771_v18  ;;  %v1772_v28 = vmul.f32 0.5, %v1771_v18 }
 0xe5e   :  { %v1774_v24 = vmul.f32 %v1773_v23, %v1771_v18 }
 0xe60   :  { %v1775_v25 = vmul.f32 0.044715, %v1774_v24 }
 0xe62   :  { %v1776_v12 = vadd.f32 %v1775_v25, %v1771_v18  ;;  %v6156_v25 = vld [vmem:[#allocation26 + $0x18] sm:$0xff]  }
 0xe64   :  { %v1777_v26 = vmul.f32 0.7978846, %v1776_v12  ;;  %v6157_v12 = vld [vmem:[#allocation26 + $0x10] sm:$0xff]  }
 0xe66   :  { %6104 = vtanh.f32 %v1777_v26  ;;  %v6158_v26 = vld [vmem:[#allocation26 + $0x8] sm:$0xff]  }
 0xe73   :  { %v6105_v27 = vpop.eup %6104 }
 0xe74   :  { %v1779_v15 = vadd.f32 1.0, %v6105_v27  ;;  %v4548_v27 = vld [vmem:[#allocation7 + $0x7] ss:$0 sm:$0xff] }
 0xe76   :  { %v1780_v29 = vmul.f32 %v1779_v15, %v1772_v28 }
 0xe78   :  { %v7242_v30 = vadd.f32 %v1780_v29, %v7184_v37 }
 0xe7a   :  { %v1799_v17 = vpack.c.bf16 %v7242_v30, %v7242_v30 }
 0xe7c   :  { %5537 = vmatmul.mubr.bf16.vlgmr.msra.gmra.mxu0 %v1799_v17 }
 0xe7d   :  { %5561 = vmatpush3.bf16.msra.mxu0 %v7246_v31  ;;  %5576 = vmatprep.mubr.msk.bf16.mxu0 %vm6605_vm0, %v6604_v0 }
 0xe7e   :  { %5562 = vmatprep.subr.bf16.mxu0 %v6604_v0 }
 0xe81   :  { %5563 = vmatpush3.bf16.msra.mxu0 %v7252_v32 }
 0xe82   :  { %5564 = vmatprep.subr.bf16.mxu0 %v6604_v0 }
 0xe85   :  { %5565 = vmatpush3.bf16.msra.mxu0 %v6976_v20  ;;  %v4537_v20 = vld [vmem:[#allocation7 + $0x6] ss:$0 sm:$0xff] }
 0xe86   :  { %5566 = vmatprep.subr.bf16.mxu0 %v6604_v0 }
 0xe89   :  { %5567 = vmatpush3.bf16.msra.mxu0 %v6980_v21 }
 0xe8a   :  { %5568 = vmatprep.subr.bf16.mxu0 %v6604_v0 }
 0xe8d   :  { %5569 = vmatpush3.bf16.msra.mxu0 %v7016_v58 }
 0xe8e   :  { %5570 = vmatprep.subr.bf16.mxu0 %v6604_v0 }
 0xe91   :  { %5571 = vmatpush3.bf16.msra.mxu0 %v7020_v59 }
 0xe92   :  { %5572 = vmatprep.subr.bf16.mxu0 %v6604_v0 }
 0xe95   :  { %5573 = vmatpush3.bf16.msra.mxu0 %v7024_v60 }
 0xe96   :  { %5574 = vmatprep.subr.bf16.mxu0 %v6604_v0 }
 0xe99   :  { %5575 = vmatpush3.bf16.msra.mxu0 %v7144_v45 }
 0xe9a   :  { %5600 = vmatprep.subr.bf16.mxu0 %v6604_v0 }
 0xf3c   :  { %v1887_v21 = vpop.f32.mrf.mxu0 }
 0xf3d   :  { %v7268_v33 = vadd.f32 %v4537_v20, %v1887_v21 }
 0xf3e   :  { %v5538_v34 = vpop.f32.mrf.mxu0 }
 0xf3f   :  { %v1895_v35 = vpack.c.bf16 %v7268_v33, %v7268_v33  ;;  %v1936_v36 = vmul.f32 %v7268_v33, %v7268_v33 }
 0xf40   :  { %v1890_v37 = vpop.f32.mrf.mxu0 }
 0xf41   :  { %v1937_v38 = vpack.c.bf16 %v1936_v36, %v1936_v36  ;;  %5557 = vmatmul.mubr.bf16.vlgmr.msra.gmra.mxu1 %v1895_v35 }
 0xf42   :  { %v5539_v39 = vpop.f32.mrf.mxu0  ;;  %5596 = vmatprep.mubr.msk.bf16.mxu1 %vm6605_vm0, %v6604_v0 }
 0xf43   :  { %5577 = vmatmul.mubr.bf16.vlgmr.msra.gmra.mxu0 %v1937_v38 }
 0xf44   :  { %5601 = vmatpush3.bf16.msra.mxu0 %v7246_v31  ;;  %5616 = vmatprep.mubr.msk.bf16.mxu0 %vm6605_vm0, %v6604_v0 }
 0xf45   :  { %5602 = vmatprep.subr.bf16.mxu0 %v6604_v0 }
 0xf48   :  { %5603 = vmatpush3.bf16.msra.mxu0 %v7252_v32 }
 0xf49   :  { %5604 = vmatprep.subr.bf16.mxu0 %v6604_v0 }
 0xf4c   :  { %5605 = vmatpush3.bf16.msra.mxu0 %v7282_v40 }
 0xf4d   :  { %5606 = vmatprep.subr.bf16.mxu0 %v6604_v0 }
 0xf50   :  { %5607 = vmatpush3.bf16.msra.mxu0 %v7286_v41 }
 0xf51   :  { %5608 = vmatprep.subr.bf16.mxu0 %v6604_v0 }
 0xf54   :  { %5609 = vmatpush3.bf16.msra.mxu0 %v7016_v58 }
 0xf55   :  { %5610 = vmatprep.subr.bf16.mxu0 %v6604_v0 }
 0xf58   :  { %5611 = vmatpush3.bf16.msra.mxu0 %v7020_v59 }
 0xf59   :  { %5612 = vmatprep.subr.bf16.mxu0 %v6604_v0 }
 0xf5c   :  { %5613 = vmatpush3.bf16.msra.mxu0 %v7024_v60  ;;  %v5906_v60 = vld [vmem:[#allocation5 + $0x1f8] sm:$0xff]  }
 0xf5d   :  { %5614 = vmatprep.subr.bf16.mxu0 %v6604_v0  ;;  %5581 = vmatpush3.bf16.msra.mxu1 %v5906_v60  ;;  %v5929_v60 = vld [vmem:[#allocation11 + $0x20] ss:$8 sps:$4 sm:$0xff]  }
 0xf5e   :  { %5582 = vmatprep.subr.bf16.mxu1 %v6604_v0 }
 0xf60   :  { %5615 = vmatpush3.bf16.msra.mxu0 %v7144_v45 }
 0xf61   :  { %5583 = vmatpush3.bf16.msra.mxu1 %v5907_v51  ;;  %v5934_v51 = vld [vmem:[#allocation11 + $0x14] ss:$8 sps:$4 sm:$0xff]  }
 0xf62   :  { %5584 = vmatprep.subr.bf16.mxu1 %v6604_v0 }
 0xf65   :  { %5585 = vmatpush3.bf16.msra.mxu1 %v5908_v52  ;;  %v5932_v52 = vld [vmem:[#allocation11 + $0x10] ss:$8 sps:$4 sm:$0xff]  }
 0xf66   :  { %5586 = vmatprep.subr.bf16.mxu1 %v6604_v0 }
 0xf69   :  { %5587 = vmatpush3.bf16.msra.mxu1 %v5909_v53  ;;  %v5937_v53 = vld [vmem:[#allocation11 + $0x4] ss:$8 sps:$4 sm:$0xff]  }
 0xf6a   :  { %5588 = vmatprep.subr.bf16.mxu1 %v6604_v0 }
 0xf6d   :  { %5589 = vmatpush3.bf16.msra.mxu1 %v5910_v54  ;;  %v5935_v54 = vld [vmem:[#allocation11] ss:$8 sps:$4 sm:$0xff]  }
 0xf6e   :  { %5590 = vmatprep.subr.bf16.mxu1 %v6604_v0 }
 0xf71   :  { %5591 = vmatpush3.bf16.msra.mxu1 %v5911_v55  ;;  %v5938_v55 = vld [vmem:[#allocation14 + $0x78] sm:$0xff]  }
 0xf72   :  { %5592 = vmatprep.subr.bf16.mxu1 %v6604_v0 }
 0xf75   :  { %5593 = vmatpush3.bf16.msra.mxu1 %v5912_v56  ;;  %v5939_v56 = vld [vmem:[#allocation14 + $0x38] sm:$0xff]  }
 0xf76   :  { %5594 = vmatprep.subr.bf16.mxu1 %v6604_v0 }
 0xf79   :  { %5595 = vmatpush3.bf16.msra.mxu1 %v5913_v57  ;;  %v5940_v57 = vld [vmem:[#allocation14 + $0x70] sm:$0xff]  }
 0xf7a   :  { %5620 = vmatprep.subr.bf16.mxu1 %v6604_v0 }
0x1001   :  { %v1930_v42 = vpop.f32.mrf.mxu1 }
0x1002   :  { %v1978_v43 = vmul.f32 %v1930_v42, %v1930_v42  ;;  %1982 = vperm.xlu0 %5828, %v1930_v42  }
0x1003   :  { %v5558_v44 = vpop.f32.mrf.mxu1  ;;  %v1972_v46 = vpop.f32.mrf.mxu0 }
0x1004   :  { %v1979_v47 = vsub.f32 %v1972_v46, %v1978_v43  ;;  %v5916_v43 = vld [vmem:[#allocation11 + $0x74] ss:$8 sps:$4 sm:$0xff]   ;;  %v5914_v44 = vld [vmem:[#allocation11 + $0x70] ss:$8 sps:$4 sm:$0xff]   ;;  %v5919_v46 = vld [vmem:[#allocation11 + $0x64] ss:$8 sps:$4 sm:$0xff]  }
0x1005   :  { %v1933_v48 = vpop.f32.mrf.mxu1  ;;  %v5578_v58 = vpop.f32.mrf.mxu0  ;;  %2355 = vmatprep.subr.bf16.mxu0 %v5916_v43  ;;  %v5969_v43 = vld [vmem:[#allocation17 + $0x20] ss:$8 sps:$4 sm:$0xff]  }
0x1006   :  { %v1986_v4 = vadd.f32 1e-05, %v1979_v47  ;;  %v5917_v47 = vld [vmem:[#allocation11 + $0x60] ss:$8 sps:$4 sm:$0xff]   ;;  %v5922_v48 = vld [vmem:[#allocation11 + $0x54] ss:$8 sps:$4 sm:$0xff]  }
0x1007   :  { %v5559_v5 = vpop.f32.mrf.mxu1  ;;  %v1975_v49 = vpop.f32.mrf.mxu0  ;;  %v5920_v58 = vld [vmem:[#allocation11 + $0x50] ss:$8 sps:$4 sm:$0xff]  }
0x1008   :  { %6106 = vrsqrt.f32 %v1986_v4  ;;  %v5923_v4 = vld [vmem:[#allocation11 + $0x40] ss:$8 sps:$4 sm:$0xff]   ;;  %v5925_v5 = vld [vmem:[#allocation11 + $0x44] ss:$8 sps:$4 sm:$0xff]   ;;  %v5928_v49 = vld [vmem:[#allocation11 + $0x34] ss:$8 sps:$4 sm:$0xff]  }
0x1009   :  { %v5579_v59 = vpop.f32.mrf.mxu0 }
0x100a   :  { %v5926_v59 = vld [vmem:[#allocation11 + $0x30] ss:$8 sps:$4 sm:$0xff]  }
0x1015   :  { %v6107_v50 = vpop.eup %6106 }
0x1016   :  { %1990 = vperm.xlu1 %5829, %v6107_v50   ;;  %v5931_v50 = vld [vmem:[#allocation11 + $0x24] ss:$8 sps:$4 sm:$0xff]  }
0x107d   :  { %v1983_v61 = vpop.permute.xlu0 %1982 }
0x107e   :  { %v1985_v62 = vsub.f32 %v7268_v33, %v1983_v61  ;;  %v5941_v61 = vld [vmem:[#allocation14 + $0x30] sm:$0xff]  }
0x1091   :  { %v1991_v1 = vpop.permute.xlu1 %1990 }
0x1092   :  { %v1993_v2 = vmul.f32 %v1991_v1, %v1985_v62  ;;  %v5942_v62 = vld [vmem:[#allocation14 + $0x68] sm:$0xff]   ;;  %v5944_v1 = vld [vmem:[#allocation14 + $0x60] sm:$0xff]  }
0x1094   :  { %v1998_v6 = vmul.f32 %v4546_v63, %v1993_v2  ;;  %v5943_v63 = vld [vmem:[#allocation14 + $0x28] sm:$0xff]   ;;  %v5945_v2 = vld [vmem:[#allocation14 + $0x20] sm:$0xff]  }
0x1096   :  { %v2003_v7 = vadd.f32 %v4547_v3, %v1998_v6  ;;  %v5946_v3 = vld [vmem:[#allocation14 + $0x58] sm:$0xff]  }
0x1097   :  { %v5947_v6 = vld [vmem:[#allocation14 + $0x18] sm:$0xff]  }
0x1098   :  { %v2005_v8 = vmul.f32 %v2003_v7, %v2003_v7  ;;  %v2004_v16 = vmul.f32 0.5, %v2003_v7 }
0x109a   :  { %v2006_v9 = vmul.f32 %v2005_v8, %v2003_v7  ;;  %v5949_v8 = vld [vmem:[#allocation14 + $0x10] sm:$0xff]  }
0x109c   :  { %v2007_v10 = vmul.f32 0.044715, %v2006_v9 }
0x109e   :  { %v2008_v11 = vadd.f32 %v2007_v10, %v2003_v7  ;;  %v5948_v7 = vld [vmem:[#allocation14 + $0x50] sm:$0xff]  }
0x10a0   :  { %v2009_v13 = vmul.f32 0.7978846, %v2008_v11  ;;  %v4557_v11 = vld [vmem:[#allocation8 + $0x7] ss:$0 sm:$0xff] }
0x10a2   :  { %6108 = vtanh.f32 %v2009_v13 }
0x10af   :  { %v6109_v14 = vpop.eup %6108 }
0x10b0   :  { %v2011_v22 = vadd.f32 1.0, %v6109_v14 }
0x10b2   :  { %v2012_v18 = vmul.f32 %v2011_v22, %v2004_v16  ;;  %v4558_v16 = vld [vmem:[#allocation10 + $0x7] ss:$0 sm:$0xff] }
0x10b4   :  { %v7307_v23 = vadd.f32 %v2012_v18, %v7242_v30 }
0x10b6   :  { %v2031_v24 = vpack.c.bf16 %v7307_v23, %v7307_v23 }
0x10b8   :  { %5597 = vmatmul.mubr.bf16.vlgmr.msra.gmra.mxu1 %v2031_v24 }
0x10b9   :  { %5621 = vmatpush3.bf16.msra.mxu1 %v7246_v31  ;;  %5636 = vmatprep.mubr.msk.bf16.mxu1 %vm6605_vm0, %v6604_v0 }
0x10ba   :  { %5622 = vmatprep.subr.bf16.mxu1 %v6604_v0 }
0x10bd   :  { %5623 = vmatpush3.bf16.msra.mxu1 %v7252_v32 }
0x10be   :  { %5624 = vmatprep.subr.bf16.mxu1 %v6604_v0 }
0x10c1   :  { %5625 = vmatpush3.bf16.msra.mxu1 %v7282_v40 }
0x10c2   :  { %5626 = vmatprep.subr.bf16.mxu1 %v6604_v0 }
0x10c5   :  { %5627 = vmatpush3.bf16.msra.mxu1 %v7286_v41 }
0x10c6   :  { %5628 = vmatprep.subr.bf16.mxu1 %v6604_v0 }
0x10c9   :  { %5629 = vmatpush3.bf16.msra.mxu1 %v6156_v25 }
0x10ca   :  { %5630 = vmatprep.subr.bf16.mxu1 %v6604_v0 }
0x10cd   :  { %5631 = vmatpush3.bf16.msra.mxu1 %v6157_v12 }
0x10ce   :  { %5632 = vmatprep.subr.bf16.mxu1 %v6604_v0 }
0x10d1   :  { %5633 = vmatpush3.bf16.msra.mxu1 %v6158_v26 }
0x10d2   :  { %5634 = vmatprep.subr.bf16.mxu1 %v6604_v0 }
0x10d5   :  { %5635 = vmatpush3.bf16.msra.mxu1 %v7144_v45 }
0x10d6   :  { %4934 = vmatprep.subr.bf16.mxu1 %v5938_v55  ;;  %v5974_v55 = vld [vmem:[#allocation17 + $0x14] ss:$8 sps:$4 sm:$0xff]  }
0x1178   :  { %v2119_v28 = vpop.f32.mrf.mxu1 }
0x1179   :  { %v7325_v15 = vadd.f32 %v4548_v27, %v2119_v28 }
0x117a   :  { %v5598_v29 = vpop.f32.mrf.mxu1 }
0x117b   :  { %v2127_v30 = vpack.c.bf16 %v7325_v15, %v7325_v15  ;;  %v2168_v17 = vmul.f32 %v7325_v15, %v7325_v15 }
0x117c   :  { %v2122_v31 = vpop.f32.mrf.mxu1 }
0x117d   :  { %v2169_v32 = vpack.c.bf16 %v2168_v17, %v2168_v17  ;;  %5617 = vmatmul.mubr.bf16.vlgmr.msra.gmra.mxu0 %v2127_v30 }
0x117e   :  { %v5599_v20 = vpop.f32.mrf.mxu1  ;;  %2387 = vmatprep.mubr.bf16.mxu0 %v6606_v19  ;;  %2356 = vmatpush1.bf16.msra.mxu0 %v5914_v44  ;;  %v2265_v44 = vlaneseq }
0x117f   :  { %5637 = vmatmul.mubr.bf16.vlgmr.msra.gmra.mxu1 %v2169_v32  ;;  %2357 = vmatprep.subr.bf16.mxu0 %v5919_v46  ;;  %v5950_v32 = vld [vmem:[#allocation14 + $0x48] sm:$0xff]  }
0x1180   :  { %4935 = vmatpush3.bf16.msra.mxu1 %v5939_v56  ;;  %v5951_v20 = vld [vmem:[#allocation14 + $0x8] sm:$0xff]   ;;  %v2266_v46 = vshrl.u32 %v2265_v44, 7  ;;  %v5972_v56 = vld [vmem:[#allocation17 + $0x10] ss:$8 sps:$4 sm:$0xff]  }
0x1181   :  { %4936 = vmatprep.subr.bf16.mxu1 %v5940_v57  ;;  %v5977_v57 = vld [vmem:[#allocation17 + $0x4] ss:$8 sps:$4 sm:$0xff]  }
0x1182   :  { %2358 = vmatpush1.bf16.msra.mxu0 %v5917_v47  ;;  %v7340_v47 = vsub.s32 0, %v2266_v46 }
0x1183   :  { %2359 = vmatprep.subr.bf16.mxu0 %v5922_v48  ;;  %v2263_v48 = vld [vmem:[#allocation13] sm:$0x3] }
0x1184   :  { %4937 = vmatpush3.bf16.msra.mxu1 %v5941_v61  ;;  %v5975_v61 = vld [vmem:[#allocation17] ss:$8 sps:$4 sm:$0xff]  }
0x1185   :  { %4938 = vmatprep.subr.bf16.mxu1 %v5942_v62  ;;  %v7346_v62 = vld [vmem:[#allocation28 + $0x78] sm:$0xff]  }
0x1186   :  { %2360 = vmatpush1.bf16.msra.mxu0 %v5920_v58  ;;  %v7342_v58 = vsub.s32 1, %v2266_v46 }
0x1187   :  { %2361 = vmatprep.subr.bf16.mxu0 %v5925_v5 }
0x1188   :  { %4939 = vmatpush3.bf16.msra.mxu1 %v5943_v63  ;;  %v2272_v5 = vrot.slane %v2263_v48, %v7342_v58  ;;  %v7348_v63 = vld [vmem:[#allocation28 + $0x38] sm:$0xff]  }
0x1189   :  { %4940 = vmatprep.subr.bf16.mxu1 %v5944_v1  ;;  %v7350_v1 = vld [vmem:[#allocation28 + $0x70] sm:$0xff]  }
0x118a   :  { %2362 = vmatpush1.bf16.msra.mxu0 %v5923_v4  ;;  %v2268_v4 = vrot.slane %v2263_v48, %v7340_v47 }
0x118b   :  { %2363 = vmatprep.subr.bf16.mxu0 %v5928_v49 }
0x118c   :  { %4941 = vmatpush3.bf16.msra.mxu1 %v5945_v2  ;;  %v7355_v2 = vld [vmem:[#allocation28 + $0x30] sm:$0xff]  }
0x118d   :  { %4942 = vmatprep.subr.bf16.mxu1 %v5946_v3  ;;  %v7358_v3 = vld [vmem:[#allocation28 + $0x68] sm:$0xff]  }
0x118e   :  { %2364 = vmatpush1.bf16.msra.mxu0 %v5926_v59 }
0x118f   :  { %2365 = vmatprep.subr.bf16.mxu0 %v5931_v50 }
0x1190   :  { %4943 = vmatpush3.bf16.msra.mxu1 %v5947_v6  ;;  %v7361_v6 = vld [vmem:[#allocation28 + $0x28] sm:$0xff]  }
0x1191   :  { %4944 = vmatprep.subr.bf16.mxu1 %v5948_v7  ;;  %v7364_v7 = vld [vmem:[#allocation28 + $0x60] sm:$0xff]  }
0x1192   :  { %2366 = vmatpush1.bf16.msra.mxu0 %v5929_v60 }
0x1193   :  { %2367 = vmatprep.subr.bf16.mxu0 %v5934_v51 }
0x1194   :  { %4945 = vmatpush3.bf16.msra.mxu1 %v5949_v8  ;;  %v7367_v8 = vld [vmem:[#allocation28 + $0x20] sm:$0xff]  }
0x1195   :  { %4946 = vmatprep.subr.bf16.mxu1 %v5950_v32 }
0x1196   :  { %2368 = vmatpush1.bf16.msra.mxu0 %v5932_v52 }
0x1197   :  { %2369 = vmatprep.subr.bf16.mxu0 %v5937_v53 }
0x1198   :  { %4947 = vmatpush3.bf16.msra.mxu1 %v5951_v20 }
0x119a   :  { %2370 = vmatpush1.bf16.msra.mxu0 %v5935_v54 }
0x123d   :  { %v2162_v21 = vpop.f32.mrf.mxu0 }
0x123e   :  { %v2210_v45 = vmul.f32 %v2162_v21, %v2162_v21  ;;  %2214 = vperm.xlu0 %5828, %v2162_v21   ;;  %v5952_v21 = vld [vmem:[#allocation14 + $0x40] sm:$0xff]  }
0x123f   :  { %v5618_v33 = vpop.f32.mrf.mxu0  ;;  %v2204_v34 = vpop.f32.mrf.mxu1  ;;  %4948 = vmatprep.subr.bf16.mxu1 %v5952_v21 }
0x1240   :  { %v2211_v35 = vsub.f32 %v2204_v34, %v2210_v45  ;;  %v5953_v45 = vld [vmem:[#allocation14] sm:$0xff]   ;;  %v5954_v33 = vld [vmem:[#allocation17 + $0x70] ss:$8 sps:$4 sm:$0xff]  }
0x1241   :  { %v2165_v36 = vpop.f32.mrf.mxu0  ;;  %v5638_v37 = vpop.f32.mrf.mxu1  ;;  %4949 = vmatpush3.bf16.msra.mxu1 %v5953_v45  ;;  %v5956_v34 = vld [vmem:[#allocation17 + $0x74] ss:$8 sps:$4 sm:$0xff]  }
0x1242   :  { %v2218_v38 = vadd.f32 1e-05, %v2211_v35  ;;  %v5959_v35 = vld [vmem:[#allocation17 + $0x64] ss:$8 sps:$4 sm:$0xff]   ;;  %2684 = vmatprep.subr.bf16.mxu0 %v5956_v34  ;;  %v5962_v36 = vld [vmem:[#allocation17 + $0x54] ss:$8 sps:$4 sm:$0xff]   ;;  %4956 = vmatprep.subr.bf16.mxu1 %v7346_v62 }
0x1243   :  { %v5619_v39 = vpop.f32.mrf.mxu0  ;;  %v2207_v40 = vpop.f32.mrf.mxu1  ;;  %v5960_v37 = vld [vmem:[#allocation17 + $0x50] ss:$8 sps:$4 sm:$0xff]  }
0x1244   :  { %6110 = vrsqrt.f32 %v2218_v38  ;;  %v5965_v38 = vld [vmem:[#allocation17 + $0x44] ss:$8 sps:$4 sm:$0xff]   ;;  %v5963_v39 = vld [vmem:[#allocation17 + $0x40] ss:$8 sps:$4 sm:$0xff]   ;;  %v5968_v40 = vld [vmem:[#allocation17 + $0x34] ss:$8 sps:$4 sm:$0xff]  }
0x1245   :  { %v5639_v41 = vpop.f32.mrf.mxu1 }
0x1246   :  { %v5966_v41 = vld [vmem:[#allocation17 + $0x30] ss:$8 sps:$4 sm:$0xff]  }
0x1251   :  { %v6111_v42 = vpop.eup %6110 }
0x1252   :  { %2222 = vperm.xlu1 %5829, %v6111_v42   ;;  %v5971_v42 = vld [vmem:[#allocation17 + $0x24] ss:$8 sps:$4 sm:$0xff]  }
0x12b9   :  { %v2215_v9 = vpop.permute.xlu0 %2214 }
0x12ba   :  { %v2217_v10 = vsub.f32 %v7325_v15, %v2215_v9  ;;  %v7370_v9 = vld [vmem:[#allocation28 + $0x58] sm:$0xff]  }
0x12cd   :  { %v2223_v13 = vpop.permute.xlu1 %2222 }
0x12ce   :  { %v2225_v14 = vmul.f32 %v2223_v13, %v2217_v10  ;;  %v7373_v10 = vld [vmem:[#allocation28 + $0x18] sm:$0xff]   ;;  %v7379_v13 = vld [vmem:[#allocation28 + $0x10] sm:$0xff]  }
0x12d0   :  { %v2230_v22 = vmul.f32 %v4557_v11, %v2225_v14  ;;  %v7376_v11 = vld [vmem:[#allocation28 + $0x50] sm:$0xff]  }
0x12d2   :  { %v2235_v18 = vadd.f32 %v4558_v16, %v2230_v22 }
0x12d4   :  { %v2237_v24 = vmul.f32 %v2235_v18, %v2235_v18  ;;  %v2236_v29 = vmul.f32 0.5, %v2235_v18 }
0x12d6   :  { %v2238_v25 = vmul.f32 %v2237_v24, %v2235_v18 }
0x12d8   :  { %v2239_v12 = vmul.f32 0.044715, %v2238_v25 }
0x12da   :  { %v2240_v26 = vadd.f32 %v2239_v12, %v2235_v18  ;;  %v4591_v18 = vld [vmem:[#allocation16] ss:$0 sm:$0xff] }
0x12dc   :  { %v2241_v27 = vmul.f32 0.7978846, %v2240_v26 }
0x12de   :  { %6112 = vtanh.f32 %v2241_v27 }
0x12eb   :  { %v6113_v28 = vpop.eup %6112 }
0x12ec   :  { %v2243_v30 = vadd.f32 1.0, %v6113_v28  ;;  %v7395_v28 = vld [vmem:[#allocation28 + $0x48] sm:$0xff]  }
0x12ee   :  { %v2244_v17 = vmul.f32 %v2243_v30, %v2236_v29  ;;  %v7397_v29 = vld [vmem:[#allocation28 + $0x8] sm:$0xff]   ;;  %v7403_v30 = vld [vmem:[#allocation28 + $0x40] sm:$0xff]  }
0x12f0   :  { %v7334_v31 = vadd.f32 %v2244_v17, %v7307_v23  ;;  %v5957_v23 = vld [vmem:[#allocation17 + $0x60] ss:$8 sps:$4 sm:$0xff]  }
0x12f1   :  { %v7405_v17 = vld [vmem:[#allocation28] sm:$0xff]  }
0x12f2   :  { %v2262_v15 = vpack.c.bf16 %v7334_v31, %v7334_v31 }
0x12f4   :  { %2388 = vmatmul.mubr.bf16.vlgmr.msra.gmra.mxu0 %v2262_v15 }
0x12f5   :  { %2716 = vmatprep.mubr.bf16.mxu0 %v6606_v19  ;;  %2685 = vmatpush1.bf16.msra.mxu0 %v5954_v33 }
0x12f6   :  { %2686 = vmatprep.subr.bf16.mxu0 %v5959_v35 }
0x12f9   :  { %2687 = vmatpush1.bf16.msra.mxu0 %v5957_v23 }
0x12fa   :  { %2688 = vmatprep.subr.bf16.mxu0 %v5962_v36 }
0x12fd   :  { %2689 = vmatpush1.bf16.msra.mxu0 %v5960_v37 }
0x12fe   :  { %2690 = vmatprep.subr.bf16.mxu0 %v5965_v38 }
0x1301   :  { %2691 = vmatpush1.bf16.msra.mxu0 %v5963_v39 }
0x1302   :  { %2692 = vmatprep.subr.bf16.mxu0 %v5968_v40 }
0x1305   :  { %2693 = vmatpush1.bf16.msra.mxu0 %v5966_v41  ;;  %v6607_v41 = vmov 1  }
0x1306   :  { %2694 = vmatprep.subr.bf16.mxu0 %v5971_v42  ;;  %5830 = vset.pattern.permute.xlu0 %v6607_v41 }
0x1309   :  { %2695 = vmatpush1.bf16.msra.mxu0 %v5969_v43 }
0x130a   :  { %2696 = vmatprep.subr.bf16.mxu0 %v5974_v55  ;;  %v5998_v55 = vld [vmem:[#allocation19 + $0x68] sm:$0xff]  }
0x130d   :  { %2697 = vmatpush1.bf16.msra.mxu0 %v5972_v56  ;;  %v5999_v56 = vld [vmem:[#allocation19 + $0x28] sm:$0xff]  }
0x130e   :  { %2698 = vmatprep.subr.bf16.mxu0 %v5977_v57  ;;  %v6000_v57 = vld [vmem:[#allocation19 + $0x60] sm:$0xff]  }
0x1311   :  { %2699 = vmatpush1.bf16.msra.mxu0 %v5975_v61  ;;  %v6001_v61 = vld [vmem:[#allocation19 + $0x20] sm:$0xff]  }
0x1312   :  { %4978 = vmatprep.subr.bf16.mxu0 %v7346_v62 }
0x13b4   :  { %v2389_v49 = vpop.f32.mrf.mxu0 }
0x13b5   :  { %v2390_v59 = vadd.f32 %v2389_v49, %v2268_v4 }
0x13b6   :  { %v2391_v50 = vpop.f32.mrf.mxu0 }
0x13b7   :  { %v2392_v60 = vadd.f32 %v2391_v50, %v2272_v5  ;;  %v2428_v53 = vpack.c.bf16 %v2390_v59, %v2390_v59 }
0x13b8   :  { %v2393_v51 = vpop.f32.mrf.mxu0 }
0x13b9   :  { %v2429_v52 = vpack.c.bf16 %v2392_v60, %v2392_v60  ;;  %v5994_v51 = vld [vmem:[#allocation19 + $0x78] sm:$0xff]  }
0x13ba   :  { %v2394_v54 = vpop.f32.mrf.mxu0 }
0x13bb   :  { %2558 = vmatprep.mubr.bf16.mxu1 %v2429_v52  ;;  %v5995_v52 = vld [vmem:[#allocation19 + $0x38] sm:$0xff]   ;;  %v5997_v54 = vld [vmem:[#allocation19 + $0x30] sm:$0xff]  }
0x13bc   :  { %2559 = vmatmul.mubr.bf16.vlgmr.msra.gmra.mxu1 %v2428_v53  ;;  %v5996_v53 = vld [vmem:[#allocation19 + $0x70] sm:$0xff]  }
0x13bd   :  { %4957 = vmatpush3.bf16.msra.mxu1 %v7348_v63 }
0x13be   :  { %4958 = vmatprep.subr.bf16.mxu1 %v7350_v1 }
0x13c1   :  { %4959 = vmatpush3.bf16.msra.mxu1 %v7355_v2 }
0x13c2   :  { %4960 = vmatprep.subr.bf16.mxu1 %v7358_v3 }
0x13c5   :  { %4961 = vmatpush3.bf16.msra.mxu1 %v7361_v6 }
0x13c6   :  { %4962 = vmatprep.subr.bf16.mxu1 %v7364_v7 }
0x13c9   :  { %4963 = vmatpush3.bf16.msra.mxu1 %v7367_v8 }
0x13ca   :  { %4964 = vmatprep.subr.bf16.mxu1 %v7370_v9 }
0x13cd   :  { %4965 = vmatpush3.bf16.msra.mxu1 %v7373_v10 }
0x13ce   :  { %4966 = vmatprep.subr.bf16.mxu1 %v7376_v11 }
0x13d1   :  { %4967 = vmatpush3.bf16.msra.mxu1 %v7379_v13 }
0x13d2   :  { %4968 = vmatprep.subr.bf16.mxu1 %v7395_v28 }
0x13d5   :  { %4969 = vmatpush3.bf16.msra.mxu1 %v7397_v29 }
0x13d6   :  { %4970 = vmatprep.subr.bf16.mxu1 %v7403_v30 }
0x13d9   :  { %4971 = vmatpush3.bf16.msra.mxu1 %v7405_v17 }
0x13da   :  { %5000 = vmatprep.subr.bf16.mxu1 %v5994_v51 }
0x147c   :  { %v4950_v14 = vpop.f32.mrf.mxu1 }
0x147e   :  { %v4951_v16 = vpop.f32.mrf.mxu1 }
0x147f   :  { %v4952_v22 = vadd.f32 %v4951_v16, %v4950_v14  ;;  %v6002_v14 = vld [vmem:[#allocation19 + $0x58] sm:$0xff]  }
0x1480   :  { %v4953_v24 = vpop.f32.mrf.mxu1  ;;  %v6003_v16 = vld [vmem:[#allocation19 + $0x18] sm:$0xff]  }
0x1481   :  { %v2566_v25 = vadd.f32 %v4952_v22, %v7334_v31  ;;  %v2592_v31 = vld [vmem:[%s7716_s10] ss:$4 sm:$0x3]  ;;  %v6004_v22 = vld [vmem:[#allocation19 + $0x50] sm:$0xff]   ;;  %v6006_v24 = vld [vmem:[#allocation19 + $0x48] sm:$0xff]  }
0x1482   :  { %v4954_v12 = vpop.f32.mrf.mxu1  ;;  %v2597_v15 = vrot.slane %v2592_v31, %v7340_v47  ;;  %v2601_v32 = vrot.slane %v2592_v31, %v7342_v58  ;;  %v7439_v31 = vld [vmem:[#allocation29 + $0x30] sm:$0xff]  }
0x1483   :  { %v2574_v26 = vadd.f32 %v4591_v18, %v2566_v25  ;;  %v6005_v18 = vld [vmem:[#allocation19 + $0x10] sm:$0xff]   ;;  %v6007_v25 = vld [vmem:[#allocation19 + $0x8] sm:$0xff]   ;;  %v6008_v12 = vld [vmem:[#allocation19 + $0x40] sm:$0xff]  }
0x1485   :  { %v2591_v27 = vpack.c.bf16 %v2574_v26, %v2574_v26  ;;  %v6009_v26 = vld [vmem:[#allocation19] sm:$0xff]  }
0x1487   :  { %2717 = vmatmul.mubr.bf16.vlgmr.msra.gmra.mxu0 %v2591_v27  ;;  %v7436_v27 = vld [vmem:[#allocation29 + $0x38] sm:$0xff]  }
0x1488   :  { %4979 = vmatpush3.bf16.msra.mxu0 %v7348_v63 }
0x1489   :  { %4980 = vmatprep.subr.bf16.mxu0 %v7350_v1 }
0x148c   :  { %4981 = vmatpush3.bf16.msra.mxu0 %v7355_v2 }
0x148d   :  { %4982 = vmatprep.subr.bf16.mxu0 %v7358_v3 }
0x1490   :  { %4983 = vmatpush3.bf16.msra.mxu0 %v7361_v6 }
0x1491   :  { %4984 = vmatprep.subr.bf16.mxu0 %v7364_v7 }
0x1494   :  { %4985 = vmatpush3.bf16.msra.mxu0 %v7367_v8 }
0x1495   :  { %4986 = vmatprep.subr.bf16.mxu0 %v7370_v9 }
0x1498   :  { %4987 = vmatpush3.bf16.msra.mxu0 %v7373_v10 }
0x1499   :  { %4988 = vmatprep.subr.bf16.mxu0 %v7376_v11 }
0x149c   :  { %4989 = vmatpush3.bf16.msra.mxu0 %v7379_v13 }
0x149d   :  { %4990 = vmatprep.subr.bf16.mxu0 %v7395_v28 }
0x14a0   :  { %4991 = vmatpush3.bf16.msra.mxu0 %v7397_v29 }
0x14a1   :  { %4992 = vmatprep.subr.bf16.mxu0 %v7403_v30 }
0x14a4   :  { %4993 = vmatpush3.bf16.msra.mxu0 %v7405_v17 }
0x14a5   :  { %5640 = vmatprep.subr.bf16.mxu0 %v6604_v0 }
0x1547   :  { %v2718_v20 = vpop.f32.mrf.mxu0 }
0x1548   :  { %v7417_v21 = vadd.f32 %v2718_v20, %v2597_v15  ;;  %v7443_v15 = vld [vmem:[#allocation29 + $0x28] sm:$0xff]   ;;  %v7451_v20 = vld [vmem:[#allocation29 + $0x18] sm:$0xff]  }
0x1549   :  { %v2720_v45 = vpop.f32.mrf.mxu0 }
0x154a   :  { %v7419_v33 = vadd.f32 %v2720_v45, %v2601_v32  ;;  %v2899_v34 = vmul.f32 %v7417_v21, %v7417_v21  ;;  %v2761_v37 = vpack.c.bf16 %v7417_v21, %v7417_v21  ;;  %v7447_v32 = vld [vmem:[#allocation29 + $0x20] sm:$0xff]   ;;  %v7455_v45 = vld [vmem:[#allocation29 + $0x10] sm:$0xff]  }
0x154b   :  { %v2722_v35 = vpop.f32.mrf.mxu0 }
0x154c   :  { %v2762_v23 = vpack.c.bf16 %v7419_v33, %v7419_v33  ;;  %v2900_v36 = vmul.f32 %v7419_v33, %v7419_v33  ;;  %v2901_v40 = vpack.c.bf16 %v2899_v34, %v2899_v34 }
0x154d   :  { %v2723_v38 = vpop.f32.mrf.mxu0 }
0x154e   :  { %2891 = vmatprep.mubr.bf16.mxu1 %v2762_v23  ;;  %v2902_v39 = vpack.c.bf16 %v2900_v36, %v2900_v36 }
0x154f   :  { %2892 = vmatmul.mubr.bf16.vlgmr.msra.gmra.mxu1 %v2761_v37 }
0x1550   :  { %2935 = vmatprep.mubr.bf16.mxu0 %v2902_v39  ;;  %5001 = vmatpush3.bf16.msra.mxu1 %v5995_v52 }
0x1551   :  { %2936 = vmatmul.mubr.bf16.vlgmr.msra.gmra.mxu0 %v2901_v40  ;;  %5002 = vmatprep.subr.bf16.mxu1 %v5996_v53 }
0x1552   :  { %5656 = vmatprep.mubr.msk.bf16.mxu0 %vm6605_vm0, %v6604_v0  ;;  %5641 = vmatpush3.bf16.msra.mxu0 %v7436_v27 }
0x1553   :  { %5642 = vmatprep.subr.bf16.mxu0 %v6604_v0 }
0x1554   :  { %5003 = vmatpush3.bf16.msra.mxu1 %v5997_v54 }
0x1555   :  { %5004 = vmatprep.subr.bf16.mxu1 %v5998_v55 }
0x1556   :  { %5643 = vmatpush3.bf16.msra.mxu0 %v7439_v31 }
0x1557   :  { %5644 = vmatprep.subr.bf16.mxu0 %v6604_v0 }
0x1558   :  { %5005 = vmatpush3.bf16.msra.mxu1 %v5999_v56 }
0x1559   :  { %5006 = vmatprep.subr.bf16.mxu1 %v6000_v57 }
0x155a   :  { %5645 = vmatpush3.bf16.msra.mxu0 %v7443_v15 }
0x155b   :  { %5646 = vmatprep.subr.bf16.mxu0 %v6604_v0 }
0x155c   :  { %5007 = vmatpush3.bf16.msra.mxu1 %v6001_v61 }
0x155d   :  { %5008 = vmatprep.subr.bf16.mxu1 %v6002_v14 }
0x155e   :  { %5647 = vmatpush3.bf16.msra.mxu0 %v7447_v32 }
0x155f   :  { %5648 = vmatprep.subr.bf16.mxu0 %v6604_v0 }
0x1560   :  { %5009 = vmatpush3.bf16.msra.mxu1 %v6003_v16 }
0x1561   :  { %5010 = vmatprep.subr.bf16.mxu1 %v6004_v22 }
0x1562   :  { %5649 = vmatpush3.bf16.msra.mxu0 %v7451_v20 }
0x1563   :  { %5650 = vmatprep.subr.bf16.mxu0 %v6604_v0 }
0x1564   :  { %5011 = vmatpush3.bf16.msra.mxu1 %v6005_v18 }
0x1565   :  { %5012 = vmatprep.subr.bf16.mxu1 %v6006_v24 }
0x1566   :  { %5651 = vmatpush3.bf16.msra.mxu0 %v7455_v45 }
0x1567   :  { %5652 = vmatprep.subr.bf16.mxu0 %v6604_v0 }
0x1568   :  { %5013 = vmatpush3.bf16.msra.mxu1 %v6007_v25 }
0x1569   :  { %5014 = vmatprep.subr.bf16.mxu1 %v6008_v12 }
0x156c   :  { %5015 = vmatpush3.bf16.msra.mxu1 %v6009_v26 }
0x156d   :  { %5660 = vmatprep.subr.bf16.mxu1 %v6604_v0 }
0x160f   :  { %v4972_v42 = vpop.f32.mrf.mxu1 }
0x1611   :  { %v4973_v43 = vpop.f32.mrf.mxu1  ;;  %v4994_v46 = vpop.f32.mrf.mxu0 }
0x1612   :  { %v4974_v48 = vadd.f32 %v4973_v43, %v4972_v42 }
0x1613   :  { %v4975_v4 = vpop.f32.mrf.mxu1  ;;  %v4995_v5 = vpop.f32.mrf.mxu0 }
0x1614   :  { %2950 = vperm.xlu1 %5829, %v4974_v48   ;;  %2954 = vperm.xlu0 %5830, %v4974_v48   ;;  %v4996_v50 = vadd.f32 %v4995_v5, %v4994_v46  ;;  %v4608_v46 = vld [vmem:[%s7716_s10 + $0x1] ss:$4 sm:$0x3]  ;;  %v4609_v48 = vld [vmem:[%s7716_s10 + $0x2] ss:$4 sm:$0x3] }
0x1615   :  { %v4976_v49 = vpop.f32.mrf.mxu1  ;;  %v4997_v59 = vpop.f32.mrf.mxu0  ;;  %v2990_v5 = vrot.slane %v4608_v46, %v7342_v58  ;;  %v3003_v52 = vrot.slane %v4609_v48, %v7342_v58  ;;  %v2999_v54 = vrot.slane %v4609_v48, %v7340_v47  ;;  %v7492_v48 = vld [vmem:[#allocation29] sm:$0xff]  }
0x1617   :  { %v4998_v60 = vpop.f32.mrf.mxu0 }
0x1618   :  { %5831 = vset.pattern.permute.xlu1 %v6607_v41  ;;  %5832 = vset.pattern.permute.xlu0 %v6606_v19 }
0x1619   :  { %2965 = vperm.xlu1 %5831, %v4996_v50   ;;  %2961 = vperm.xlu0 %5832, %v4996_v50   ;;  %v2986_v50 = vrot.slane %v4608_v46, %v7340_v47  ;;  %v7486_v46 = vld [vmem:[#allocation29 + $0x8] sm:$0xff]  }
0x161a   :  { %5653 = vmatpush3.bf16.msra.mxu0 %v7486_v46 }
0x161b   :  { %5654 = vmatprep.subr.bf16.mxu0 %v6604_v0 }
0x161d   :  { %5833 = vset.pattern.permute.xlu1 %v6606_v19 }
0x161e   :  { %5655 = vmatpush3.bf16.msra.mxu0 %v7492_v48 }
0x168f   :  { %v2951_v34 = vpop.permute.xlu1 %2950  ;;  %v2955_v35 = vpop.permute.xlu0 %2954 }
0x1690   :  { %v2970_v23 = vmul.f32 %v2951_v34, %v2951_v34  ;;  %v2971_v36 = vmul.f32 %v2955_v35, %v2955_v35  ;;  %v2975_v4 = vsub.f32 %v7419_v33, %v2955_v35  ;;  %v2974_v59 = vsub.f32 %v7417_v21, %v2951_v34 }
0x1694   :  { %v2966_v37 = vpop.permute.xlu1 %2965  ;;  %v2962_v38 = vpop.permute.xlu0 %2961 }
0x1695   :  { %v2973_v39 = vsub.f32 %v2966_v37, %v2971_v36  ;;  %v2972_v40 = vsub.f32 %v2962_v38, %v2970_v23 }
0x1697   :  { %v2977_v42 = vadd.f32 1e-05, %v2973_v39  ;;  %v2976_v43 = vadd.f32 1e-05, %v2972_v40 }
0x1699   :  { %6114 = vrsqrt.f32 %v2977_v42 }
0x169a   :  { %6116 = vrsqrt.f32 %v2976_v43 }
0x16a6   :  { %v6115_v49 = vpop.eup %6114 }
0x16a7   :  { %v6117_v60 = vpop.eup %6116  ;;  %v2981_v51 = vmul.f32 %v6115_v49, %v2975_v4 }
0x16a8   :  { %v2980_v53 = vmul.f32 %v6117_v60, %v2974_v59 }
0x16a9   :  { %v2994_v55 = vmul.f32 %v2990_v5, %v2981_v51  ;;  %v4626_v5 = vld [vmem:[%s7718_s12] ss:$0 sm:$0xff] }
0x16aa   :  { %v2993_v56 = vmul.f32 %v2986_v50, %v2980_v53 }
0x16ab   :  { %v3007_v57 = vadd.f32 %v3003_v52, %v2994_v55 }
0x16ac   :  { %v3006_v61 = vadd.f32 %v2999_v54, %v2993_v56 }
0x16ad   :  { %v3011_v14 = vmul.f32 %v3007_v57, %v3007_v57  ;;  %v3009_v23 = vmul.f32 0.5, %v3007_v57 }
0x16ae   :  { %v3010_v33 = vmul.f32 %v3006_v61, %v3006_v61  ;;  %v3008_v37 = vmul.f32 0.5, %v3006_v61 }
0x16af   :  { %v3013_v16 = vmul.f32 %v3011_v14, %v3007_v57 }
0x16b0   :  { %v3012_v22 = vmul.f32 %v3010_v33, %v3006_v61 }
0x16b1   :  { %v3015_v18 = vmul.f32 0.044715, %v3013_v16 }
0x16b2   :  { %v3014_v24 = vmul.f32 0.044715, %v3012_v22 }
0x16b3   :  { %v3017_v21 = vadd.f32 %v3015_v18, %v3007_v57  ;;  %v6018_v18 = vld [vmem:[#allocation20 + $0x70] ss:$8 sps:$4 sm:$0xff]  }
0x16b4   :  { %v3016_v25 = vadd.f32 %v3014_v24, %v3006_v61  ;;  %v6020_v24 = vld [vmem:[#allocation20 + $0x74] ss:$8 sps:$4 sm:$0xff]  }
0x16b5   :  { %v3019_v12 = vmul.f32 0.7978846, %v3017_v21  ;;  %v6023_v21 = vld [vmem:[#allocation20 + $0x64] ss:$8 sps:$4 sm:$0xff]   ;;  %3505 = vmatprep.subr.bf16.mxu0 %v6020_v24 }
0x16b6   :  { %v3018_v26 = vmul.f32 0.7978846, %v3016_v25  ;;  %v6021_v25 = vld [vmem:[#allocation20 + $0x60] ss:$8 sps:$4 sm:$0xff]  }
0x16b7   :  { %6118 = vtanh.f32 %v3019_v12  ;;  %v6026_v12 = vld [vmem:[#allocation20 + $0x54] ss:$8 sps:$4 sm:$0xff]  }
0x16b8   :  { %6120 = vtanh.f32 %v3018_v26  ;;  %v6024_v26 = vld [vmem:[#allocation20 + $0x50] ss:$8 sps:$4 sm:$0xff]  }
0x16c4   :  { %v6119_v34 = vpop.eup %6118 }
0x16c5   :  { %v6121_v35 = vpop.eup %6120  ;;  %v3023_v36 = vadd.f32 1.0, %v6119_v34  ;;  %v6029_v34 = vld [vmem:[#allocation20 + $0x44] ss:$8 sps:$4 sm:$0xff]  }
0x16c6   :  { %v3022_v38 = vadd.f32 1.0, %v6121_v35  ;;  %v6027_v35 = vld [vmem:[#allocation20 + $0x40] ss:$8 sps:$4 sm:$0xff]  }
0x16c7   :  { %v3025_v39 = vmul.f32 %v3023_v36, %v3009_v23  ;;  %v6032_v23 = vld [vmem:[#allocation20 + $0x34] ss:$8 sps:$4 sm:$0xff]   ;;  %v6030_v36 = vld [vmem:[#allocation20 + $0x30] ss:$8 sps:$4 sm:$0xff]  }
0x16c8   :  { %v3024_v40 = vmul.f32 %v3022_v38, %v3008_v37  ;;  %v6035_v37 = vld [vmem:[#allocation20 + $0x24] ss:$8 sps:$4 sm:$0xff]   ;;  %v6033_v38 = vld [vmem:[#allocation20 + $0x20] ss:$8 sps:$4 sm:$0xff]  }
0x16c9   :  { %v3059_v42 = vpack.c.bf16 %v3025_v39, %v3025_v39  ;;  %v6038_v39 = vld [vmem:[#allocation20 + $0x14] ss:$8 sps:$4 sm:$0xff]  }
0x16ca   :  { %v3058_v43 = vpack.c.bf16 %v3024_v40, %v3024_v40  ;;  %v6036_v40 = vld [vmem:[#allocation20 + $0x10] ss:$8 sps:$4 sm:$0xff]  }
0x16cb   :  { %3193 = vmatprep.mubr.bf16.mxu1 %v3059_v42  ;;  %v6041_v42 = vld [vmem:[#allocation20 + $0x4] ss:$8 sps:$4 sm:$0xff]  }
0x16cc   :  { %3194 = vmatmul.mubr.bf16.vlgmr.msra.gmra.mxu1 %v3058_v43  ;;  %v6039_v43 = vld [vmem:[#allocation20] ss:$8 sps:$4 sm:$0xff]  }
0x16cd   :  { %5661 = vmatpush3.bf16.msra.mxu1 %v7436_v27  ;;  %5676 = vmatprep.mubr.msk.bf16.mxu1 %vm6605_vm0, %v6604_v0 }
0x16ce   :  { %5662 = vmatprep.subr.bf16.mxu1 %v6604_v0 }
0x16d1   :  { %5663 = vmatpush3.bf16.msra.mxu1 %v7439_v31 }
0x16d2   :  { %5664 = vmatprep.subr.bf16.mxu1 %v6604_v0 }
0x16d5   :  { %5665 = vmatpush3.bf16.msra.mxu1 %v7443_v15 }
0x16d6   :  { %5666 = vmatprep.subr.bf16.mxu1 %v6604_v0 }
0x16d9   :  { %5667 = vmatpush3.bf16.msra.mxu1 %v7447_v32 }
0x16da   :  { %5668 = vmatprep.subr.bf16.mxu1 %v6604_v0 }
0x16dd   :  { %5669 = vmatpush3.bf16.msra.mxu1 %v7451_v20 }
0x16de   :  { %5670 = vmatprep.subr.bf16.mxu1 %v6604_v0 }
0x16e1   :  { %5671 = vmatpush3.bf16.msra.mxu1 %v7455_v45 }
0x16e2   :  { %5672 = vmatprep.subr.bf16.mxu1 %v6604_v0 }
0x16e5   :  { %5673 = vmatpush3.bf16.msra.mxu1 %v7486_v46 }
0x16e6   :  { %5674 = vmatprep.subr.bf16.mxu1 %v6604_v0 }
0x16e9   :  { %5675 = vmatpush3.bf16.msra.mxu1 %v7492_v48 }
0x16ea   :  { %5040 = vmatprep.subr.bf16.mxu1 %v7346_v62 }
0x178c   :  { %v5016_v4 = vpop.f32.mrf.mxu1 }
0x178e   :  { %v5017_v49 = vpop.f32.mrf.mxu1 }
0x178f   :  { %v5018_v59 = vadd.f32 %v5017_v49, %v5016_v4  ;;  %v7527_v4 = vand.u32 127, %v2265_v44 }
0x1790   :  { %v5019_v50 = vpop.f32.mrf.mxu1 }
0x1791   :  { %v7500_v60 = vadd.f32 %v5018_v59, %v4626_v5  ;;  %vm3350_vm1 = vcmp.lt.s32.totalorder %v7527_v4, 64  ;;  %vm4435_vm2 = vcmp.lt.s32.totalorder %v7527_v4, 12 }
0x1792   :  { %v5020_v51 = vpop.f32.mrf.mxu1 }
0x1793   :  { %v3219_v52 = vpack.c.bf16 %v7500_v60, %v7500_v60  ;;  %v3308_v53 = vmul.f32 %v7500_v60, %v7500_v60 }
0x1795   :  { %5657 = vmatmul.mubr.bf16.vlgmr.msra.gmra.mxu0 %v3219_v52  ;;  %v3309_v54 = vpack.c.bf16 %v3308_v53, %v3308_v53 }
0x1796   :  { %3537 = vmatprep.mubr.bf16.mxu0 %v6606_v19  ;;  %3506 = vmatpush1.bf16.msra.mxu0 %v6018_v18 }
0x1797   :  { %5677 = vmatmul.mubr.bf16.vlgmr.msra.gmra.mxu1 %v3309_v54  ;;  %3507 = vmatprep.subr.bf16.mxu0 %v6023_v21 }
0x1798   :  { %5041 = vmatpush3.bf16.msra.mxu1 %v7348_v63 }
0x1799   :  { %5042 = vmatprep.subr.bf16.mxu1 %v7350_v1 }
0x179a   :  { %3508 = vmatpush1.bf16.msra.mxu0 %v6021_v25 }
0x179b   :  { %3509 = vmatprep.subr.bf16.mxu0 %v6026_v12 }
0x179c   :  { %5043 = vmatpush3.bf16.msra.mxu1 %v7355_v2 }
0x179d   :  { %5044 = vmatprep.subr.bf16.mxu1 %v7358_v3 }
0x179e   :  { %3510 = vmatpush1.bf16.msra.mxu0 %v6024_v26 }
0x179f   :  { %3511 = vmatprep.subr.bf16.mxu0 %v6029_v34 }
0x17a0   :  { %5045 = vmatpush3.bf16.msra.mxu1 %v7361_v6 }
0x17a1   :  { %5046 = vmatprep.subr.bf16.mxu1 %v7364_v7 }
0x17a2   :  { %3512 = vmatpush1.bf16.msra.mxu0 %v6027_v35 }
0x17a3   :  { %3513 = vmatprep.subr.bf16.mxu0 %v6032_v23 }
0x17a4   :  { %5047 = vmatpush3.bf16.msra.mxu1 %v7367_v8 }
0x17a5   :  { %5048 = vmatprep.subr.bf16.mxu1 %v7370_v9 }
0x17a6   :  { %3514 = vmatpush1.bf16.msra.mxu0 %v6030_v36 }
0x17a7   :  { %3515 = vmatprep.subr.bf16.mxu0 %v6035_v37 }
0x17a8   :  { %5049 = vmatpush3.bf16.msra.mxu1 %v7373_v10 }
0x17a9   :  { %5050 = vmatprep.subr.bf16.mxu1 %v7376_v11 }
0x17aa   :  { %3516 = vmatpush1.bf16.msra.mxu0 %v6033_v38 }
0x17ab   :  { %3517 = vmatprep.subr.bf16.mxu0 %v6038_v39 }
0x17ac   :  { %5051 = vmatpush3.bf16.msra.mxu1 %v7379_v13 }
0x17ad   :  { %5052 = vmatprep.subr.bf16.mxu1 %v7395_v28 }
0x17ae   :  { %3518 = vmatpush1.bf16.msra.mxu0 %v6036_v40 }
0x17af   :  { %3519 = vmatprep.subr.bf16.mxu0 %v6041_v42 }
0x17b0   :  { %5053 = vmatpush3.bf16.msra.mxu1 %v7397_v29 }
0x17b1   :  { %5054 = vmatprep.subr.bf16.mxu1 %v7403_v30 }
0x17b2   :  { %3520 = vmatpush1.bf16.msra.mxu0 %v6039_v43 }
0x17b3   :  { %5062 = vmatprep.subr.bf16.mxu0 %v7346_v62 }
0x17b4   :  { %5055 = vmatpush3.bf16.msra.mxu1 %v7405_v17 }
0x1855   :  { %v3302_v55 = vpop.f32.mrf.mxu0 }
0x1856   :  { %3353 = vperm.xlu1 %5833, %v3302_v55  }
0x1857   :  { %v5658_v56 = vpop.f32.mrf.mxu0  ;;  %v3344_v57 = vpop.f32.mrf.mxu1 }
0x1858   :  { %3363 = vperm.xlu0 %5832, %v3344_v57   ;;  %v4651_v56 = vld [vmem:[%s7718_s12 + $0x1] ss:$0 sm:$0xff] }
0x1859   :  { %v3305_v61 = vpop.f32.mrf.mxu0  ;;  %v5678_v14 = vpop.f32.mrf.mxu1 }
0x185a   :  { %5834 = vset.pattern.permute.xlu1 %v6607_v41  ;;  %v4652_v61 = vld [vmem:[%s7718_s12 + $0x2] ss:$0 sm:$0xff] }
0x185b   :  { %v3347_v33 = vpop.f32.mrf.mxu1  ;;  %3357 = vperm.xlu1 %5834, %v3302_v55   ;;  %v5659_v16 = vpop.f32.mrf.mxu0 }
0x185c   :  { %5835 = vset.pattern.permute.xlu0 %v6607_v41 }
0x185d   :  { %v5679_v22 = vpop.f32.mrf.mxu1 }
0x185f   :  { %3367 = vperm.xlu1 %5834, %v3344_v57  }
0x1863   :  { %5836 = vset.pattern.permute.xlu1 %v6606_v19 }
0x18d1   :  { %v3354_v5 = vpop.permute.xlu1 %3353 }
0x18d3   :  { %v3364_v50 = vpop.permute.xlu0 %3363 }
0x18d6   :  { %v3358_v49 = vpop.permute.xlu1 %3357 }
0x18d7   :  { %v3360_v59 = vsel %vm3350_vm1, %v3354_v5, %v3358_v49  ;;  %v6042_v49 = vld [vmem:[#allocation22 + $0x78] sm:$0xff]  }
0x18d8   :  { %v3371_v51 = vmul.f32 %v3360_v59, %v3360_v59  ;;  %v3373_v62 = vsub.f32 %v7500_v60, %v3360_v59  ;;  %v6043_v59 = vld [vmem:[#allocation22 + $0x38] sm:$0xff]   ;;  %5084 = vmatprep.subr.bf16.mxu1 %v6042_v49 }
0x18da   :  { %v3368_v52 = vpop.permute.xlu1 %3367 }
0x18db   :  { %v3370_v53 = vsel %vm3350_vm1, %v3364_v50, %v3368_v52  ;;  %v6044_v50 = vld [vmem:[#allocation22 + $0x70] sm:$0xff]   ;;  %v6046_v52 = vld [vmem:[#allocation22 + $0x68] sm:$0xff]  }
0x18dc   :  { %v3372_v54 = vsub.f32 %v3370_v53, %v3371_v51  ;;  %v6045_v51 = vld [vmem:[#allocation22 + $0x30] sm:$0xff]   ;;  %v6047_v53 = vld [vmem:[#allocation22 + $0x28] sm:$0xff]  }
0x18de   :  { %v3374_v55 = vadd.f32 1e-05, %v3372_v54  ;;  %v6048_v54 = vld [vmem:[#allocation22 + $0x60] sm:$0xff]  }
0x18e0   :  { %6122 = vrsqrt.f32 %v3374_v55  ;;  %v6049_v55 = vld [vmem:[#allocation22 + $0x20] sm:$0xff]  }
0x18ed   :  { %v6123_v44 = vpop.eup %6122 }
0x18ee   :  { %v3376_v57 = vmul.f32 %v6123_v44, %v3373_v62  ;;  %v6050_v62 = vld [vmem:[#allocation22 + $0x58] sm:$0xff]  }
0x18ef   :  { %v6051_v44 = vld [vmem:[#allocation22 + $0x18] sm:$0xff]  }
0x18f0   :  { %v3381_v14 = vmul.f32 %v4651_v56, %v3376_v57  ;;  %v6053_v56 = vld [vmem:[#allocation22 + $0x10] sm:$0xff]   ;;  %v6054_v57 = vld [vmem:[#allocation22 + $0x48] sm:$0xff]  }
0x18f2   :  { %v3386_v33 = vadd.f32 %v4652_v61, %v3381_v14  ;;  %v6055_v61 = vld [vmem:[#allocation22 + $0x8] sm:$0xff]   ;;  %v6056_v14 = vld [vmem:[#allocation22 + $0x40] sm:$0xff]  }
0x18f4   :  { %v3388_v16 = vmul.f32 %v3386_v33, %v3386_v33  ;;  %v3387_v60 = vmul.f32 0.5, %v3386_v33 }
0x18f6   :  { %v3389_v22 = vmul.f32 %v3388_v16, %v3386_v33 }
0x18f8   :  { %v3390_v18 = vmul.f32 0.044715, %v3389_v22 }
0x18fa   :  { %v3391_v24 = vadd.f32 %v3390_v18, %v3386_v33  ;;  %v6057_v33 = vld [vmem:[#allocation22] sm:$0xff]  }
0x18fc   :  { %v3392_v21 = vmul.f32 0.7978846, %v3391_v24 }
0x18fe   :  { %6124 = vtanh.f32 %v3392_v21 }
0x190b   :  { %v6125_v25 = vpop.eup %6124 }
0x190c   :  { %v3394_v12 = vadd.f32 1.0, %v6125_v25 }
0x190e   :  { %v3395_v26 = vmul.f32 %v3394_v12, %v3387_v60 }
0x1910   :  { %v3412_v34 = vpack.c.bf16 %v3395_v26, %v3395_v26 }
0x1912   :  { %3538 = vmatmul.mubr.bf16.vlgmr.msra.gmra.mxu0 %v3412_v34 }
0x1913   :  { %5063 = vmatpush3.bf16.msra.mxu0 %v7348_v63  ;;  %v3413_v63 = vld [vmem:[%s7720_s14] ss:$4 sm:$0x3] }
0x1914   :  { %5064 = vmatprep.subr.bf16.mxu0 %v7350_v1  ;;  %v3418_v1 = vrot.slane %v3413_v63, %v7340_v47 }
0x1917   :  { %5065 = vmatpush3.bf16.msra.mxu0 %v7355_v2  ;;  %v3422_v2 = vrot.slane %v3413_v63, %v7342_v58  ;;  %v4669_v63 = vld [vmem:[%s7720_s14 + $0x1] ss:$4 sm:$0x3] }
0x1918   :  { %5066 = vmatprep.subr.bf16.mxu0 %v7358_v3 }
0x191b   :  { %5067 = vmatpush3.bf16.msra.mxu0 %v7361_v6 }
0x191c   :  { %5068 = vmatprep.subr.bf16.mxu0 %v7364_v7 }
0x191f   :  { %5069 = vmatpush3.bf16.msra.mxu0 %v7367_v8 }
0x1920   :  { %5070 = vmatprep.subr.bf16.mxu0 %v7370_v9 }
0x1923   :  { %5071 = vmatpush3.bf16.msra.mxu0 %v7373_v10 }
0x1924   :  { %5072 = vmatprep.subr.bf16.mxu0 %v7376_v11 }
0x1927   :  { %5073 = vmatpush3.bf16.msra.mxu0 %v7379_v13 }
0x1928   :  { %5074 = vmatprep.subr.bf16.mxu0 %v7395_v28 }
0x192b   :  { %5075 = vmatpush3.bf16.msra.mxu0 %v7397_v29 }
0x192c   :  { %5076 = vmatprep.subr.bf16.mxu0 %v7403_v30 }
0x192f   :  { %5077 = vmatpush3.bf16.msra.mxu0 %v7405_v17 }
0x1930   :  { %5680 = vmatprep.subr.bf16.mxu0 %v6604_v0 }
0x19d2   :  { %v3539_v3 = vpop.f32.mrf.mxu0 }
0x19d3   :  { %v7562_v6 = vadd.f32 %v3539_v3, %v3418_v1  ;;  %v4670_v1 = vld [vmem:[%s7720_s14 + $0x2] ss:$4 sm:$0x3]  ;;  %v3678_v3 = vrot.slane %v4669_v63, %v7342_v58 }
0x19d4   :  { %v3541_v7 = vpop.f32.mrf.mxu0 }
0x19d5   :  { %v7564_v8 = vadd.f32 %v3541_v7, %v3422_v2  ;;  %v3592_v9 = vmul.f32 %v7562_v6, %v7562_v6  ;;  %v3550_v28 = vpack.c.bf16 %v7562_v6, %v7562_v6 }
0x19d6   :  { %v3543_v10 = vpop.f32.mrf.mxu0 }
0x19d7   :  { %v3551_v11 = vpack.c.bf16 %v7564_v8, %v7564_v8  ;;  %v3593_v13 = vmul.f32 %v7564_v8, %v7564_v8  ;;  %v3594_v17 = vpack.c.bf16 %v3592_v9, %v3592_v9  ;;  %v3674_v10 = vrot.slane %v4669_v63, %v7340_v47  ;;  %v6065_v63 = vld [vmem:[#allocation23] sm:$0xff]  }
0x19d8   :  { %v3544_v29 = vpop.f32.mrf.mxu0 }
0x19d9   :  { %3584 = vmatprep.mubr.bf16.mxu1 %v3551_v11  ;;  %v3595_v30 = vpack.c.bf16 %v3593_v13, %v3593_v13 }
0x19da   :  { %3585 = vmatmul.mubr.bf16.vlgmr.msra.gmra.mxu1 %v3550_v28  ;;  %v3691_v28 = vrot.slane %v4670_v1, %v7342_v58 }
0x19db   :  { %3628 = vmatprep.mubr.bf16.mxu0 %v3595_v30  ;;  %5085 = vmatpush3.bf16.msra.mxu1 %v6043_v59  ;;  %v3687_v30 = vrot.slane %v4670_v1, %v7340_v47  ;;  %v6066_v1 = vld [vmem:[#allocation31 + $0x38] sm:$0xff]  }
0x19dc   :  { %3629 = vmatmul.mubr.bf16.vlgmr.msra.gmra.mxu0 %v3594_v17  ;;  %5086 = vmatprep.subr.bf16.mxu1 %v6044_v50 }
0x19dd   :  { %5681 = vmatpush3.bf16.msra.mxu0 %v7436_v27  ;;  %5696 = vmatprep.mubr.msk.bf16.mxu0 %vm6605_vm0, %v6604_v0 }
0x19de   :  { %5682 = vmatprep.subr.bf16.mxu0 %v6604_v0 }
0x19df   :  { %5087 = vmatpush3.bf16.msra.mxu1 %v6045_v51 }
0x19e0   :  { %5088 = vmatprep.subr.bf16.mxu1 %v6046_v52 }
0x19e1   :  { %5683 = vmatpush3.bf16.msra.mxu0 %v7439_v31 }
0x19e2   :  { %5684 = vmatprep.subr.bf16.mxu0 %v6604_v0 }
0x19e3   :  { %5089 = vmatpush3.bf16.msra.mxu1 %v6047_v53 }
0x19e4   :  { %5090 = vmatprep.subr.bf16.mxu1 %v6048_v54 }
0x19e5   :  { %5685 = vmatpush3.bf16.msra.mxu0 %v7443_v15 }
0x19e6   :  { %5686 = vmatprep.subr.bf16.mxu0 %v6604_v0 }
0x19e7   :  { %5091 = vmatpush3.bf16.msra.mxu1 %v6049_v55 }
0x19e8   :  { %5092 = vmatprep.subr.bf16.mxu1 %v6050_v62 }
0x19e9   :  { %5687 = vmatpush3.bf16.msra.mxu0 %v7447_v32 }
0x19ea   :  { %5688 = vmatprep.subr.bf16.mxu0 %v6604_v0 }
0x19eb   :  { %5093 = vmatpush3.bf16.msra.mxu1 %v6051_v44 }
0x19ed   :  { %5689 = vmatpush3.bf16.msra.mxu0 %v7451_v20 }
0x19ee   :  { %5690 = vmatprep.subr.bf16.mxu0 %v6604_v0 }
0x19f1   :  { %5691 = vmatpush3.bf16.msra.mxu0 %v7455_v45 }
0x19f2   :  { %5692 = vmatprep.subr.bf16.mxu0 %v6604_v0 }
0x19f5   :  { %5693 = vmatpush3.bf16.msra.mxu0 %v7486_v46 }
0x19f6   :  { %5694 = vmatprep.subr.bf16.mxu0 %v6604_v0 }
0x19f9   :  { %5695 = vmatpush3.bf16.msra.mxu0 %v7492_v48 }
0x19fa   :  { %5720 = vmatprep.subr.bf16.mxu0 %v6604_v0 }
0x1a9a   :  { %v5056_v35 = vpop.f32.mrf.mxu1 }
0x1a9c   :  { %v5057_v23 = vpop.f32.mrf.mxu1  ;;  %v5078_v36 = vpop.f32.mrf.mxu0 }
0x1a9d   :  { %v5058_v37 = vadd.f32 %v5057_v23, %v5056_v35 }
0x1a9e   :  { %v5059_v38 = vpop.f32.mrf.mxu1  ;;  %v5079_v39 = vpop.f32.mrf.mxu0 }
0x1a9f   :  { %3638 = vperm.xlu1 %5836, %v5058_v37   ;;  %3642 = vperm.xlu0 %5835, %v5058_v37   ;;  %v5080_v43 = vadd.f32 %v5079_v39, %v5078_v36 }
0x1aa0   :  { %v5060_v40 = vpop.f32.mrf.mxu1  ;;  %v5081_v42 = vpop.f32.mrf.mxu0 }
0x1aa2   :  { %v5082_v5 = vpop.f32.mrf.mxu0 }
0x1aa3   :  { %5837 = vset.pattern.permute.xlu1 %v6607_v41  ;;  %5838 = vset.pattern.permute.xlu0 %v6606_v19 }
0x1aa4   :  { %3653 = vperm.xlu1 %5837, %v5080_v43   ;;  %3649 = vperm.xlu0 %5838, %v5080_v43  }
0x1aa8   :  { %5839 = vset.pattern.permute.xlu1 %v6606_v19  ;;  %v6052_v19 = vld [vmem:[#allocation22 + $0x50] sm:$0xff]  }
0x1aa9   :  { %5094 = vmatprep.subr.bf16.mxu1 %v6052_v19 }
0x1aaa   :  { %5095 = vmatpush3.bf16.msra.mxu1 %v6053_v56 }
0x1aab   :  { %5096 = vmatprep.subr.bf16.mxu1 %v6054_v57 }
0x1aae   :  { %5097 = vmatpush3.bf16.msra.mxu1 %v6055_v61 }
0x1aaf   :  { %5098 = vmatprep.subr.bf16.mxu1 %v6056_v14 }
0x1ab2   :  { %5099 = vmatpush3.bf16.msra.mxu1 %v6057_v33 }
0x1ab3   :  { %5700 = vmatprep.subr.bf16.mxu1 %v6604_v0 }
0x1b1a   :  { %v3639_v16 = vpop.permute.xlu1 %3638  ;;  %v3643_v22 = vpop.permute.xlu0 %3642 }
0x1b1b   :  { %v3658_v18 = vmul.f32 %v3639_v16, %v3639_v16  ;;  %v3659_v24 = vmul.f32 %v3643_v22, %v3643_v22  ;;  %v3663_v2 = vsub.f32 %v7564_v8, %v3643_v22  ;;  %v3662_v9 = vsub.f32 %v7562_v6, %v3639_v16 }
0x1b1f   :  { %v3654_v21 = vpop.permute.xlu1 %3653  ;;  %v3650_v25 = vpop.permute.xlu0 %3649 }
0x1b20   :  { %v3661_v60 = vsub.f32 %v3654_v21, %v3659_v24  ;;  %v3660_v12 = vsub.f32 %v3650_v25, %v3658_v18  ;;  %v6058_v24 = vld [vmem:[#allocation23 + $0x38] sm:$0xff]   ;;  %v6059_v21 = vld [vmem:[#allocation23 + $0x30] sm:$0xff]   ;;  %v6060_v25 = vld [vmem:[#allocation23 + $0x28] sm:$0xff]  }
0x1b22   :  { %v3665_v26 = vadd.f32 1e-05, %v3661_v60  ;;  %v3664_v34 = vadd.f32 1e-05, %v3660_v12  ;;  %v6061_v60 = vld [vmem:[#allocation23 + $0x20] sm:$0xff]   ;;  %v6062_v12 = vld [vmem:[#allocation23 + $0x18] sm:$0xff]  }
0x1b24   :  { %6126 = vrsqrt.f32 %v3665_v26  ;;  %v6063_v26 = vld [vmem:[#allocation23 + $0x10] sm:$0xff]  }
0x1b25   :  { %6128 = vrsqrt.f32 %v3664_v34  ;;  %v6064_v34 = vld [vmem:[#allocation23 + $0x8] sm:$0xff]  }
0x1b31   :  { %v6127_v7 = vpop.eup %6126 }
0x1b32   :  { %v6129_v11 = vpop.eup %6128  ;;  %v3669_v13 = vmul.f32 %v6127_v7, %v3663_v2  ;;  %v6067_v2 = vld [vmem:[#allocation31 + $0x30] sm:$0xff]   ;;  %v6069_v7 = vld [vmem:[#allocation31 + $0x20] sm:$0xff]  }
0x1b33   :  { %v3668_v29 = vmul.f32 %v6129_v11, %v3662_v9  ;;  %v6070_v9 = vld [vmem:[#allocation31 + $0x18] sm:$0xff]   ;;  %v6072_v11 = vld [vmem:[#allocation31 + $0x8] sm:$0xff]  }
0x1b34   :  { %v3682_v17 = vmul.f32 %v3678_v3, %v3669_v13  ;;  %v6068_v3 = vld [vmem:[#allocation31 + $0x28] sm:$0xff]  }
0x1b35   :  { %v3681_v35 = vmul.f32 %v3674_v10, %v3668_v29  ;;  %v6071_v10 = vld [vmem:[#allocation31 + $0x10] sm:$0xff]  }
0x1b36   :  { %v3695_v23 = vadd.f32 %v3691_v28, %v3682_v17 }
0x1b37   :  { %v3694_v36 = vadd.f32 %v3687_v30, %v3681_v35 }
0x1b38   :  { %v3699_v37 = vmul.f32 %v3695_v23, %v3695_v23  ;;  %v3697_v50 = vmul.f32 0.5, %v3695_v23 }
0x1b39   :  { %v3698_v8 = vmul.f32 %v3694_v36, %v3694_v36  ;;  %v3696_v51 = vmul.f32 0.5, %v3694_v36 }
0x1b3a   :  { %v3701_v38 = vmul.f32 %v3699_v37, %v3695_v23 }
0x1b3b   :  { %v3700_v39 = vmul.f32 %v3698_v8, %v3694_v36 }
0x1b3c   :  { %v3703_v40 = vmul.f32 0.044715, %v3701_v38 }
0x1b3d   :  { %v3702_v42 = vmul.f32 0.044715, %v3700_v39  ;;  %v4688_v39 = vld [vmem:[%s7722_s16 + $0x1] ss:$0 sm:$0xff] }
0x1b3e   :  { %v3705_v6 = vadd.f32 %v3703_v40, %v3695_v23 }
0x1b3f   :  { %v3704_v43 = vadd.f32 %v3702_v42, %v3694_v36  ;;  %v4689_v42 = vld [vmem:[%s7722_s16 + $0x2] ss:$0 sm:$0xff] }
0x1b40   :  { %v3707_v5 = vmul.f32 0.7978846, %v3705_v6 }
0x1b41   :  { %v3706_v49 = vmul.f32 0.7978846, %v3704_v43 }
0x1b42   :  { %6130 = vtanh.f32 %v3707_v5 }
0x1b43   :  { %6132 = vtanh.f32 %v3706_v49 }
0x1b4f   :  { %v6131_v58 = vpop.eup %6130 }
0x1b50   :  { %v6133_v59 = vpop.eup %6132  ;;  %v3711_v47 = vadd.f32 1.0, %v6131_v58 }
0x1b51   :  { %v3710_v52 = vadd.f32 1.0, %v6133_v59 }
0x1b52   :  { %v3713_v53 = vmul.f32 %v3711_v47, %v3697_v50 }
0x1b53   :  { %v3712_v54 = vmul.f32 %v3710_v52, %v3696_v51 }
0x1b54   :  { %v3747_v55 = vpack.c.bf16 %v3713_v53, %v3713_v53 }
0x1b55   :  { %v3746_v62 = vpack.c.bf16 %v3712_v54, %v3712_v54 }
0x1b56   :  { %3881 = vmatprep.mubr.bf16.mxu1 %v3747_v55  ;;  %v6073_v55 = vld [vmem:[#allocation31] sm:$0xff]  }
0x1b57   :  { %3882 = vmatmul.mubr.bf16.vlgmr.msra.gmra.mxu1 %v3746_v62  ;;  %v4690_v62 = vld [vmem:[%s7724_s18] ss:$0 sm:$0xff] }
0x1b58   :  { %5701 = vmatpush3.bf16.msra.mxu1 %v7436_v27  ;;  %5716 = vmatprep.mubr.msk.bf16.mxu1 %vm6605_vm0, %v6604_v0 }
0x1b59   :  { %5702 = vmatprep.subr.bf16.mxu1 %v6604_v0 }
0x1b5c   :  { %5703 = vmatpush3.bf16.msra.mxu1 %v7439_v31  ;;  %v4671_v31 = vld [vmem:[%s7722_s16] ss:$0 sm:$0xff] }
0x1b5d   :  { %5704 = vmatprep.subr.bf16.mxu1 %v6604_v0 }
0x1b60   :  { %5705 = vmatpush3.bf16.msra.mxu1 %v7443_v15 }
0x1b61   :  { %5706 = vmatprep.subr.bf16.mxu1 %v6604_v0 }
0x1b64   :  { %5707 = vmatpush3.bf16.msra.mxu1 %v7447_v32 }
0x1b65   :  { %5708 = vmatprep.subr.bf16.mxu1 %v6604_v0 }
0x1b68   :  { %5709 = vmatpush3.bf16.msra.mxu1 %v7451_v20 }
0x1b69   :  { %5710 = vmatprep.subr.bf16.mxu1 %v6604_v0 }
0x1b6c   :  { %5711 = vmatpush3.bf16.msra.mxu1 %v7455_v45 }
0x1b6d   :  { %5712 = vmatprep.subr.bf16.mxu1 %v6604_v0 }
0x1b70   :  { %5713 = vmatpush3.bf16.msra.mxu1 %v7486_v46 }
0x1b71   :  { %5714 = vmatprep.subr.bf16.mxu1 %v6604_v0 }
0x1b74   :  { %5715 = vmatpush3.bf16.msra.mxu1 %v7492_v48 }
0x1b75   :  { %5740 = vmatprep.subr.bf16.mxu1 %v6604_v0 }
0x1c17   :  { %v5100_v27 = vpop.f32.mrf.mxu1 }
0x1c19   :  { %v5101_v15 = vpop.f32.mrf.mxu1 }
0x1c1a   :  { %v5102_v32 = vadd.f32 %v5101_v15, %v5100_v27 }
0x1c1b   :  { %v5103_v20 = vpop.f32.mrf.mxu1 }
0x1c1c   :  { %v7629_v44 = vadd.f32 %v5102_v32, %v4671_v31 }
0x1c1d   :  { %v5104_v45 = vpop.f32.mrf.mxu1 }
0x1c1e   :  { %v3891_v46 = vpack.c.bf16 %v7629_v44, %v7629_v44  ;;  %v3932_v19 = vmul.f32 %v7629_v44, %v7629_v44 }
0x1c20   :  { %5697 = vmatmul.mubr.bf16.vlgmr.msra.gmra.mxu0 %v3891_v46  ;;  %v3933_v48 = vpack.c.bf16 %v3932_v19, %v3932_v19 }
0x1c21   :  { %5736 = vmatprep.mubr.msk.bf16.mxu0 %vm6605_vm0, %v6604_v0  ;;  %5721 = vmatpush3.bf16.msra.mxu0 %v6058_v24  ;;  %v6076_v24 = vld [vmem:[#allocation25 + $0x28] sm:$0xff]  }
0x1c22   :  { %5717 = vmatmul.mubr.bf16.vlgmr.msra.gmra.mxu1 %v3933_v48  ;;  %5722 = vmatprep.subr.bf16.mxu0 %v6604_v0 }
0x1c23   :  { %5756 = vmatprep.mubr.msk.bf16.mxu1 %vm6605_vm0, %v6604_v0  ;;  %5741 = vmatpush3.bf16.msra.mxu1 %v6066_v1 }
0x1c24   :  { %5742 = vmatprep.subr.bf16.mxu1 %v6604_v0 }
0x1c25   :  { %5723 = vmatpush3.bf16.msra.mxu0 %v6059_v21  ;;  %v6077_v21 = vld [vmem:[#allocation25 + $0x20] sm:$0xff]  }
0x1c26   :  { %5724 = vmatprep.subr.bf16.mxu0 %v6604_v0 }
0x1c27   :  { %5743 = vmatpush3.bf16.msra.mxu1 %v6067_v2 }
0x1c28   :  { %5744 = vmatprep.subr.bf16.mxu1 %v6604_v0 }
0x1c29   :  { %5725 = vmatpush3.bf16.msra.mxu0 %v6060_v25  ;;  %v6078_v25 = vld [vmem:[#allocation25 + $0x18] sm:$0xff]  }
0x1c2a   :  { %5726 = vmatprep.subr.bf16.mxu0 %v6604_v0 }
0x1c2b   :  { %5745 = vmatpush3.bf16.msra.mxu1 %v6068_v3 }
0x1c2c   :  { %5746 = vmatprep.subr.bf16.mxu1 %v6604_v0 }
0x1c2d   :  { %5727 = vmatpush3.bf16.msra.mxu0 %v6061_v60  ;;  %v6079_v60 = vld [vmem:[#allocation25 + $0x10] sm:$0xff]  }
0x1c2e   :  { %5728 = vmatprep.subr.bf16.mxu0 %v6604_v0 }
0x1c2f   :  { %5747 = vmatpush3.bf16.msra.mxu1 %v6069_v7 }
0x1c30   :  { %5748 = vmatprep.subr.bf16.mxu1 %v6604_v0 }
0x1c31   :  { %5729 = vmatpush3.bf16.msra.mxu0 %v6062_v12  ;;  %v6081_v12 = vld [vmem:[#allocation25] sm:$0xff]  }
0x1c32   :  { %5730 = vmatprep.subr.bf16.mxu0 %v6604_v0 }
0x1c33   :  { %5749 = vmatpush3.bf16.msra.mxu1 %v6070_v9 }
0x1c34   :  { %5750 = vmatprep.subr.bf16.mxu1 %v6604_v0 }
0x1c35   :  { %5731 = vmatpush3.bf16.msra.mxu0 %v6063_v26 }
0x1c36   :  { %5732 = vmatprep.subr.bf16.mxu0 %v6604_v0 }
0x1c37   :  { %5751 = vmatpush3.bf16.msra.mxu1 %v6071_v10 }
0x1c38   :  { %5752 = vmatprep.subr.bf16.mxu1 %v6604_v0 }
0x1c39   :  { %5733 = vmatpush3.bf16.msra.mxu0 %v6064_v34 }
0x1c3a   :  { %5734 = vmatprep.subr.bf16.mxu0 %v6604_v0 }
0x1c3b   :  { %5753 = vmatpush3.bf16.msra.mxu1 %v6072_v11 }
0x1c3c   :  { %5754 = vmatprep.subr.bf16.mxu1 %v6604_v0 }
0x1c3d   :  { %5735 = vmatpush3.bf16.msra.mxu0 %v6065_v63 }
0x1c3e   :  { %5760 = vmatprep.subr.bf16.mxu0 %v6604_v0 }
0x1c3f   :  { %5755 = vmatpush3.bf16.msra.mxu1 %v6073_v55 }
0x1c40   :  { %5780 = vmatprep.subr.bf16.mxu1 %v6604_v0 }
0x1ce0   :  { %v3926_v56 = vpop.f32.mrf.mxu0 }
0x1ce1   :  { %3976 = vperm.xlu1 %5839, %v3926_v56  }
0x1ce2   :  { %v5698_v57 = vpop.f32.mrf.mxu0  ;;  %v3968_v61 = vpop.f32.mrf.mxu1 }
0x1ce3   :  { %3986 = vperm.xlu0 %5838, %v3968_v61  }
0x1ce4   :  { %v3929_v14 = vpop.f32.mrf.mxu0  ;;  %v5718_v33 = vpop.f32.mrf.mxu1 }
0x1ce5   :  { %5840 = vset.pattern.permute.xlu1 %v6607_v41 }
0x1ce6   :  { %v3971_v16 = vpop.f32.mrf.mxu1  ;;  %3980 = vperm.xlu1 %5840, %v3926_v56   ;;  %v5699_v22 = vpop.f32.mrf.mxu0 }
0x1ce7   :  { %v6074_v22 = vld [vmem:[#allocation25 + $0x38] sm:$0xff]  }
0x1ce8   :  { %v5719_v18 = vpop.f32.mrf.mxu1 }
0x1ce9   :  { %v6075_v18 = vld [vmem:[#allocation25 + $0x30] sm:$0xff]  }
0x1cea   :  { %3990 = vperm.xlu1 %5840, %v3968_v61  }
0x1d5c   :  { %v3977_v13 = vpop.permute.xlu1 %3976 }
0x1d5e   :  { %v3987_v30 = vpop.permute.xlu0 %3986 }
0x1d61   :  { %v3981_v28 = vpop.permute.xlu1 %3980 }
0x1d62   :  { %v3983_v29 = vsel %vm3350_vm1, %v3977_v13, %v3981_v28 }
0x1d63   :  { %v3994_v17 = vmul.f32 %v3983_v29, %v3983_v29  ;;  %v3996_v8 = vsub.f32 %v7629_v44, %v3983_v29  ;;  %v4708_v29 = vld [vmem:[%s7724_s18 + $0x2] ss:$0 sm:$0xff] }
0x1d65   :  { %v3991_v35 = vpop.permute.xlu1 %3990 }
0x1d66   :  { %v3993_v23 = vsel %vm3350_vm1, %v3987_v30, %v3991_v35 }
0x1d67   :  { %v3995_v36 = vsub.f32 %v3993_v23, %v3994_v17 }
0x1d69   :  { %v3997_v37 = vadd.f32 1e-05, %v3995_v36 }
0x1d6b   :  { %6134 = vrsqrt.f32 %v3997_v37 }
0x1d78   :  { %v6135_v38 = vpop.eup %6134 }
0x1d79   :  { %v3999_v40 = vmul.f32 %v6135_v38, %v3996_v8 }
0x1d7b   :  { %v4004_v6 = vmul.f32 %v4688_v39, %v3999_v40 }
0x1d7d   :  { %v4009_v43 = vadd.f32 %v4689_v42, %v4004_v6 }
0x1d7f   :  { %v4011_v5 = vmul.f32 %v4009_v43, %v4009_v43  ;;  %v4010_v51 = vmul.f32 0.5, %v4009_v43 }
0x1d81   :  { %v4012_v49 = vmul.f32 %v4011_v5, %v4009_v43 }
0x1d83   :  { %v4013_v58 = vmul.f32 0.044715, %v4012_v49 }
0x1d85   :  { %v4014_v59 = vadd.f32 %v4013_v58, %v4009_v43  ;;  %v4709_v43 = vld [vmem:[%s7726_s20] ss:$0 sm:$0xff] }
0x1d87   :  { %v4015_v50 = vmul.f32 0.7978846, %v4014_v59 }
0x1d89   :  { %6136 = vtanh.f32 %v4015_v50 }
0x1d96   :  { %v6137_v47 = vpop.eup %6136 }
0x1d97   :  { %v4017_v52 = vadd.f32 1.0, %v6137_v47 }
0x1d99   :  { %v4018_v53 = vmul.f32 %v4017_v52, %v4010_v51 }
0x1d9b   :  { %v4035_v54 = vpack.c.bf16 %v4018_v53, %v4018_v53 }
0x1d9d   :  { %5737 = vmatmul.mubr.bf16.vlgmr.msra.gmra.mxu0 %v4035_v54 }
0x1d9e   :  { %5761 = vmatpush3.bf16.msra.mxu0 %v6066_v1  ;;  %5776 = vmatprep.mubr.msk.bf16.mxu0 %vm6605_vm0, %v6604_v0 }
0x1d9f   :  { %5762 = vmatprep.subr.bf16.mxu0 %v6604_v0 }
0x1da2   :  { %5763 = vmatpush3.bf16.msra.mxu0 %v6067_v2 }
0x1da3   :  { %5764 = vmatprep.subr.bf16.mxu0 %v6604_v0 }
0x1da6   :  { %5765 = vmatpush3.bf16.msra.mxu0 %v6068_v3 }
0x1da7   :  { %5766 = vmatprep.subr.bf16.mxu0 %v6604_v0 }
0x1daa   :  { %5767 = vmatpush3.bf16.msra.mxu0 %v6069_v7 }
0x1dab   :  { %5768 = vmatprep.subr.bf16.mxu0 %v6604_v0 }
0x1dae   :  { %5769 = vmatpush3.bf16.msra.mxu0 %v6070_v9 }
0x1daf   :  { %5770 = vmatprep.subr.bf16.mxu0 %v6604_v0 }
0x1db2   :  { %5771 = vmatpush3.bf16.msra.mxu0 %v6071_v10 }
0x1db3   :  { %5772 = vmatprep.subr.bf16.mxu0 %v6604_v0 }
0x1db6   :  { %5773 = vmatpush3.bf16.msra.mxu0 %v6072_v11 }
0x1db7   :  { %5774 = vmatprep.subr.bf16.mxu0 %v6604_v0 }
0x1dba   :  { %5775 = vmatpush3.bf16.msra.mxu0 %v6073_v55 }
0x1e5d   :  { %v4123_v27 = vpop.f32.mrf.mxu0 }
0x1e5e   :  { %v4124_v31 = vadd.f32 %v4690_v62, %v4123_v27 }
0x1e5f   :  { %v5738_v15 = vpop.f32.mrf.mxu0 }
0x1e60   :  { %v4147_v32 = vpack.c.bf16 %v4124_v31, %v4124_v31  ;;  %v4236_v20 = vmul.f32 %v4124_v31, %v4124_v31 }
0x1e61   :  { %v4126_v44 = vpop.f32.mrf.mxu0 }
0x1e62   :  { %v4237_v45 = vpack.c.bf16 %v4236_v20, %v4236_v20  ;;  %5757 = vmatmul.mubr.bf16.vlgmr.msra.gmra.mxu1 %v4147_v32 }
0x1e63   :  { %v5739_v46 = vpop.f32.mrf.mxu0  ;;  %5796 = vmatprep.mubr.msk.bf16.mxu1 %vm6605_vm0, %v6604_v0  ;;  %5781 = vmatpush3.bf16.msra.mxu1 %v6074_v22 }
0x1e64   :  { %5777 = vmatmul.mubr.bf16.vlgmr.msra.gmra.mxu0 %v4237_v45  ;;  %5782 = vmatprep.subr.bf16.mxu1 %v6604_v0 }
0x1e67   :  { %5783 = vmatpush3.bf16.msra.mxu1 %v6075_v18 }
0x1e68   :  { %5784 = vmatprep.subr.bf16.mxu1 %v6604_v0 }
0x1e6b   :  { %5785 = vmatpush3.bf16.msra.mxu1 %v6076_v24 }
0x1e6c   :  { %5786 = vmatprep.subr.bf16.mxu1 %v6604_v0 }
0x1e6f   :  { %5787 = vmatpush3.bf16.msra.mxu1 %v6077_v21 }
0x1e70   :  { %5788 = vmatprep.subr.bf16.mxu1 %v6604_v0 }
0x1e73   :  { %5789 = vmatpush3.bf16.msra.mxu1 %v6078_v25 }
0x1e74   :  { %5790 = vmatprep.subr.bf16.mxu1 %v6604_v0 }
0x1e77   :  { %5791 = vmatpush3.bf16.msra.mxu1 %v6079_v60 }
0x1e78   :  { %5792 = vmatprep.subr.bf16.mxu1 %v6604_v0 }
0x1f22   :  { %v4230_v19 = vpop.f32.mrf.mxu1 }
0x1f23   :  { %4284 = vperm.xlu1 %5840, %v4230_v19   ;;  %4280 = vperm.xlu0 %5838, %v4230_v19  }
0x1f24   :  { %v5758_v48 = vpop.f32.mrf.mxu1  ;;  %v4272_v56 = vpop.f32.mrf.mxu0 }
0x1f26   :  { %v4233_v57 = vpop.f32.mrf.mxu1  ;;  %v5778_v61 = vpop.f32.mrf.mxu0 }
0x1f27   :  { %4294 = vperm.xlu1 %5840, %v4272_v56   ;;  %4290 = vperm.xlu0 %5838, %v4272_v56  }
0x1f28   :  { %v5759_v14 = vpop.f32.mrf.mxu1  ;;  %v4275_v33 = vpop.f32.mrf.mxu0 }
0x1f2a   :  { %v5779_v16 = vpop.f32.mrf.mxu0 }
0x1f2b   :  { %5841 = vset.pattern.permute.xlu0 %v6607_v41  ;;  %v6080_v41 = vld [vmem:[#allocation25 + $0x8] sm:$0xff]  }
0x1f2c   :  { %5793 = vmatpush3.bf16.msra.mxu1 %v6080_v41 }
0x1f2d   :  { %5794 = vmatprep.subr.bf16.mxu1 %v6604_v0  ;;  %v4707_v0 = vld [vmem:[%s7724_s18 + $0x1] ss:$0 sm:$0xff]  ;;  %s6608_s18 = smov [#allocation32]  }
0x1f2e   :  { %s4445_s7 = sshll.u32 %s6608_s18, 4  ;;  %s4446_s7 = int_to_ptr.vmem [resolvable:$true] %s4445_s7 }
0x1f2f   :  { %s6539_s25 = scalar_lea.vmem %s4446_s7, 128  ;;  %p6544_p12 = scmp.lt.s32.totalorder %s4446_s7, %s4446_s7 }
0x1f30   :  { %5795 = vmatpush3.bf16.msra.mxu1 %v6081_v12  ;;  %p6540_p11 = scmp.ne.s32.totalorder %s4446_s7, %s6539_s25  ;;  %p6545_p13 = scmp.lt.s32.totalorder %s6539_s25, %s6539_s25 }
0x1f32   :  { %p6546_p0 = por %p6545_p13, %p6544_p12 }
0x1f34   :  { %p6547_p1 = pnand %p6546_p0, %p6540_p11 }
0x1f9e   :  { %v4285_v26 = vpop.permute.xlu1 %4284  ;;  %v4281_v34 = vpop.permute.xlu0 %4280 }
0x1f9f   :  { %v4287_v63 = vsel %vm3350_vm1, %v4281_v34, %v4285_v26 }
0x1fa0   :  { %v4298_v1 = vmul.f32 %v4287_v63, %v4287_v63  ;;  %v4300_v11 = vsub.f32 %v4124_v31, %v4287_v63 }
0x1fa2   :  { %v4295_v2 = vpop.permute.xlu1 %4294  ;;  %v4291_v3 = vpop.permute.xlu0 %4290 }
0x1fa3   :  { %v4297_v7 = vsel %vm3350_vm1, %v4291_v3, %v4295_v2 }
0x1fa4   :  { %v4299_v9 = vsub.f32 %v4297_v7, %v4298_v1 }
0x1fa6   :  { %v4301_v10 = vadd.f32 1e-05, %v4299_v9 }
0x1fa8   :  { %6138 = vrsqrt.f32 %v4301_v10 }
0x1fb5   :  { %v6139_v13 = vpop.eup %6138 }
0x1fb6   :  { %v4303_v28 = vmul.f32 %v6139_v13, %v4300_v11 }
0x1fb8   :  { %v4308_v30 = vmul.f32 %v4707_v0, %v4303_v28 }
0x1fba   :  { %v4313_v17 = vadd.f32 %v4708_v29, %v4308_v30 }
0x1fbc   :  { %v4315_v35 = vmul.f32 %v4313_v17, %v4313_v17  ;;  %v4314_v39 = vmul.f32 0.5, %v4313_v17 }
0x1fbe   :  { %v4316_v23 = vmul.f32 %v4315_v35, %v4313_v17 }
0x1fc0   :  { %v4317_v36 = vmul.f32 0.044715, %v4316_v23 }
0x1fc2   :  { %v4318_v37 = vadd.f32 %v4317_v36, %v4313_v17 }
0x1fc4   :  { %v4319_v8 = vmul.f32 0.7978846, %v4318_v37 }
0x1fc6   :  { %6140 = vtanh.f32 %v4319_v8 }
0x1fd3   :  { %v6141_v38 = vpop.eup %6140 }
0x1fd4   :  { %v4321_v40 = vadd.f32 1.0, %v6141_v38 }
0x1fd6   :  { %v4322_v42 = vmul.f32 %v4321_v40, %v4314_v39 }
0x1fd8   :  { %v4339_v6 = vpack.c.bf16 %v4322_v42, %v4322_v42 }
0x1fda   :  { %5797 = vmatmul.mubr.bf16.vlgmr.msra.gmra.mxu1 %v4339_v6 }
0x209a   :  { %v4429_v5 = vpop.f32.mrf.mxu1 }
0x209b   :  { %v4430_v49 = vadd.f32 %v4709_v43, %v4429_v5 }
0x209c   :  { %v5798_v58 = vpop.f32.mrf.mxu1 }
0x209d   :  { %6142 = vtanh.f32 %v4430_v49 }
0x209e   :  { %v4432_v59 = vpop.f32.mrf.mxu1 }
0x20a0   :  { %v5799_v50 = vpop.f32.mrf.mxu1 }
0x20aa   :  { %v6143_v47 = vpop.eup %6142 }
0x20ab   :  { %v4437_v51 = vsel %vm4435_vm2, %v6143_v47, %v4430_v49 }
0x20ac   :  { %4438 = vst [vmem:[#allocation32] sm:$0xff] %v4437_v51 }
0x20ad   :  { %6550 = shalt.err (!%p6547_p1)
}
0x20ae   :  { %s7753_s10 = sld [smem:[#allocation54_spill]] }
0x20b4   :  { %4448 = dma.vmem_to_hbm [thread:$0]  %s4446_s7, 128, %s7753_s10, [#allocation4]  }
0x20b5   :  { %6579 = dma.done.wait [#allocation4], 128  }
0x20b6   :  { %6580 = vsyncadd [#allocation4], 4294967168 }
0x20b7   :  { %4452 = vsyncpa [#allocation3], 1 }
0x20b8   :  { %4453 = vsyncpa [#allocation6], 1 }
0x20b9   :  { %4454 = vsyncpa [#allocation9], 1 }
0x20ba   :  { %4455 = vsyncpa [#allocation12], 1 }
0x20bb   :  { %4456 = vsyncpa [#allocation15], 1 }
0x20bc   :  { %4457 = vsyncpa [#allocation18], 1 }
0x20bd   :  { %4458 = vsyncpa [#allocation21], 1 }
0x20be   :  { %4459 = vsyncpa [#allocation24], 1 }
0x20bf   :  { %4460 = vsyncpa [#allocation27], 1 }
0x20c0   :  { %4461 = vsyncpa [#allocation30], 1 }
0x20c1   :  { %4462 = vsyncpa [#allocation4], 1 }

</bundles_post_ra>
